<compile_context>
chip_gen: v7x
topology: tpu7x:2x2x1
jax: 0.10.0
libtpu: 0.0.40
codegen_flags: <defaults>
</compile_context>

<pallas_src>
import jax
import jax.numpy as jnp
from jax.experimental import pallas as pl
from jax.experimental.pallas import tpu as pltpu

INPUT_DIM = 32 * 32 * 3   # 3072
HIDDEN_1 = 512
HIDDEN_2 = 256
OUTPUT_DIM = 10
OUT_PAD = 128             # lane-dense padded output width

BATCH_TILE_LARGE = 256    # fills the 256-row MXU on v6e/v7x
BATCH_TILE_SMALL = 128    # fallback for small batches


def _choose_batch_tile(batch):
    """Pick the batch tile: 256 when it still yields a >=2-step grid
    (so v7x's two TensorCores both get work and step overhead is amortized),
    otherwise 128."""
    if batch >= 2 * BATCH_TILE_LARGE:
        return BATCH_TILE_LARGE
    return BATCH_TILE_SMALL


def _mlp_kernel(x_ref, w1_ref, b1_ref, w2_ref, b2_ref, w3_ref, b3_ref, o_ref):
    # x arrives f32; cast to bf16 on the VPU (MXU is the busy unit here).
    x_bf = x_ref[...].astype(jnp.bfloat16)
    # Layer 1: (TB, 3072)bf16 @ (3072, 512)bf16 -> f32 acc, bias + ReLU in f32
    h1 = jnp.dot(x_bf, w1_ref[...], preferred_element_type=jnp.float32)
    h1 = jnp.maximum(h1 + b1_ref[...], 0.0)
    # Layer 2: (TB, 512) @ (512, 256) -> f32 acc, bias + ReLU in f32
    h2 = jnp.dot(h1.astype(jnp.bfloat16), w2_ref[...],
                 preferred_element_type=jnp.float32)
    h2 = jnp.maximum(h2 + b2_ref[...], 0.0)
    # Layer 3: (TB, 256) @ (256, 128 padded) -> f32 acc, bias; lane-dense store
    out = jnp.dot(h2.astype(jnp.bfloat16), w3_ref[...],
                  preferred_element_type=jnp.float32)
    o_ref[...] = (out + b3_ref[...]).astype(o_ref.dtype)


def pack_params(params):
    """One-time packing of f32 params into the kernel's layout:
    bf16 weights (in, out) and f32 biases, with W3/b3 zero-padded to 128
    output columns for lane-dense layer-3 matmul / unmasked output stores."""
    w1, b1, w2, b2, w3, b3 = params
    w1_bf = w1.astype(jnp.bfloat16)
    w2_bf = w2.astype(jnp.bfloat16)
    w3_p = jnp.pad(w3, ((0, 0), (0, OUT_PAD - OUTPUT_DIM))).astype(jnp.bfloat16)
    b3_p = jnp.pad(b3, ((0, 0), (0, OUT_PAD - OUTPUT_DIM))).astype(jnp.float32)
    return (w1_bf, b1.astype(jnp.float32), w2_bf, b2.astype(jnp.float32),
            w3_p, b3_p)


def logistic_regression_forward(x, packed_params):
    """x: (B, 3, 32, 32) float32 NCHW. packed_params: from pack_params().
    Returns logits (B, 10) float32."""
    w1_bf, b1, w2_bf, b2, w3_p, b3_p = packed_params
    B = x.shape[0]
    # Same semantics as torch .view(-1, 3072) on contiguous NCHW input.
    x_flat = x.reshape(B, INPUT_DIM).astype(jnp.float32)

    tb = _choose_batch_tile(B)
    pad = (-B) % tb
    if pad:
        x_flat = jnp.pad(x_flat, ((0, pad), (0, 0)))
    Bp = x_flat.shape[0]
    grid = (Bp // tb,)

    # Grid-invariant weights/biases: single-buffer (constant index_map).
    def const_spec(shape):
        return pl.BlockSpec(shape, lambda i: (0, 0),
                            pipeline_mode=pl.Buffered(1))

    out = pl.pallas_call(
        _mlp_kernel,
        out_shape=jax.ShapeDtypeStruct((Bp, OUT_PAD), jnp.float32),
        grid_spec=pltpu.PrefetchScalarGridSpec(
            num_scalar_prefetch=0,
            grid=grid,
            in_specs=[
                pl.BlockSpec((tb, INPUT_DIM), lambda i: (i, 0)),  # x tile (f32)
                const_spec((INPUT_DIM, HIDDEN_1)),                # W1 bf16
                const_spec((1, HIDDEN_1)),                        # b1 f32
                const_spec((HIDDEN_1, HIDDEN_2)),                 # W2 bf16
                const_spec((1, HIDDEN_2)),                        # b2 f32
                const_spec((HIDDEN_2, OUT_PAD)),                  # W3 (padded) bf16
                const_spec((1, OUT_PAD)),                         # b3 (padded) f32
            ],
            out_specs=pl.BlockSpec((tb, OUT_PAD), lambda i: (i, 0)),
        ),
        compiler_params=pltpu.CompilerParams(
            dimension_semantics=("parallel",),
            vmem_limit_bytes=32 << 20,   # ~10 MiB actual footprint at TB=256
        ),
    )(x_flat, w1_bf, b1, w2_bf, b2, w3_p, b3_p)

    return out[:B, :OUTPUT_DIM]


def init_params(key):
    """Deterministic init mirroring nn.Linear's U(-1/sqrt(fan_in), 1/sqrt(fan_in)).

    Weights are stored as (in_features, out_features) — i.e. already the
    transpose of PyTorch's (out, in) layout — so the kernel does x @ W.
    """
    ks = jax.random.split(key, 6)

    def linear(kw, kb, fan_in, fan_out):
        bound = 1.0 / jnp.sqrt(fan_in)
        w = jax.random.uniform(kw, (fan_in, fan_out), jnp.float32, -bound, bound)
        b = jax.random.uniform(kb, (1, fan_out), jnp.float32, -bound, bound)
        return w, b

    w1, b1 = linear(ks[0], ks[1], INPUT_DIM, HIDDEN_1)
    w2, b2 = linear(ks[2], ks[3], HIDDEN_1, HIDDEN_2)
    w3, b3 = linear(ks[4], ks[5], HIDDEN_2, OUTPUT_DIM)
    return (w1, b1, w2, b2, w3, b3)


def _reference_forward(x, params):
    """Plain-JAX reference matching the kernel's precision recipe
    (bf16 matmul operands, f32 accumulation, f32 bias/ReLU)."""
    w1, b1, w2, b2, w3, b3 = params
    bf = jnp.bfloat16
    xf = x.reshape(x.shape[0], INPUT_DIM)
    h1 = jnp.dot(xf.astype(bf), w1.astype(bf),
                 preferred_element_type=jnp.float32) + b1
    h1 = jnp.maximum(h1, 0.0)
    h2 = jnp.dot(h1.astype(bf), w2.astype(bf),
                 preferred_element_type=jnp.float32) + b2
    h2 = jnp.maximum(h2, 0.0)
    return jnp.dot(h2.astype(bf), w3.astype(bf),
                   preferred_element_type=jnp.float32) + b3


if __name__ == "__main__":
    key = jax.random.PRNGKey(0)
    k_param, k_x = jax.random.split(key)

    params = init_params(k_param)
    packed = pack_params(params)   # one-time weight cast/pad, outside the hot path

    # Small CIFAR-shaped batch: (B, C, H, W) = (4, 3, 32, 32)
    x = jax.random.normal(k_x, (4, 3, 32, 32), dtype=jnp.float32)

    logits = logistic_regression_forward(x, packed)
    logits = jax.block_until_ready(logits)

    ref = _reference_forward(x, params)
    assert logits.shape == (4, OUTPUT_DIM), logits.shape
    assert jnp.allclose(logits, ref, atol=1e-2, rtol=1e-2), "mismatch vs reference"

    print("KERNEL_OK")
</pallas_src>

<mosaic_0001>
module attributes {stable_mosaic.version = 11 : i64} {
  func.func @_mlp_kernel(%arg0: i32, %arg1: memref<128x3072xf32, #tpu.memory_space<vmem>>, %arg2: memref<3072x512xbf16, #tpu.memory_space<vmem>>, %arg3: memref<1x512xf32, #tpu.memory_space<vmem>>, %arg4: memref<512x256xbf16, #tpu.memory_space<vmem>>, %arg5: memref<1x256xf32, #tpu.memory_space<vmem>>, %arg6: memref<256x128xbf16, #tpu.memory_space<vmem>>, %arg7: memref<1x128xf32, #tpu.memory_space<vmem>>, %arg8: memref<128x128xf32, #tpu.memory_space<vmem>>) attributes {dimension_semantics = [#tpu.dimension_semantics<parallel>], iteration_bounds = array<i64: 1>, scalar_prefetch = 0 : i64, scratch_operands = 0 : i64, tpu.core_type = #tpu.core_type<tc>, window_params = [{transform_indices = @transform_0, window_bounds = array<i64: 128, 3072>}, {pipeline_mode = #tpu.pipeline_mode<synchronous>, transform_indices = @transform_1, window_bounds = array<i64: 3072, 512>}, {pipeline_mode = #tpu.pipeline_mode<synchronous>, transform_indices = @transform_2, window_bounds = array<i64: 1, 512>}, {pipeline_mode = #tpu.pipeline_mode<synchronous>, transform_indices = @transform_3, window_bounds = array<i64: 512, 256>}, {pipeline_mode = #tpu.pipeline_mode<synchronous>, transform_indices = @transform_4, window_bounds = array<i64: 1, 256>}, {pipeline_mode = #tpu.pipeline_mode<synchronous>, transform_indices = @transform_5, window_bounds = array<i64: 256, 128>}, {pipeline_mode = #tpu.pipeline_mode<synchronous>, transform_indices = @transform_6, window_bounds = array<i64: 1, 128>}, {transform_indices = @transform_7, window_bounds = array<i64: 128, 128>}]} {
    %c0 = arith.constant 0 : index
    %c0_0 = arith.constant 0 : index
    %0 = vector.load %arg1[%c0, %c0_0] : memref<128x3072xf32, #tpu.memory_space<vmem>>, vector<128x3072xf32>
    %1 = arith.truncf %0 : vector<128x3072xf32> to vector<128x3072xbf16>
    %c0_1 = arith.constant 0 : index
    %c0_2 = arith.constant 0 : index
    %2 = vector.load %arg2[%c0_1, %c0_2] : memref<3072x512xbf16, #tpu.memory_space<vmem>>, vector<3072x512xbf16>
    %cst = arith.constant dense<0.000000e+00> : vector<128x512xf32>
    %3 = tpu.matmul %1, %2, %cst {dimension_numbers = #tpu.dot_dimension_numbers<[1], [0], [0], [1], [0, 0, 1, 1], [], []>} : vector<128x3072xbf16>, vector<3072x512xbf16>, vector<128x512xf32> -> vector<128x512xf32>
    %c0_3 = arith.constant 0 : index
    %c0_4 = arith.constant 0 : index
    %4 = vector.load %arg3[%c0_3, %c0_4] : memref<1x512xf32, #tpu.memory_space<vmem>>, vector<1x512xf32>
    %5 = vector.broadcast %4 : vector<1x512xf32> to vector<128x512xf32>
    %6 = arith.addf %3, %5 : vector<128x512xf32>
    %cst_5 = arith.constant 0.000000e+00 : f32
    %7 = vector.broadcast %cst_5 : f32 to vector<128x512xf32>
    %8 = arith.maximumf %6, %7 : vector<128x512xf32>
    %9 = arith.truncf %8 : vector<128x512xf32> to vector<128x512xbf16>
    %c0_6 = arith.constant 0 : index
    %c0_7 = arith.constant 0 : index
    %10 = vector.load %arg4[%c0_6, %c0_7] : memref<512x256xbf16, #tpu.memory_space<vmem>>, vector<512x256xbf16>
    %cst_8 = arith.constant dense<0.000000e+00> : vector<128x256xf32>
    %11 = tpu.matmul %9, %10, %cst_8 {dimension_numbers = #tpu.dot_dimension_numbers<[1], [0], [0], [1], [0, 0, 1, 1], [], []>} : vector<128x512xbf16>, vector<512x256xbf16>, vector<128x256xf32> -> vector<128x256xf32>
    %c0_9 = arith.constant 0 : index
    %c0_10 = arith.constant 0 : index
    %12 = vector.load %arg5[%c0_9, %c0_10] : memref<1x256xf32, #tpu.memory_space<vmem>>, vector<1x256xf32>
    %13 = vector.broadcast %12 : vector<1x256xf32> to vector<128x256xf32>
    %14 = arith.addf %11, %13 : vector<128x256xf32>
    %cst_11 = arith.constant 0.000000e+00 : f32
    %15 = vector.broadcast %cst_11 : f32 to vector<128x256xf32>
    %16 = arith.maximumf %14, %15 : vector<128x256xf32>
    %17 = arith.truncf %16 : vector<128x256xf32> to vector<128x256xbf16>
    %c0_12 = arith.constant 0 : index
    %c0_13 = arith.constant 0 : index
    %18 = vector.load %arg6[%c0_12, %c0_13] : memref<256x128xbf16, #tpu.memory_space<vmem>>, vector<256x128xbf16>
    %cst_14 = arith.constant dense<0.000000e+00> : vector<128x128xf32>
    %19 = tpu.matmul %17, %18, %cst_14 {dimension_numbers = #tpu.dot_dimension_numbers<[1], [0], [0], [1], [0, 0, 1, 1], [], []>} : vector<128x256xbf16>, vector<256x128xbf16>, vector<128x128xf32> -> vector<128x128xf32>
    %c0_15 = arith.constant 0 : index
    %c0_16 = arith.constant 0 : index
    %20 = vector.load %arg7[%c0_15, %c0_16] : memref<1x128xf32, #tpu.memory_space<vmem>>, vector<1x128xf32>
    %21 = vector.broadcast %20 : vector<1x128xf32> to vector<128x128xf32>
    %22 = arith.addf %19, %21 : vector<128x128xf32>
    %c0_17 = arith.constant 0 : index
    %c0_18 = arith.constant 0 : index
    %23 = vector.load %arg8[%c0_17, %c0_18] : memref<128x128xf32, #tpu.memory_space<vmem>>, vector<128x128xf32>
    tpu.vector_store %arg8[%c0_17, %c0_18], %22 {strides = array<i32>} : memref<128x128xf32, #tpu.memory_space<vmem>>, vector<128x128xf32>,
    return
  }
  func.func @transform_0(%arg0: i32) -> (i32, i32) {
    %c0_i32 = arith.constant 0 : i32
    %c0_i32_0 = arith.constant 0 : i32
    return %arg0, %c0_i32 : i32, i32
  }
  func.func @transform_1(%arg0: i32) -> (i32, i32) {
    %c0_i32 = arith.constant 0 : i32
    %c0_i32_0 = arith.constant 0 : i32
    %c0_i32_1 = arith.constant 0 : i32
    return %c0_i32, %c0_i32_0 : i32, i32
  }
  func.func @transform_2(%arg0: i32) -> (i32, i32) {
    %c0_i32 = arith.constant 0 : i32
    %c0_i32_0 = arith.constant 0 : i32
    %c0_i32_1 = arith.constant 0 : i32
    return %c0_i32, %c0_i32_0 : i32, i32
  }
  func.func @transform_3(%arg0: i32) -> (i32, i32) {
    %c0_i32 = arith.constant 0 : i32
    %c0_i32_0 = arith.constant 0 : i32
    %c0_i32_1 = arith.constant 0 : i32
    return %c0_i32, %c0_i32_0 : i32, i32
  }
  func.func @transform_4(%arg0: i32) -> (i32, i32) {
    %c0_i32 = arith.constant 0 : i32
    %c0_i32_0 = arith.constant 0 : i32
    %c0_i32_1 = arith.constant 0 : i32
    return %c0_i32, %c0_i32_0 : i32, i32
  }
  func.func @transform_5(%arg0: i32) -> (i32, i32) {
    %c0_i32 = arith.constant 0 : i32
    %c0_i32_0 = arith.constant 0 : i32
    %c0_i32_1 = arith.constant 0 : i32
    return %c0_i32, %c0_i32_0 : i32, i32
  }
  func.func @transform_6(%arg0: i32) -> (i32, i32) {
    %c0_i32 = arith.constant 0 : i32
    %c0_i32_0 = arith.constant 0 : i32
    %c0_i32_1 = arith.constant 0 : i32
    return %c0_i32, %c0_i32_0 : i32, i32
  }
  func.func @transform_7(%arg0: i32) -> (i32, i32) {
    %c0_i32 = arith.constant 0 : i32
    %c0_i32_0 = arith.constant 0 : i32
    return %arg0, %c0_i32 : i32, i32
  }
}

</mosaic_0001>

<bundles_post_ra>
// kernel: tpu_custom_call.1
= control target key start
LH: loop header
LB: loop body
LE: loop exit
PB: predicated region body
PF: predicated region fallthrough
CT: control target
= control target key end

     0   :  { %12 = vsyncpa [#allocation3], 0  ;;  %s12786_s0 = inlined_call_operand.hbm [shape: f32[128,3072], index: 0, kind: input, shape index: {}]   ;;  %s12787_s1 = inlined_call_operand.hbm [shape: bf16[3072,512], index: 1, kind: input, shape index: {}]   ;;  %s12788_s2 = inlined_call_operand.hbm [shape: f32[1,512], index: 2, kind: input, shape index: {}]   ;;  %s12789_s3 = inlined_call_operand.hbm [shape: bf16[512,256], index: 3, kind: input, shape index: {}]   ;;  %s12790_s4 = inlined_call_operand.hbm [shape: f32[1,256], index: 4, kind: input, shape index: {}]   ;;  %s12791_s5 = inlined_call_operand.hbm [shape: bf16[256,128], index: 5, kind: input, shape index: {}]   ;;  %s12792_s6 = inlined_call_operand.hbm [shape: f32[1,128], index: 6, kind: input, shape index: {}]   ;;  %s12793_s7 = inlined_call_operand.hbm [shape: f32[128,128], index: 7, kind: output, shape index: {}]  }
   0x1   :  { %13 = vsyncpa [#allocation6], 0 }
   0x2   :  { %14 = vsyncpa [#allocation9], 0 }
   0x3   :  { %15 = vsyncpa [#allocation12], 0 }
   0x4   :  { %16 = vsyncpa [#allocation4], 0  ;;  %s12312_s24 = smov [#allocation5]   ;;  %s12126_s28 = scalar_lea.hbm %s12787_s1, 98304 }
   0x5   :  { %s34_s25 = sshll.u32 %s12312_s24, 4  ;;  %p12127_p0 = scmp.ne.s32.totalorder %s12787_s1, %s12126_s28  ;;  %s35_s25 = int_to_ptr.vmem [resolvable:$true] %s34_s25 }
   0x6   :  { %p12130_p1 = scmp.lt.u32.totalorder %s12126_s28, %s12787_s1 }
   0x8   :  { %p12132_p2 = pnand %p12130_p1, %p12127_p0 }
   0xa   :  { %12135 = shalt.err (!%p12132_p2)
}
   0xb   :  { %s12136_s10 = scalar_lea.vmem %s35_s25, 98304  ;;  %p12141_p4 = scmp.lt.s32.totalorder %s35_s25, %s35_s25 }
   0xc   :  { %p12137_p3 = scmp.ne.s32.totalorder %s35_s25, %s12136_s10  ;;  %p12142_p5 = scmp.lt.s32.totalorder %s12136_s10, %s12136_s10 }
   0xe   :  { %p12143_p6 = por %p12142_p5, %p12141_p4 }
  0x10   :  { %p12144_p7 = pnand %p12143_p6, %p12137_p3 }
  0x12   :  { %12147 = shalt.err (!%p12144_p7)
}
  0x13   :  { %s12313_s11 = smov 256   ;;  %s12314_s12 = smov 16  }
  0x14   :  { %40 = dma.hbm_to_vmem [thread:$0]  %s12787_s1, 98304, %s35_s25, [#allocation6], %s12313_s11, %s12313_s11, %s12314_s12  }
  0x15   :  { %s12315_s15 = smov [#allocation8]   ;;  %s12148_s19 = scalar_lea.hbm %s12789_s3, 8192 }
  0x16   :  { %s56_s16 = sshll.u32 %s12315_s15, 4  ;;  %p12149_p8 = scmp.ne.s32.totalorder %s12789_s3, %s12148_s19  ;;  %s57_s16 = int_to_ptr.vmem [resolvable:$true] %s56_s16 }
  0x17   :  { %p12152_p9 = scmp.lt.u32.totalorder %s12148_s19, %s12789_s3 }
  0x19   :  { %p12154_p10 = pnand %p12152_p9, %p12149_p8 }
  0x1b   :  { %12157 = shalt.err (!%p12154_p10)
}
  0x1c   :  { %s12158_s24 = scalar_lea.vmem %s57_s16, 8192  ;;  %p12163_p12 = scmp.lt.s32.totalorder %s57_s16, %s57_s16 }
  0x1d   :  { %p12159_p11 = scmp.ne.s32.totalorder %s57_s16, %s12158_s24  ;;  %p12164_p13 = scmp.lt.s32.totalorder %s12158_s24, %s12158_s24 }
  0x1f   :  { %p12165_p0 = por %p12164_p13, %p12163_p12 }
  0x21   :  { %p12166_p1 = pnand %p12165_p0, %p12159_p11 }
  0x23   :  { %12169 = shalt.err (!%p12166_p1)
}
  0x24   :  { %s12316_s1 = smov 128   ;;  %s12317_s25 = smov 8  }
  0x25   :  { %62 = dma.hbm_to_vmem [thread:$0]  %s12789_s3, 8192, %s57_s16, [#allocation9], %s12316_s1, %s12316_s1, %s12317_s25  }
  0x26   :  { %s12318_s28 = smov [#allocation11]   ;;  %s12170_s9 = scalar_lea.hbm %s12791_s5, 2048 }
  0x27   :  { %s78_s29 = sshll.u32 %s12318_s28, 4  ;;  %p12171_p2 = scmp.ne.s32.totalorder %s12791_s5, %s12170_s9  ;;  %s79_s29 = int_to_ptr.vmem [resolvable:$true] %s78_s29 }
  0x28   :  { %p12174_p3 = scmp.lt.u32.totalorder %s12170_s9, %s12791_s5 }
  0x2a   :  { %p12176_p4 = pnand %p12174_p3, %p12171_p2 }
  0x2c   :  { %12179 = shalt.err (!%p12176_p4)
}
  0x2d   :  { %s12180_s14 = scalar_lea.vmem %s79_s29, 2048  ;;  %p12185_p6 = scmp.lt.s32.totalorder %s79_s29, %s79_s29 }
  0x2e   :  { %p12181_p5 = scmp.ne.s32.totalorder %s79_s29, %s12180_s14  ;;  %p12186_p7 = scmp.lt.s32.totalorder %s12180_s14, %s12180_s14 }
  0x30   :  { %p12187_p8 = por %p12186_p7, %p12185_p6 }
  0x32   :  { %p12188_p9 = pnand %p12187_p8, %p12181_p5 }
  0x34   :  { %12191 = shalt.err (!%p12188_p9)
}
  0x35   :  { %s12319_s3 = smov 64   ;;  %s12320_s15 = smov 4  }
  0x36   :  { %84 = dma.hbm_to_vmem [thread:$0]  %s12791_s5, 2048, %s79_s29, [#allocation12], %s12319_s3, %s12319_s3, %s12320_s15  }
  0x37   :  { %s12321_s18 = smov [#allocation2]   ;;  %s12192_s22 = scalar_lea.hbm %s12786_s0, 49152 }
  0x38   :  { %s22_s19 = sshll.u32 %s12321_s18, 4  ;;  %p12193_p10 = scmp.ne.s32.totalorder %s12786_s0, %s12192_s22  ;;  %s23_s19 = int_to_ptr.vmem [resolvable:$true] %s22_s19 }
  0x39   :  { %p12196_p11 = scmp.lt.u32.totalorder %s12192_s22, %s12786_s0 }
  0x3b   :  { %p12198_p12 = pnand %p12196_p11, %p12193_p10 }
  0x3d   :  { %12201 = shalt.err (!%p12198_p12)
}
  0x3e   :  { %s12202_s28 = scalar_lea.vmem %s23_s19, 49152  ;;  %p12207_p0 = scmp.lt.s32.totalorder %s23_s19, %s23_s19 }
  0x3f   :  { %p12203_p13 = scmp.ne.s32.totalorder %s23_s19, %s12202_s28  ;;  %p12208_p1 = scmp.lt.s32.totalorder %s12202_s28, %s12202_s28 }
  0x41   :  { %p12209_p2 = por %p12208_p1, %p12207_p0 }
  0x43   :  { %p12210_p3 = pnand %p12209_p2, %p12203_p13 }
  0x45   :  { %12213 = shalt.err (!%p12210_p3)
}
  0x46   :  { %s12322_s5 = smov 3072   ;;  %s12323_s29 = smov 192  }
  0x47   :  { %28 = dma.hbm_to_vmem [thread:$0]  %s12786_s0, 49152, %s23_s19, [#allocation3], %s12322_s5, %s12322_s5, %s12323_s29  }
  0x48   :  { %s12324_s9 = smov [#allocation7]   ;;  %s12325_s11 = smov [#allocation10]  }
  0x49   :  { %s47_s10 = sshll.u32 %s12324_s9, 4  ;;  %s69_s12 = sshll.u32 %s12325_s11, 4  ;;  %s48_s10 = int_to_ptr.vmem [resolvable:$true] %s47_s10  ;;  %s70_s12 = int_to_ptr.vmem [resolvable:$true] %s69_s12 }
  0x4a   :  { %s12214_s3 = scalar_lea.hbm %s12788_s2, 64 }
  0x4b   :  { %p12215_p4 = scmp.ne.s32.totalorder %s12788_s2, %s12214_s3  ;;  %p12218_p5 = scmp.lt.u32.totalorder %s12214_s3, %s12788_s2 }
  0x4d   :  { %p12220_p6 = pnand %p12218_p5, %p12215_p4 }
  0x4f   :  { %12223 = shalt.err (!%p12220_p6)
}
  0x50   :  { %s12224_s0 = scalar_lea.vmem %s48_s10, 64  ;;  %p12229_p8 = scmp.lt.s32.totalorder %s48_s10, %s48_s10 }
  0x51   :  { %p12225_p7 = scmp.ne.s32.totalorder %s48_s10, %s12224_s0  ;;  %p12230_p9 = scmp.lt.s32.totalorder %s12224_s0, %s12224_s0 }
  0x53   :  { %p12231_p10 = por %p12230_p9, %p12229_p8 }
  0x55   :  { %p12232_p11 = pnand %p12231_p10, %p12225_p7 }
  0x57   :  { %12235 = shalt.err (!%p12232_p11)
}
  0x58   :  { %50 = dma.hbm_to_vmem [thread:$0]  %s12788_s2, 64, %s48_s10, [#allocation6]  }
  0x59   :  { %s12236_s23 = scalar_lea.hbm %s12790_s4, 32 }
  0x5a   :  { %p12237_p12 = scmp.ne.s32.totalorder %s12790_s4, %s12236_s23  ;;  %p12240_p13 = scmp.lt.u32.totalorder %s12236_s23, %s12790_s4 }
  0x5c   :  { %p12242_p0 = pnand %p12240_p13, %p12237_p12 }
  0x5e   :  { %12245 = shalt.err (!%p12242_p0)
}
  0x5f   :  { %s12246_s5 = scalar_lea.vmem %s70_s12, 32  ;;  %p12251_p2 = scmp.lt.s32.totalorder %s70_s12, %s70_s12 }
  0x60   :  { %p12247_p1 = scmp.ne.s32.totalorder %s70_s12, %s12246_s5  ;;  %p12252_p3 = scmp.lt.s32.totalorder %s12246_s5, %s12246_s5 }
  0x62   :  { %p12253_p4 = por %p12252_p3, %p12251_p2 }
  0x64   :  { %p12254_p5 = pnand %p12253_p4, %p12247_p1 }
  0x66   :  { %12257 = shalt.err (!%p12254_p5)
}
  0x67   :  { %72 = dma.hbm_to_vmem [thread:$0]  %s12790_s4, 32, %s70_s12, [#allocation9]  }
  0x68   :  { %s12326_s30 = smov [#allocation13]   ;;  %s12258_s11 = scalar_lea.hbm %s12792_s6, 16 }
  0x69   :  { %s91_s8 = sshll.u32 %s12326_s30, 4  ;;  %p12259_p6 = scmp.ne.s32.totalorder %s12792_s6, %s12258_s11  ;;  %s92_s8 = int_to_ptr.vmem [resolvable:$true] %s91_s8 }
  0x6a   :  { %p12262_p7 = scmp.lt.u32.totalorder %s12258_s11, %s12792_s6 }
  0x6c   :  { %p12264_p8 = pnand %p12262_p7, %p12259_p6 }
  0x6e   :  { %12267 = shalt.err (!%p12264_p8)
}
  0x6f   :  { %s12268_s16 = scalar_lea.vmem %s92_s8, 16  ;;  %s12272_s4 = scalar_lea.vmem %s92_s8, 32 }
  0x70   :  { %p12269_p9 = scmp.ne.s32.totalorder %s92_s8, %s12268_s16  ;;  %p12273_p10 = scmp.lt.s32.totalorder %s92_s8, %s92_s8 }
  0x71   :  { %p12274_p11 = scmp.lt.s32.totalorder %s12272_s4, %s12268_s16 }
  0x73   :  { %p12275_p12 = por %p12274_p11, %p12273_p10 }
  0x75   :  { %p12276_p13 = pnand %p12275_p12, %p12269_p9 }
  0x77   :  { %12279 = shalt.err (!%p12276_p13)
}
  0x78   :  { %94 = dma.hbm_to_vmem [thread:$0]  %s12792_s6, 16, %s92_s8, [#allocation12]  }
  0x79   :  { %12302 = dma.done.wait [#allocation3], 49152  }
  0x7a   :  { %12303 = vsyncadd [#allocation3], 4294918144 }
  0x7b   :  { %12304 = dma.done.wait [#allocation6], 98368  }
  0x7c   :  { %12305 = vsyncadd [#allocation6], 4294868928 }
  0x7d   :  { %12306 = dma.done.wait [#allocation9], 8224  }
  0x7e   :  { %12307 = vsyncadd [#allocation9], 4294959072 }
  0x7f   :  { %12308 = dma.done.wait [#allocation12], 2064  }
  0x80   :  { %12309 = vsyncadd [#allocation12], 4294965232  ;;  %v10862_v0 = vld [vmem:[#allocation5 + $0x4] ss:$16 sps:$4 sm:$0xff]   ;;  %v10864_v1 = vld [vmem:[#allocation5 + $0xc] ss:$16 sps:$4 sm:$0xff]  }
  0x81   :  { %5323 = vmatprep.subr.bf16.mxu0 %v10862_v0  ;;  %v10866_v2 = vld [vmem:[#allocation5] ss:$16 sps:$4 sm:$0xff]   ;;  %v10867_v3 = vld [vmem:[#allocation5 + $0x8] ss:$16 sps:$4 sm:$0xff]   ;;  %6679 = vmatprep.subr.bf16.mxu1 %v10864_v1  ;;  %v10868_v4 = vld [vmem:[#allocation5 + $0x24] ss:$16 sps:$4 sm:$0xff]  }
  0x82   :  { %5324 = vmatpush1.bf16.msra.mxu0 %v10866_v2  ;;  %6680 = vmatpush1.bf16.msra.mxu1 %v10867_v3  ;;  %v10870_v5 = vld [vmem:[#allocation5 + $0x2c] ss:$16 sps:$4 sm:$0xff]   ;;  %v10872_v6 = vld [vmem:[#allocation5 + $0x20] ss:$16 sps:$4 sm:$0xff]   ;;  %v10873_v7 = vld [vmem:[#allocation5 + $0x28] ss:$16 sps:$4 sm:$0xff]  }
  0x83   :  { %5325 = vmatprep.subr.bf16.mxu0 %v10868_v4  ;;  %6681 = vmatprep.subr.bf16.mxu1 %v10870_v5  ;;  %v10874_v8 = vld [vmem:[#allocation5 + $0x44] ss:$16 sps:$4 sm:$0xff]   ;;  %v10876_v9 = vld [vmem:[#allocation5 + $0x4c] ss:$16 sps:$4 sm:$0xff]   ;;  %v10878_v10 = vld [vmem:[#allocation5 + $0x40] ss:$16 sps:$4 sm:$0xff]  }
  0x84   :  { %v10879_v11 = vld [vmem:[#allocation5 + $0x48] ss:$16 sps:$4 sm:$0xff]   ;;  %v10880_v12 = vld [vmem:[#allocation5 + $0x64] ss:$16 sps:$4 sm:$0xff]   ;;  %v10882_v13 = vld [vmem:[#allocation5 + $0x6c] ss:$16 sps:$4 sm:$0xff]  }
  0x85   :  { %v10884_v14 = vld [vmem:[#allocation5 + $0x60] ss:$16 sps:$4 sm:$0xff]   ;;  %v10885_v15 = vld [vmem:[#allocation5 + $0x68] ss:$16 sps:$4 sm:$0xff]   ;;  %v10886_v16 = vld [vmem:[#allocation5 + $0x84] ss:$16 sps:$4 sm:$0xff]  }
  0x86   :  { %5326 = vmatpush1.bf16.msra.mxu0 %v10872_v6  ;;  %6682 = vmatpush1.bf16.msra.mxu1 %v10873_v7  ;;  %v10888_v17 = vld [vmem:[#allocation5 + $0x8c] ss:$16 sps:$4 sm:$0xff]   ;;  %v10890_v18 = vld [vmem:[#allocation5 + $0x80] ss:$16 sps:$4 sm:$0xff]   ;;  %v10891_v19 = vld [vmem:[#allocation5 + $0x88] ss:$16 sps:$4 sm:$0xff]  }
  0x87   :  { %5327 = vmatprep.subr.bf16.mxu0 %v10874_v8  ;;  %6683 = vmatprep.subr.bf16.mxu1 %v10876_v9  ;;  %v10892_v20 = vld [vmem:[#allocation5 + $0xa4] ss:$16 sps:$4 sm:$0xff]   ;;  %v10894_v21 = vld [vmem:[#allocation5 + $0xac] ss:$16 sps:$4 sm:$0xff]   ;;  %v10896_v22 = vld [vmem:[#allocation5 + $0xa0] ss:$16 sps:$4 sm:$0xff]  }
  0x88   :  { %v10897_v23 = vld [vmem:[#allocation5 + $0xa8] ss:$16 sps:$4 sm:$0xff]   ;;  %v10898_v24 = vld [vmem:[#allocation5 + $0xc4] ss:$16 sps:$4 sm:$0xff]   ;;  %v10900_v25 = vld [vmem:[#allocation5 + $0xcc] ss:$16 sps:$4 sm:$0xff]  }
  0x89   :  { %v10902_v26 = vld [vmem:[#allocation5 + $0xc0] ss:$16 sps:$4 sm:$0xff]   ;;  %v10903_v27 = vld [vmem:[#allocation5 + $0xc8] ss:$16 sps:$4 sm:$0xff]   ;;  %v10904_v28 = vld [vmem:[#allocation5 + $0xe4] ss:$16 sps:$4 sm:$0xff]  }
  0x8a   :  { %5328 = vmatpush1.bf16.msra.mxu0 %v10878_v10  ;;  %6684 = vmatpush1.bf16.msra.mxu1 %v10879_v11  ;;  %v10906_v29 = vld [vmem:[#allocation5 + $0xec] ss:$16 sps:$4 sm:$0xff]   ;;  %v10908_v30 = vld [vmem:[#allocation5 + $0xe0] ss:$16 sps:$4 sm:$0xff]   ;;  %v10909_v31 = vld [vmem:[#allocation5 + $0xe8] ss:$16 sps:$4 sm:$0xff]  }
  0x8b   :  { %5329 = vmatprep.subr.bf16.mxu0 %v10880_v12  ;;  %6685 = vmatprep.subr.bf16.mxu1 %v10882_v13  ;;  %v10910_v32 = vld [vmem:[#allocation5 + $0x104] ss:$16 sps:$4 sm:$0xff]   ;;  %v10912_v33 = vld [vmem:[#allocation5 + $0x10c] ss:$16 sps:$4 sm:$0xff]   ;;  %v10914_v34 = vld [vmem:[#allocation5 + $0x100] ss:$16 sps:$4 sm:$0xff]  }
  0x8c   :  { %v10915_v35 = vld [vmem:[#allocation5 + $0x108] ss:$16 sps:$4 sm:$0xff]   ;;  %v10916_v36 = vld [vmem:[#allocation5 + $0x124] ss:$16 sps:$4 sm:$0xff]   ;;  %v10918_v37 = vld [vmem:[#allocation5 + $0x12c] ss:$16 sps:$4 sm:$0xff]  }
  0x8d   :  { %v10920_v38 = vld [vmem:[#allocation5 + $0x120] ss:$16 sps:$4 sm:$0xff]   ;;  %v10921_v39 = vld [vmem:[#allocation5 + $0x128] ss:$16 sps:$4 sm:$0xff]   ;;  %v10922_v40 = vld [vmem:[#allocation5 + $0x144] ss:$16 sps:$4 sm:$0xff]  }
  0x8e   :  { %5330 = vmatpush1.bf16.msra.mxu0 %v10884_v14  ;;  %6686 = vmatpush1.bf16.msra.mxu1 %v10885_v15  ;;  %v10924_v41 = vld [vmem:[#allocation5 + $0x14c] ss:$16 sps:$4 sm:$0xff]   ;;  %v10926_v42 = vld [vmem:[#allocation5 + $0x140] ss:$16 sps:$4 sm:$0xff]   ;;  %v10927_v43 = vld [vmem:[#allocation5 + $0x148] ss:$16 sps:$4 sm:$0xff]  }
  0x8f   :  { %5331 = vmatprep.subr.bf16.mxu0 %v10886_v16  ;;  %6687 = vmatprep.subr.bf16.mxu1 %v10888_v17  ;;  %v10928_v44 = vld [vmem:[#allocation5 + $0x164] ss:$16 sps:$4 sm:$0xff]   ;;  %v10930_v45 = vld [vmem:[#allocation5 + $0x16c] ss:$16 sps:$4 sm:$0xff]   ;;  %v10932_v47 = vld [vmem:[#allocation5 + $0x160] ss:$16 sps:$4 sm:$0xff]  }
  0x90   :  { %v118_v46 = vld [vmem:[#allocation2 + $0x8] sm:$0xff]  ;;  %v10934_v50 = vld [vmem:[#allocation5 + $0x184] ss:$16 sps:$4 sm:$0xff]   ;;  %v10938_v53 = vld [vmem:[#allocation5 + $0x180] ss:$16 sps:$4 sm:$0xff]   ;;  %s12327_s6 = smov [#allocation14]  }
  0x91   :  { %v10933_v48 = vld [vmem:[#allocation5 + $0x168] ss:$16 sps:$4 sm:$0xff]   ;;  %v10936_v52 = vld [vmem:[#allocation5 + $0x18c] ss:$16 sps:$4 sm:$0xff]   ;;  %v10940_v55 = vld [vmem:[#allocation5 + $0x1a4] ss:$16 sps:$4 sm:$0xff]  }
  0x92   :  { %5332 = vmatpush1.bf16.msra.mxu0 %v10890_v18  ;;  %6688 = vmatpush1.bf16.msra.mxu1 %v10891_v19  ;;  %v142_v49 = vld [vmem:[#allocation2 + $0xc8] sm:$0xff]  ;;  %v10944_v57 = vld [vmem:[#allocation5 + $0x1a0] ss:$16 sps:$4 sm:$0xff]   ;;  %v10946_v59 = vld [vmem:[#allocation5 + $0x1c4] ss:$16 sps:$4 sm:$0xff]   ;;  %s9054_s18 = sshll.u32 %s12327_s6, 4  ;;  %s9055_s18 = int_to_ptr.vmem [resolvable:$true] %s9054_s18 }
  0x93   :  { %5333 = vmatprep.subr.bf16.mxu0 %v10892_v20  ;;  %6689 = vmatprep.subr.bf16.mxu1 %v10894_v21  ;;  %v502_v51 = vpack.c.bf16 %v142_v49, %v118_v46  ;;  %v10939_v54 = vld [vmem:[#allocation5 + $0x188] ss:$16 sps:$4 sm:$0xff]   ;;  %v10942_v56 = vld [vmem:[#allocation5 + $0x1ac] ss:$16 sps:$4 sm:$0xff]   ;;  %v10950_v61 = vld [vmem:[#allocation5 + $0x1c0] ss:$16 sps:$4 sm:$0xff]   ;;  %p12285_p1 = scmp.lt.s32.totalorder %s9055_s18, %s9055_s18 }
  0x94   :  { %v10945_v58 = vld [vmem:[#allocation5 + $0x1a8] ss:$16 sps:$4 sm:$0xff]   ;;  %v10948_v60 = vld [vmem:[#allocation5 + $0x1cc] ss:$16 sps:$4 sm:$0xff]   ;;  %v10952_v63 = vld [vmem:[#allocation5 + $0x1e4] ss:$16 sps:$4 sm:$0xff]  }
  0x95   :  { %5355 = vmatprep.mubr.bf16.mxu0 %v502_v51  ;;  %6711 = vmatprep.mubr.bf16.mxu1 %v502_v51  ;;  %v10951_v62 = vld [vmem:[#allocation5 + $0x1c8] ss:$16 sps:$4 sm:$0xff]   ;;  %v10954_v0 = vld [vmem:[#allocation5 + $0x1ec] ss:$16 sps:$4 sm:$0xff]   ;;  %v10956_v1 = vld [vmem:[#allocation5 + $0x1e0] ss:$16 sps:$4 sm:$0xff]  }
  0x96   :  { %5334 = vmatpush1.bf16.msra.mxu0 %v10896_v22  ;;  %6690 = vmatpush1.bf16.msra.mxu1 %v10897_v23  ;;  %v10957_v2 = vld [vmem:[#allocation5 + $0x1e8] ss:$16 sps:$4 sm:$0xff]   ;;  %v117_v3 = vld [vmem:[#allocation2] sm:$0xff]  ;;  %v10963_v6 = vld [vmem:[#allocation5 + $0x20c] ss:$16 sps:$4 sm:$0xff]   ;;  %s12280_s0 = scalar_lea.vmem %s9055_s18, 2048 }
  0x97   :  { %5335 = vmatprep.subr.bf16.mxu0 %v10898_v24  ;;  %6691 = vmatprep.subr.bf16.mxu1 %v10900_v25  ;;  %v141_v4 = vld [vmem:[#allocation2 + $0xc0] sm:$0xff]  ;;  %v10961_v9 = vld [vmem:[#allocation5 + $0x208] ss:$16 sps:$4 sm:$0xff]   ;;  %v10969_v13 = vld [vmem:[#allocation5 + $0x22c] ss:$16 sps:$4 sm:$0xff]   ;;  %p12281_p0 = scmp.ne.s32.totalorder %s9055_s18, %s12280_s0  ;;  %p12286_p2 = scmp.lt.s32.totalorder %s12280_s0, %s12280_s0 }
  0x98   :  { %v10960_v5 = vld [vmem:[#allocation5 + $0x204] ss:$16 sps:$4 sm:$0xff]   ;;  %v10958_v7 = vld [vmem:[#allocation5 + $0x200] ss:$16 sps:$4 sm:$0xff]   ;;  %v501_v8 = vpack.c.bf16 %v141_v4, %v117_v3  ;;  %v166_v10 = vld [vmem:[#allocation2 + $0x188] sm:$0xff] }
  0x99   :  { %v190_v11 = vld [vmem:[#allocation2 + $0x248] sm:$0xff]  ;;  %v10966_v12 = vld [vmem:[#allocation5 + $0x224] ss:$16 sps:$4 sm:$0xff]   ;;  %v10964_v14 = vld [vmem:[#allocation5 + $0x220] ss:$16 sps:$4 sm:$0xff]   ;;  %p12287_p3 = por %p12286_p2, %p12285_p1 }
  0x9a   :  { %5336 = vmatpush1.bf16.msra.mxu0 %v10902_v26  ;;  %6692 = vmatpush1.bf16.msra.mxu1 %v10903_v27  ;;  %v526_v15 = vpack.c.bf16 %v190_v11, %v166_v10  ;;  %v10967_v16 = vld [vmem:[#allocation5 + $0x228] ss:$16 sps:$4 sm:$0xff]   ;;  %v165_v17 = vld [vmem:[#allocation2 + $0x180] sm:$0xff]  ;;  %v10975_v20 = vld [vmem:[#allocation5 + $0x24c] ss:$16 sps:$4 sm:$0xff]  }
  0x9b   :  { %5337 = vmatprep.subr.bf16.mxu0 %v10904_v28  ;;  %6693 = vmatprep.subr.bf16.mxu1 %v10906_v29  ;;  %v189_v18 = vld [vmem:[#allocation2 + $0x240] sm:$0xff]  ;;  %v10973_v22 = vld [vmem:[#allocation5 + $0x248] ss:$16 sps:$4 sm:$0xff]   ;;  %v10981_v27 = vld [vmem:[#allocation5 + $0x26c] ss:$16 sps:$4 sm:$0xff]   ;;  %p12288_p4 = pnand %p12287_p3, %p12281_p0 }
  0x9c   :  { %v10972_v19 = vld [vmem:[#allocation5 + $0x244] ss:$16 sps:$4 sm:$0xff]   ;;  %v10970_v21 = vld [vmem:[#allocation5 + $0x240] ss:$16 sps:$4 sm:$0xff]   ;;  %v525_v23 = vpack.c.bf16 %v189_v18, %v165_v17  ;;  %v214_v24 = vld [vmem:[#allocation2 + $0x308] sm:$0xff] }
  0x9d   :  { %v238_v25 = vld [vmem:[#allocation2 + $0x3c8] sm:$0xff]  ;;  %v10978_v26 = vld [vmem:[#allocation5 + $0x264] ss:$16 sps:$4 sm:$0xff]   ;;  %v10976_v29 = vld [vmem:[#allocation5 + $0x260] ss:$16 sps:$4 sm:$0xff]  }
  0x9e   :  { %5338 = vmatpush1.bf16.msra.mxu0 %v10908_v30  ;;  %6694 = vmatpush1.bf16.msra.mxu1 %v10909_v31  ;;  %v550_v28 = vpack.c.bf16 %v238_v25, %v214_v24  ;;  %v10979_v30 = vld [vmem:[#allocation5 + $0x268] ss:$16 sps:$4 sm:$0xff]   ;;  %v213_v31 = vld [vmem:[#allocation2 + $0x300] sm:$0xff] }
  0x9f   :  { %5339 = vmatprep.subr.bf16.mxu0 %v10910_v32  ;;  %6695 = vmatprep.subr.bf16.mxu1 %v10912_v33  ;;  %v237_v32 = vld [vmem:[#allocation2 + $0x3c0] sm:$0xff]  ;;  %v310_v51 = vld [vmem:[#allocation2 + $0x608] sm:$0xff] }
  0xa0   :  { %v10984_v33 = vld [vmem:[#allocation5 + $0x284] ss:$16 sps:$4 sm:$0xff]   ;;  %v10994_v49 = vld [vmem:[#allocation5 + $0x2c0] ss:$16 sps:$4 sm:$0xff]   ;;  %v11009_v3 = vld [vmem:[#allocation5 + $0x308] ss:$16 sps:$4 sm:$0xff]  }
  0xa1   :  { %v285_v46 = vld [vmem:[#allocation2 + $0x540] sm:$0xff]  ;;  %v430_v17 = vld [vmem:[#allocation2 + $0x9c8] sm:$0xff] }
  0xa2   :  { %5340 = vmatpush1.bf16.msra.mxu0 %v10914_v34  ;;  %6696 = vmatpush1.bf16.msra.mxu1 %v10915_v35  ;;  %v10987_v34 = vld [vmem:[#allocation5 + $0x28c] ss:$16 sps:$4 sm:$0xff]   ;;  %v10982_v35 = vld [vmem:[#allocation5 + $0x280] ss:$16 sps:$4 sm:$0xff]   ;;  %v11014_v4 = vld [vmem:[#allocation5 + $0x324] ss:$16 sps:$4 sm:$0xff]  }
  0xa3   :  { %5341 = vmatprep.subr.bf16.mxu0 %v10916_v36  ;;  %6697 = vmatprep.subr.bf16.mxu1 %v10918_v37  ;;  %v10985_v36 = vld [vmem:[#allocation5 + $0x288] ss:$16 sps:$4 sm:$0xff]   ;;  %v549_v37 = vpack.c.bf16 %v237_v32, %v213_v31  ;;  %v381_v10 = vld [vmem:[#allocation2 + $0x840] sm:$0xff] }
  0xa4   :  { %v11020_v11 = vld [vmem:[#allocation5 + $0x344] ss:$16 sps:$4 sm:$0xff]   ;;  %v478_v31 = vld [vmem:[#allocation2 + $0xb48] sm:$0xff] }
  0xa5   :  { %v11026_v18 = vld [vmem:[#allocation5 + $0x364] ss:$16 sps:$4 sm:$0xff]  }
  0xa6   :  { %5342 = vmatpush1.bf16.msra.mxu0 %v10920_v38  ;;  %6698 = vmatpush1.bf16.msra.mxu1 %v10921_v39  ;;  %v262_v38 = vld [vmem:[#allocation2 + $0x488] sm:$0xff]  ;;  %v429_v24 = vld [vmem:[#allocation2 + $0x9c0] sm:$0xff] }
  0xa7   :  { %5343 = vmatprep.subr.bf16.mxu0 %v10922_v40  ;;  %6699 = vmatprep.subr.bf16.mxu1 %v10924_v41  ;;  %v286_v39 = vld [vmem:[#allocation2 + $0x548] sm:$0xff]  ;;  %v10990_v40 = vld [vmem:[#allocation5 + $0x2a4] ss:$16 sps:$4 sm:$0xff]  }
  0xa8   :  { %v10993_v41 = vld [vmem:[#allocation5 + $0x2ac] ss:$16 sps:$4 sm:$0xff]   ;;  %v11032_v25 = vld [vmem:[#allocation5 + $0x384] ss:$16 sps:$4 sm:$0xff]  }
  0xa9   :  { %v11038_v32 = vld [vmem:[#allocation5 + $0x3a4] ss:$16 sps:$4 sm:$0xff]  }
  0xaa   :  { %5344 = vmatpush1.bf16.msra.mxu0 %v10926_v42  ;;  %6700 = vmatpush1.bf16.msra.mxu1 %v10927_v43  ;;  %v10988_v42 = vld [vmem:[#allocation5 + $0x2a0] ss:$16 sps:$4 sm:$0xff]   ;;  %v574_v43 = vpack.c.bf16 %v286_v39, %v262_v38  ;;  %v11044_v39 = vld [vmem:[#allocation5 + $0x3c4] ss:$16 sps:$4 sm:$0xff]  }
  0xab   :  { %5345 = vmatprep.subr.bf16.mxu0 %v10928_v44  ;;  %6701 = vmatprep.subr.bf16.mxu1 %v10930_v45  ;;  %v10991_v44 = vld [vmem:[#allocation5 + $0x2a8] ss:$16 sps:$4 sm:$0xff]   ;;  %v261_v45 = vld [vmem:[#allocation2 + $0x480] sm:$0xff] }
  0xac   :  { %v477_v38 = vld [vmem:[#allocation2 + $0xb40] sm:$0xff] }
  0xae   :  { %5346 = vmatpush1.bf16.msra.mxu0 %v10932_v47  ;;  %6702 = vmatpush1.bf16.msra.mxu1 %v10933_v48  ;;  %v10996_v47 = vld [vmem:[#allocation5 + $0x2c4] ss:$16 sps:$4 sm:$0xff]   ;;  %v10999_v48 = vld [vmem:[#allocation5 + $0x2cc] ss:$16 sps:$4 sm:$0xff]  }
  0xaf   :  { %5347 = vmatprep.subr.bf16.mxu0 %v10934_v50  ;;  %6703 = vmatprep.subr.bf16.mxu1 %v10936_v52  ;;  %v573_v50 = vpack.c.bf16 %v285_v46, %v261_v45  ;;  %v334_v52 = vld [vmem:[#allocation2 + $0x6c8] sm:$0xff]  ;;  %v144_v45 = vld [vmem:[#allocation2 + $0xd8] sm:$0xff]  ;;  %v11050_v46 = vld [vmem:[#allocation5 + $0x3e4] ss:$16 sps:$4 sm:$0xff]  }
  0xb2   :  { %5348 = vmatpush1.bf16.msra.mxu0 %v10938_v53  ;;  %6704 = vmatpush1.bf16.msra.mxu1 %v10939_v54  ;;  %v10997_v53 = vld [vmem:[#allocation5 + $0x2c8] ss:$16 sps:$4 sm:$0xff]   ;;  %v11002_v54 = vld [vmem:[#allocation5 + $0x2e4] ss:$16 sps:$4 sm:$0xff]  }
  0xb3   :  { %5349 = vmatprep.subr.bf16.mxu0 %v10940_v55  ;;  %6705 = vmatprep.subr.bf16.mxu1 %v10942_v56  ;;  %v11005_v55 = vld [vmem:[#allocation5 + $0x2ec] ss:$16 sps:$4 sm:$0xff]   ;;  %v11000_v56 = vld [vmem:[#allocation5 + $0x2e0] ss:$16 sps:$4 sm:$0xff]  }
  0xb6   :  { %5350 = vmatpush1.bf16.msra.mxu0 %v10944_v57  ;;  %6706 = vmatpush1.bf16.msra.mxu1 %v10945_v58  ;;  %v11003_v57 = vld [vmem:[#allocation5 + $0x2e8] ss:$16 sps:$4 sm:$0xff]   ;;  %v598_v58 = vpack.c.bf16 %v334_v52, %v310_v51  ;;  %v119_v51 = vld [vmem:[#allocation2 + $0x10] sm:$0xff] }
  0xb7   :  { %5351 = vmatprep.subr.bf16.mxu0 %v10946_v59  ;;  %6707 = vmatprep.subr.bf16.mxu1 %v10948_v60  ;;  %v309_v59 = vld [vmem:[#allocation2 + $0x600] sm:$0xff]  ;;  %v143_v52 = vld [vmem:[#allocation2 + $0xd0] sm:$0xff] }
  0xb8   :  { %v333_v60 = vld [vmem:[#allocation2 + $0x6c0] sm:$0xff] }
  0xba   :  { %5352 = vmatpush1.bf16.msra.mxu0 %v10950_v61  ;;  %6708 = vmatpush1.bf16.msra.mxu1 %v10951_v62  ;;  %v11008_v61 = vld [vmem:[#allocation5 + $0x304] ss:$16 sps:$4 sm:$0xff]   ;;  %v11011_v62 = vld [vmem:[#allocation5 + $0x30c] ss:$16 sps:$4 sm:$0xff]  }
  0xbb   :  { %5353 = vmatprep.subr.bf16.mxu0 %v10952_v63  ;;  %6709 = vmatprep.subr.bf16.mxu1 %v10954_v0  ;;  %v597_v63 = vpack.c.bf16 %v333_v60, %v309_v59  ;;  %v358_v0 = vld [vmem:[#allocation2 + $0x788] sm:$0xff]  ;;  %v11062_v60 = vld [vmem:[#allocation5 + $0x424] ss:$16 sps:$4 sm:$0xff]  }
  0xbc   :  { %v11057_v59 = vld [vmem:[#allocation5 + $0x408] ss:$16 sps:$4 sm:$0xff]  }
  0xbe   :  { %5354 = vmatpush1.bf16.msra.mxu0 %v10956_v1  ;;  %6710 = vmatpush1.bf16.msra.mxu1 %v10957_v2  ;;  %v382_v1 = vld [vmem:[#allocation2 + $0x848] sm:$0xff]  ;;  %v11006_v2 = vld [vmem:[#allocation5 + $0x300] ss:$16 sps:$4 sm:$0xff]  }
  0xbf   :  { %5436 = vmatprep.subr.bf16.mxu0 %v10960_v5  ;;  %6792 = vmatprep.subr.bf16.mxu1 %v10963_v6  ;;  %v11017_v5 = vld [vmem:[#allocation5 + $0x32c] ss:$16 sps:$4 sm:$0xff]   ;;  %v11012_v6 = vld [vmem:[#allocation5 + $0x320] ss:$16 sps:$4 sm:$0xff]  }
  0xc1   :  { %5356 = vmatmul.mubr.bf16.vlgmr.msra.gmra.mrb[0].mxu0 %v501_v8  ;;  %6712 = vmatmul.mubr.bf16.vlgmr.msra.gmra.mrb[0].mxu1 %v501_v8  ;;  %v622_v8 = vpack.c.bf16 %v382_v1, %v358_v0  ;;  %v167_v1 = vld [vmem:[#allocation2 + $0x190] sm:$0xff] }
  0xc2   :  { %5437 = vmatpush1.bf16.msra.mxu0 %v10958_v7  ;;  %6793 = vmatpush1.bf16.msra.mxu1 %v10961_v9  ;;  %v11015_v7 = vld [vmem:[#allocation5 + $0x328] ss:$16 sps:$4 sm:$0xff]   ;;  %v357_v9 = vld [vmem:[#allocation2 + $0x780] sm:$0xff] }
  0xc3   :  { %5438 = vmatprep.subr.bf16.mxu0 %v10966_v12  ;;  %6794 = vmatprep.subr.bf16.mxu1 %v10969_v13  ;;  %v11023_v12 = vld [vmem:[#allocation5 + $0x34c] ss:$16 sps:$4 sm:$0xff]   ;;  %v11018_v13 = vld [vmem:[#allocation5 + $0x340] ss:$16 sps:$4 sm:$0xff]  }
  0xc4   :  { %5365 = vmatprep.mubr.bf16.mxu0 %v526_v15  ;;  %6721 = vmatprep.mubr.bf16.mxu1 %v526_v15  ;;  %v11021_v15 = vld [vmem:[#allocation5 + $0x348] ss:$16 sps:$4 sm:$0xff]  }
  0xc6   :  { %5439 = vmatpush1.bf16.msra.mxu0 %v10964_v14  ;;  %6795 = vmatpush1.bf16.msra.mxu1 %v10967_v16  ;;  %v621_v14 = vpack.c.bf16 %v381_v10, %v357_v9  ;;  %v406_v16 = vld [vmem:[#allocation2 + $0x908] sm:$0xff]  ;;  %v11074_v10 = vld [vmem:[#allocation5 + $0x464] ss:$16 sps:$4 sm:$0xff]  }
  0xc7   :  { %5440 = vmatprep.subr.bf16.mxu0 %v10972_v19  ;;  %6796 = vmatprep.subr.bf16.mxu1 %v10975_v20  ;;  %v11029_v19 = vld [vmem:[#allocation5 + $0x36c] ss:$16 sps:$4 sm:$0xff]   ;;  %v11024_v20 = vld [vmem:[#allocation5 + $0x360] ss:$16 sps:$4 sm:$0xff]   ;;  %v11069_v9 = vld [vmem:[#allocation5 + $0x448] ss:$16 sps:$4 sm:$0xff]  }
  0xc9   :  { %5366 = vmatmul.mubr.bf16.gmra.mrb[4].mxu0 %v525_v23  ;;  %6722 = vmatmul.mubr.bf16.gmra.mrb[4].mxu1 %v525_v23  ;;  %v405_v23 = vld [vmem:[#allocation2 + $0x900] sm:$0xff] }
  0xca   :  { %5441 = vmatpush1.bf16.msra.mxu0 %v10970_v21  ;;  %6797 = vmatpush1.bf16.msra.mxu1 %v10973_v22  ;;  %v646_v21 = vpack.c.bf16 %v430_v17, %v406_v16  ;;  %v11027_v22 = vld [vmem:[#allocation5 + $0x368] ss:$16 sps:$4 sm:$0xff]   ;;  %v239_v16 = vld [vmem:[#allocation2 + $0x3d0] sm:$0xff] }
  0xcb   :  { %5442 = vmatprep.subr.bf16.mxu0 %v10978_v26  ;;  %6798 = vmatprep.subr.bf16.mxu1 %v10981_v27  ;;  %v11035_v26 = vld [vmem:[#allocation5 + $0x38c] ss:$16 sps:$4 sm:$0xff]   ;;  %v11030_v27 = vld [vmem:[#allocation5 + $0x380] ss:$16 sps:$4 sm:$0xff]   ;;  %v11080_v17 = vld [vmem:[#allocation5 + $0x484] ss:$16 sps:$4 sm:$0xff]  }
  0xcc   :  { %5375 = vmatprep.mubr.bf16.mxu0 %v550_v28  ;;  %6731 = vmatprep.mubr.bf16.mxu1 %v550_v28  ;;  %v11033_v28 = vld [vmem:[#allocation5 + $0x388] ss:$16 sps:$4 sm:$0xff]  }
  0xce   :  { %5443 = vmatpush1.bf16.msra.mxu0 %v10976_v29  ;;  %6799 = vmatpush1.bf16.msra.mxu1 %v10979_v30  ;;  %v645_v29 = vpack.c.bf16 %v429_v24, %v405_v23  ;;  %v454_v30 = vld [vmem:[#allocation2 + $0xa88] sm:$0xff]  ;;  %v288_v23 = vld [vmem:[#allocation2 + $0x558] sm:$0xff]  ;;  %v11086_v24 = vld [vmem:[#allocation5 + $0x4a4] ss:$16 sps:$4 sm:$0xff]  }
  0xcf   :  { %5444 = vmatprep.subr.bf16.mxu0 %v10984_v33  ;;  %6800 = vmatprep.subr.bf16.mxu1 %v10987_v34  ;;  %v11041_v33 = vld [vmem:[#allocation5 + $0x3ac] ss:$16 sps:$4 sm:$0xff]   ;;  %v670_v34 = vpack.c.bf16 %v478_v31, %v454_v30  ;;  %v287_v30 = vld [vmem:[#allocation2 + $0x550] sm:$0xff] }
  0xd0   :  { %v11092_v31 = vld [vmem:[#allocation5 + $0x4c4] ss:$16 sps:$4 sm:$0xff]  }
  0xd1   :  { %5376 = vmatmul.mubr.bf16.gmra.mrb[8].mxu0 %v549_v37  ;;  %6732 = vmatmul.mubr.bf16.gmra.mrb[8].mxu1 %v549_v37  ;;  %v453_v37 = vld [vmem:[#allocation2 + $0xa80] sm:$0xff] }
  0xd2   :  { %5445 = vmatpush1.bf16.msra.mxu0 %v10982_v35  ;;  %6801 = vmatpush1.bf16.msra.mxu1 %v10985_v36  ;;  %v11036_v35 = vld [vmem:[#allocation5 + $0x3a0] ss:$16 sps:$4 sm:$0xff]   ;;  %v11039_v36 = vld [vmem:[#allocation5 + $0x3a8] ss:$16 sps:$4 sm:$0xff]  }
  0xd3   :  { %5446 = vmatprep.subr.bf16.mxu0 %v10990_v40  ;;  %6802 = vmatprep.subr.bf16.mxu1 %v10993_v41  ;;  %v11047_v40 = vld [vmem:[#allocation5 + $0x3cc] ss:$16 sps:$4 sm:$0xff]   ;;  %v11042_v41 = vld [vmem:[#allocation5 + $0x3c0] ss:$16 sps:$4 sm:$0xff]  }
  0xd4   :  { %5385 = vmatprep.mubr.bf16.mxu0 %v574_v43  ;;  %6741 = vmatprep.mubr.bf16.mxu1 %v574_v43  ;;  %v669_v43 = vpack.c.bf16 %v477_v38, %v453_v37  ;;  %v336_v37 = vld [vmem:[#allocation2 + $0x6d8] sm:$0xff]  ;;  %v11098_v38 = vld [vmem:[#allocation5 + $0x4e4] ss:$16 sps:$4 sm:$0xff]  }
  0xd6   :  { %5447 = vmatpush1.bf16.msra.mxu0 %v10988_v42  ;;  %6803 = vmatpush1.bf16.msra.mxu1 %v10991_v44  ;;  %v11045_v42 = vld [vmem:[#allocation5 + $0x3c8] ss:$16 sps:$4 sm:$0xff]  }
  0xd7   :  { %5448 = vmatprep.subr.bf16.mxu0 %v10996_v47  ;;  %6804 = vmatprep.subr.bf16.mxu1 %v10999_v48  ;;  %v120_v44 = vld [vmem:[#allocation2 + $0x18] sm:$0xff]  ;;  %v11048_v48 = vld [vmem:[#allocation5 + $0x3e0] ss:$16 sps:$4 sm:$0xff]  }
  0xd8   :  { %v11053_v47 = vld [vmem:[#allocation5 + $0x3ec] ss:$16 sps:$4 sm:$0xff]  }
  0xd9   :  { %5386 = vmatmul.mubr.bf16.gmra.mrb[12].mxu0 %v573_v50  ;;  %6742 = vmatmul.mubr.bf16.gmra.mrb[12].mxu1 %v573_v50  ;;  %v11051_v50 = vld [vmem:[#allocation5 + $0x3e8] ss:$16 sps:$4 sm:$0xff]  }
  0xda   :  { %5449 = vmatpush1.bf16.msra.mxu0 %v10994_v49  ;;  %6805 = vmatpush1.bf16.msra.mxu1 %v10997_v53  ;;  %v504_v49 = vpack.c.bf16 %v144_v45, %v120_v44  ;;  %v11056_v53 = vld [vmem:[#allocation5 + $0x404] ss:$16 sps:$4 sm:$0xff]  }
  0xdb   :  { %5450 = vmatprep.subr.bf16.mxu0 %v11002_v54  ;;  %6806 = vmatprep.subr.bf16.mxu1 %v11005_v55  ;;  %v11059_v54 = vld [vmem:[#allocation5 + $0x40c] ss:$16 sps:$4 sm:$0xff]   ;;  %v11054_v55 = vld [vmem:[#allocation5 + $0x400] ss:$16 sps:$4 sm:$0xff]   ;;  %v11104_v45 = vld [vmem:[#allocation5 + $0x504] ss:$16 sps:$4 sm:$0xff]  }
  0xdc   :  { %5395 = vmatprep.mubr.bf16.mxu0 %v598_v58  ;;  %6751 = vmatprep.mubr.bf16.mxu1 %v598_v58  ;;  %v192_v58 = vld [vmem:[#allocation2 + $0x258] sm:$0xff]  ;;  %v335_v44 = vld [vmem:[#allocation2 + $0x6d0] sm:$0xff] }
  0xde   :  { %5451 = vmatpush1.bf16.msra.mxu0 %v11000_v56  ;;  %6807 = vmatpush1.bf16.msra.mxu1 %v11003_v57  ;;  %v503_v56 = vpack.c.bf16 %v143_v52, %v119_v51  ;;  %v168_v57 = vld [vmem:[#allocation2 + $0x198] sm:$0xff]  ;;  %v11110_v52 = vld [vmem:[#allocation5 + $0x524] ss:$16 sps:$4 sm:$0xff]  }
  0xdf   :  { %5452 = vmatprep.subr.bf16.mxu0 %v11008_v61  ;;  %6808 = vmatprep.subr.bf16.mxu1 %v11011_v62  ;;  %v11065_v61 = vld [vmem:[#allocation5 + $0x42c] ss:$16 sps:$4 sm:$0xff]   ;;  %v11060_v62 = vld [vmem:[#allocation5 + $0x420] ss:$16 sps:$4 sm:$0xff]   ;;  %v528_v0 = vpack.c.bf16 %v192_v58, %v168_v57 }
  0xe0   :  { %v384_v51 = vld [vmem:[#allocation2 + $0x858] sm:$0xff]  ;;  %v359_v57 = vld [vmem:[#allocation2 + $0x790] sm:$0xff] }
  0xe1   :  { %5396 = vmatmul.mubr.bf16.gmra.mrb[16].mxu0 %v597_v63  ;;  %6752 = vmatmul.mubr.bf16.gmra.mrb[16].mxu1 %v597_v63  ;;  %v11063_v63 = vld [vmem:[#allocation5 + $0x428] ss:$16 sps:$4 sm:$0xff]   ;;  %v383_v58 = vld [vmem:[#allocation2 + $0x850] sm:$0xff] }
  0xe2   :  { %5453 = vmatpush1.bf16.msra.mxu0 %v11006_v2  ;;  %6809 = vmatpush1.bf16.msra.mxu1 %v11009_v3  ;;  %v191_v2 = vld [vmem:[#allocation2 + $0x250] sm:$0xff] }
  0xe3   :  { %5454 = vmatprep.subr.bf16.mxu0 %v11014_v4  ;;  %6810 = vmatprep.subr.bf16.mxu1 %v11017_v5  ;;  %v11068_v3 = vld [vmem:[#allocation5 + $0x444] ss:$16 sps:$4 sm:$0xff]   ;;  %v11071_v4 = vld [vmem:[#allocation5 + $0x44c] ss:$16 sps:$4 sm:$0xff]   ;;  %v527_v5 = vpack.c.bf16 %v191_v2, %v167_v1  ;;  %v11117_v1 = vld [vmem:[#allocation5 + $0x548] ss:$16 sps:$4 sm:$0xff]  }
  0xe4   :  { %5405 = vmatprep.mubr.bf16.mxu0 %v622_v8  ;;  %6761 = vmatprep.mubr.bf16.mxu1 %v622_v8  ;;  %v11066_v8 = vld [vmem:[#allocation5 + $0x440] ss:$16 sps:$4 sm:$0xff]   ;;  %v11122_v2 = vld [vmem:[#allocation5 + $0x564] ss:$16 sps:$4 sm:$0xff]  }
  0xe6   :  { %5455 = vmatpush1.bf16.msra.mxu0 %v11012_v6  ;;  %6811 = vmatpush1.bf16.msra.mxu1 %v11015_v7  ;;  %v216_v6 = vld [vmem:[#allocation2 + $0x318] sm:$0xff] }
  0xe7   :  { %5456 = vmatprep.subr.bf16.mxu0 %v11020_v11  ;;  %6812 = vmatprep.subr.bf16.mxu1 %v11023_v12  ;;  %v240_v7 = vld [vmem:[#allocation2 + $0x3d8] sm:$0xff]  ;;  %v11072_v12 = vld [vmem:[#allocation5 + $0x460] ss:$16 sps:$4 sm:$0xff]  }
  0xe8   :  { %v11077_v11 = vld [vmem:[#allocation5 + $0x46c] ss:$16 sps:$4 sm:$0xff]  }
  0xe9   :  { %5406 = vmatmul.mubr.bf16.gmra.mrb[20].mxu0 %v621_v14  ;;  %6762 = vmatmul.mubr.bf16.gmra.mrb[20].mxu1 %v621_v14  ;;  %v552_v14 = vpack.c.bf16 %v240_v7, %v216_v6  ;;  %v407_v7 = vld [vmem:[#allocation2 + $0x910] sm:$0xff] }
  0xea   :  { %5457 = vmatpush1.bf16.msra.mxu0 %v11018_v13  ;;  %6813 = vmatpush1.bf16.msra.mxu1 %v11021_v15  ;;  %v11075_v13 = vld [vmem:[#allocation5 + $0x468] ss:$16 sps:$4 sm:$0xff]   ;;  %v215_v15 = vld [vmem:[#allocation2 + $0x310] sm:$0xff] }
  0xeb   :  { %5458 = vmatprep.subr.bf16.mxu0 %v11026_v18  ;;  %6814 = vmatprep.subr.bf16.mxu1 %v11029_v19  ;;  %v11083_v18 = vld [vmem:[#allocation5 + $0x48c] ss:$16 sps:$4 sm:$0xff]   ;;  %v11078_v19 = vld [vmem:[#allocation5 + $0x480] ss:$16 sps:$4 sm:$0xff]  }
  0xec   :  { %5415 = vmatprep.mubr.bf16.mxu0 %v646_v21  ;;  %6771 = vmatprep.mubr.bf16.mxu1 %v646_v21  ;;  %v11081_v21 = vld [vmem:[#allocation5 + $0x488] ss:$16 sps:$4 sm:$0xff]  }
  0xee   :  { %5459 = vmatpush1.bf16.msra.mxu0 %v11024_v20  ;;  %6815 = vmatpush1.bf16.msra.mxu1 %v11027_v22  ;;  %v551_v20 = vpack.c.bf16 %v239_v16, %v215_v15  ;;  %v264_v22 = vld [vmem:[#allocation2 + $0x498] sm:$0xff]  ;;  %v11134_v16 = vld [vmem:[#allocation5 + $0x5a4] ss:$16 sps:$4 sm:$0xff]  }
  0xef   :  { %5460 = vmatprep.subr.bf16.mxu0 %v11032_v25  ;;  %6816 = vmatprep.subr.bf16.mxu1 %v11035_v26  ;;  %v11089_v25 = vld [vmem:[#allocation5 + $0x4ac] ss:$16 sps:$4 sm:$0xff]   ;;  %v11084_v26 = vld [vmem:[#allocation5 + $0x4a0] ss:$16 sps:$4 sm:$0xff]   ;;  %v11129_v15 = vld [vmem:[#allocation5 + $0x588] ss:$16 sps:$4 sm:$0xff]  }
  0xf1   :  { %5416 = vmatmul.mubr.bf16.gmra.mrb[24].mxu0 %v645_v29  ;;  %6772 = vmatmul.mubr.bf16.gmra.mrb[24].mxu1 %v645_v29  ;;  %v263_v29 = vld [vmem:[#allocation2 + $0x490] sm:$0xff] }
  0xf2   :  { %5461 = vmatpush1.bf16.msra.mxu0 %v11030_v27  ;;  %6817 = vmatpush1.bf16.msra.mxu1 %v11033_v28  ;;  %v576_v27 = vpack.c.bf16 %v288_v23, %v264_v22  ;;  %v11087_v28 = vld [vmem:[#allocation5 + $0x4a8] ss:$16 sps:$4 sm:$0xff]   ;;  %v479_v22 = vld [vmem:[#allocation2 + $0xb50] sm:$0xff] }
  0xf3   :  { %5462 = vmatprep.subr.bf16.mxu0 %v11038_v32  ;;  %6818 = vmatprep.subr.bf16.mxu1 %v11041_v33  ;;  %v11095_v32 = vld [vmem:[#allocation5 + $0x4cc] ss:$16 sps:$4 sm:$0xff]   ;;  %v11090_v33 = vld [vmem:[#allocation5 + $0x4c0] ss:$16 sps:$4 sm:$0xff]   ;;  %v11140_v23 = vld [vmem:[#allocation5 + $0x5c4] ss:$16 sps:$4 sm:$0xff]  }
  0xf4   :  { %5425 = vmatprep.mubr.bf16.mxu0 %v670_v34  ;;  %6781 = vmatprep.mubr.bf16.mxu1 %v670_v34  ;;  %v11093_v34 = vld [vmem:[#allocation5 + $0x4c8] ss:$16 sps:$4 sm:$0xff]  }
  0xf6   :  { %5463 = vmatpush1.bf16.msra.mxu0 %v11036_v35  ;;  %6819 = vmatpush1.bf16.msra.mxu1 %v11039_v36  ;;  %v575_v35 = vpack.c.bf16 %v287_v30, %v263_v29  ;;  %v312_v36 = vld [vmem:[#allocation2 + $0x618] sm:$0xff]  ;;  %v146_v29 = vld [vmem:[#allocation2 + $0xe8] sm:$0xff]  ;;  %v11146_v30 = vld [vmem:[#allocation5 + $0x5e4] ss:$16 sps:$4 sm:$0xff]  }
  0xf7   :  { %5464 = vmatprep.subr.bf16.mxu0 %v11044_v39  ;;  %6820 = vmatprep.subr.bf16.mxu1 %v11047_v40  ;;  %v11101_v39 = vld [vmem:[#allocation5 + $0x4ec] ss:$16 sps:$4 sm:$0xff]   ;;  %v600_v40 = vpack.c.bf16 %v336_v37, %v312_v36  ;;  %v145_v36 = vld [vmem:[#allocation2 + $0xe0] sm:$0xff] }
  0xf8   :  { %v11152_v37 = vld [vmem:[#allocation5 + $0x604] ss:$16 sps:$4 sm:$0xff]  }
  0xf9   :  { %5426 = vmatmul.mubr.bf16.gmra.mrb[28].mxu0 %v669_v43  ;;  %6782 = vmatmul.mubr.bf16.gmra.mrb[28].mxu1 %v669_v43  ;;  %v311_v43 = vld [vmem:[#allocation2 + $0x610] sm:$0xff] }
  0xfa   :  { %5465 = vmatpush1.bf16.msra.mxu0 %v11042_v41  ;;  %6821 = vmatpush1.bf16.msra.mxu1 %v11045_v42  ;;  %v11096_v41 = vld [vmem:[#allocation5 + $0x4e0] ss:$16 sps:$4 sm:$0xff]   ;;  %v11099_v42 = vld [vmem:[#allocation5 + $0x4e8] ss:$16 sps:$4 sm:$0xff]  }
  0xfb   :  { %5466 = vmatprep.subr.bf16.mxu0 %v11050_v46  ;;  %6822 = vmatprep.subr.bf16.mxu1 %v11053_v47  ;;  %v11107_v46 = vld [vmem:[#allocation5 + $0x50c] ss:$16 sps:$4 sm:$0xff]   ;;  %v11102_v47 = vld [vmem:[#allocation5 + $0x500] ss:$16 sps:$4 sm:$0xff]  }
  0xfc   :  { %5468 = vmatprep.mubr.bf16.mxu0 %v504_v49  ;;  %6824 = vmatprep.mubr.bf16.mxu1 %v504_v49  ;;  %v599_v49 = vpack.c.bf16 %v335_v44, %v311_v43  ;;  %v194_v43 = vld [vmem:[#allocation2 + $0x268] sm:$0xff]  ;;  %v11158_v44 = vld [vmem:[#allocation5 + $0x624] ss:$16 sps:$4 sm:$0xff]  }
  0xfe   :  { %5467 = vmatpush1.bf16.msra.mxu0 %v11048_v48  ;;  %6823 = vmatpush1.bf16.msra.mxu1 %v11051_v50  ;;  %v11105_v48 = vld [vmem:[#allocation5 + $0x508] ss:$16 sps:$4 sm:$0xff]  }
  0xff   :  { %5549 = vmatprep.subr.bf16.mxu0 %v11056_v53  ;;  %6905 = vmatprep.subr.bf16.mxu1 %v11059_v54  ;;  %v360_v50 = vld [vmem:[#allocation2 + $0x798] sm:$0xff]  ;;  %v11108_v54 = vld [vmem:[#allocation5 + $0x520] ss:$16 sps:$4 sm:$0xff]  }
 0x100   :  { %v11113_v53 = vld [vmem:[#allocation5 + $0x52c] ss:$16 sps:$4 sm:$0xff]  }
 0x101   :  { %5469 = vmatmul.mubr.bf16.vlgmr.msra.gmra.mrb[0].mxu0 %v503_v56  ;;  %6825 = vmatmul.mubr.bf16.vlgmr.msra.gmra.mrb[0].mxu1 %v503_v56  ;;  %v11111_v56 = vld [vmem:[#allocation5 + $0x528] ss:$16 sps:$4 sm:$0xff]  }
 0x102   :  { %5550 = vmatpush1.bf16.msra.mxu0 %v11054_v55  ;;  %6906 = vmatpush1.bf16.msra.mxu1 %v11057_v59  ;;  %v624_v55 = vpack.c.bf16 %v384_v51, %v360_v50  ;;  %v11116_v59 = vld [vmem:[#allocation5 + $0x544] ss:$16 sps:$4 sm:$0xff]  }
 0x103   :  { %5551 = vmatprep.subr.bf16.mxu0 %v11062_v60  ;;  %6907 = vmatprep.subr.bf16.mxu1 %v11065_v61  ;;  %v11119_v60 = vld [vmem:[#allocation5 + $0x54c] ss:$16 sps:$4 sm:$0xff]   ;;  %v11114_v61 = vld [vmem:[#allocation5 + $0x540] ss:$16 sps:$4 sm:$0xff]   ;;  %v11164_v51 = vld [vmem:[#allocation5 + $0x644] ss:$16 sps:$4 sm:$0xff]  }
 0x104   :  { %5478 = vmatprep.mubr.bf16.mxu0 %v528_v0  ;;  %6834 = vmatprep.mubr.bf16.mxu1 %v528_v0  ;;  %v432_v0 = vld [vmem:[#allocation2 + $0x9d8] sm:$0xff]  ;;  %v193_v50 = vld [vmem:[#allocation2 + $0x260] sm:$0xff] }
 0x106   :  { %5552 = vmatpush1.bf16.msra.mxu0 %v11060_v62  ;;  %6908 = vmatpush1.bf16.msra.mxu1 %v11063_v63  ;;  %v623_v62 = vpack.c.bf16 %v383_v58, %v359_v57  ;;  %v408_v63 = vld [vmem:[#allocation2 + $0x918] sm:$0xff]  ;;  %v242_v57 = vld [vmem:[#allocation2 + $0x3e8] sm:$0xff]  ;;  %v11170_v58 = vld [vmem:[#allocation5 + $0x664] ss:$16 sps:$4 sm:$0xff]  }
 0x107   :  { %5553 = vmatprep.subr.bf16.mxu0 %v11068_v3  ;;  %6909 = vmatprep.subr.bf16.mxu1 %v11071_v4  ;;  %v11125_v3 = vld [vmem:[#allocation5 + $0x56c] ss:$16 sps:$4 sm:$0xff]   ;;  %v11120_v4 = vld [vmem:[#allocation5 + $0x560] ss:$16 sps:$4 sm:$0xff]   ;;  %v648_v6 = vpack.c.bf16 %v432_v0, %v408_v63 }
 0x108   :  { %v217_v63 = vld [vmem:[#allocation2 + $0x320] sm:$0xff] }
 0x109   :  { %5479 = vmatmul.mubr.bf16.gmra.mrb[4].mxu0 %v527_v5  ;;  %6835 = vmatmul.mubr.bf16.gmra.mrb[4].mxu1 %v527_v5  ;;  %v11123_v5 = vld [vmem:[#allocation5 + $0x568] ss:$16 sps:$4 sm:$0xff]   ;;  %v241_v0 = vld [vmem:[#allocation2 + $0x3e0] sm:$0xff] }
 0x10a   :  { %5554 = vmatpush1.bf16.msra.mxu0 %v11066_v8  ;;  %6910 = vmatpush1.bf16.msra.mxu1 %v11069_v9  ;;  %v431_v8 = vld [vmem:[#allocation2 + $0x9d0] sm:$0xff] }
 0x10b   :  { %5555 = vmatprep.subr.bf16.mxu0 %v11074_v10  ;;  %6911 = vmatprep.subr.bf16.mxu1 %v11077_v11  ;;  %v11128_v9 = vld [vmem:[#allocation5 + $0x584] ss:$16 sps:$4 sm:$0xff]   ;;  %v11131_v10 = vld [vmem:[#allocation5 + $0x58c] ss:$16 sps:$4 sm:$0xff]   ;;  %v647_v11 = vpack.c.bf16 %v431_v8, %v407_v7  ;;  %v11177_v7 = vld [vmem:[#allocation5 + $0x688] ss:$16 sps:$4 sm:$0xff]  }
 0x10c   :  { %5488 = vmatprep.mubr.bf16.mxu0 %v552_v14  ;;  %6844 = vmatprep.mubr.bf16.mxu1 %v552_v14  ;;  %v11126_v14 = vld [vmem:[#allocation5 + $0x580] ss:$16 sps:$4 sm:$0xff]   ;;  %v11182_v8 = vld [vmem:[#allocation5 + $0x6a4] ss:$16 sps:$4 sm:$0xff]  }
 0x10e   :  { %5556 = vmatpush1.bf16.msra.mxu0 %v11072_v12  ;;  %6912 = vmatpush1.bf16.msra.mxu1 %v11075_v13  ;;  %v456_v12 = vld [vmem:[#allocation2 + $0xa98] sm:$0xff] }
 0x10f   :  { %5557 = vmatprep.subr.bf16.mxu0 %v11080_v17  ;;  %6913 = vmatprep.subr.bf16.mxu1 %v11083_v18  ;;  %v480_v13 = vld [vmem:[#allocation2 + $0xb58] sm:$0xff]  ;;  %v11132_v18 = vld [vmem:[#allocation5 + $0x5a0] ss:$16 sps:$4 sm:$0xff]  }
 0x110   :  { %v11137_v17 = vld [vmem:[#allocation5 + $0x5ac] ss:$16 sps:$4 sm:$0xff]  }
 0x111   :  { %5489 = vmatmul.mubr.bf16.gmra.mrb[8].mxu0 %v551_v20  ;;  %6845 = vmatmul.mubr.bf16.gmra.mrb[8].mxu1 %v551_v20  ;;  %v672_v20 = vpack.c.bf16 %v480_v13, %v456_v12  ;;  %v265_v13 = vld [vmem:[#allocation2 + $0x4a0] sm:$0xff] }
 0x112   :  { %5558 = vmatpush1.bf16.msra.mxu0 %v11078_v19  ;;  %6914 = vmatpush1.bf16.msra.mxu1 %v11081_v21  ;;  %v11135_v19 = vld [vmem:[#allocation5 + $0x5a8] ss:$16 sps:$4 sm:$0xff]   ;;  %v455_v21 = vld [vmem:[#allocation2 + $0xa90] sm:$0xff] }
 0x113   :  { %5559 = vmatprep.subr.bf16.mxu0 %v11086_v24  ;;  %6915 = vmatprep.subr.bf16.mxu1 %v11089_v25  ;;  %v11143_v24 = vld [vmem:[#allocation5 + $0x5cc] ss:$16 sps:$4 sm:$0xff]   ;;  %v11138_v25 = vld [vmem:[#allocation5 + $0x5c0] ss:$16 sps:$4 sm:$0xff]  }
 0x114   :  { %5498 = vmatprep.mubr.bf16.mxu0 %v576_v27  ;;  %6854 = vmatprep.mubr.bf16.mxu1 %v576_v27  ;;  %v11141_v27 = vld [vmem:[#allocation5 + $0x5c8] ss:$16 sps:$4 sm:$0xff]  }
 0x116   :  { %5560 = vmatpush1.bf16.msra.mxu0 %v11084_v26  ;;  %6916 = vmatpush1.bf16.msra.mxu1 %v11087_v28  ;;  %v671_v26 = vpack.c.bf16 %v479_v22, %v455_v21  ;;  %v122_v28 = vld [vmem:[#allocation2 + $0x28] sm:$0xff]  ;;  %v11194_v22 = vld [vmem:[#allocation5 + $0x6e4] ss:$16 sps:$4 sm:$0xff]  }
 0x117   :  { %5561 = vmatprep.subr.bf16.mxu0 %v11092_v31  ;;  %6917 = vmatprep.subr.bf16.mxu1 %v11095_v32  ;;  %v11149_v31 = vld [vmem:[#allocation5 + $0x5ec] ss:$16 sps:$4 sm:$0xff]   ;;  %v11144_v32 = vld [vmem:[#allocation5 + $0x5e0] ss:$16 sps:$4 sm:$0xff]   ;;  %v11189_v21 = vld [vmem:[#allocation5 + $0x6c8] ss:$16 sps:$4 sm:$0xff]  }
 0x119   :  { %5499 = vmatmul.mubr.bf16.gmra.mrb[12].mxu0 %v575_v35  ;;  %6855 = vmatmul.mubr.bf16.gmra.mrb[12].mxu1 %v575_v35  ;;  %v121_v35 = vld [vmem:[#allocation2 + $0x20] sm:$0xff] }
 0x11a   :  { %5562 = vmatpush1.bf16.msra.mxu0 %v11090_v33  ;;  %6918 = vmatpush1.bf16.msra.mxu1 %v11093_v34  ;;  %v506_v33 = vpack.c.bf16 %v146_v29, %v122_v28  ;;  %v11147_v34 = vld [vmem:[#allocation5 + $0x5e8] ss:$16 sps:$4 sm:$0xff]   ;;  %v337_v28 = vld [vmem:[#allocation2 + $0x6e0] sm:$0xff] }
 0x11b   :  { %5563 = vmatprep.subr.bf16.mxu0 %v11098_v38  ;;  %6919 = vmatprep.subr.bf16.mxu1 %v11101_v39  ;;  %v11155_v38 = vld [vmem:[#allocation5 + $0x60c] ss:$16 sps:$4 sm:$0xff]   ;;  %v11150_v39 = vld [vmem:[#allocation5 + $0x600] ss:$16 sps:$4 sm:$0xff]   ;;  %v11200_v29 = vld [vmem:[#allocation5 + $0x704] ss:$16 sps:$4 sm:$0xff]  }
 0x11c   :  { %5508 = vmatprep.mubr.bf16.mxu0 %v600_v40  ;;  %6864 = vmatprep.mubr.bf16.mxu1 %v600_v40  ;;  %v11153_v40 = vld [vmem:[#allocation5 + $0x608] ss:$16 sps:$4 sm:$0xff]  }
 0x11e   :  { %5564 = vmatpush1.bf16.msra.mxu0 %v11096_v41  ;;  %6920 = vmatpush1.bf16.msra.mxu1 %v11099_v42  ;;  %v505_v41 = vpack.c.bf16 %v145_v36, %v121_v35  ;;  %v170_v42 = vld [vmem:[#allocation2 + $0x1a8] sm:$0xff]  ;;  %v11206_v36 = vld [vmem:[#allocation5 + $0x724] ss:$16 sps:$4 sm:$0xff]  }
 0x11f   :  { %5565 = vmatprep.subr.bf16.mxu0 %v11104_v45  ;;  %6921 = vmatprep.subr.bf16.mxu1 %v11107_v46  ;;  %v11161_v45 = vld [vmem:[#allocation5 + $0x62c] ss:$16 sps:$4 sm:$0xff]   ;;  %v530_v46 = vpack.c.bf16 %v194_v43, %v170_v42  ;;  %v385_v42 = vld [vmem:[#allocation2 + $0x860] sm:$0xff] }
 0x120   :  { %v386_v35 = vld [vmem:[#allocation2 + $0x868] sm:$0xff]  ;;  %v11212_v43 = vld [vmem:[#allocation5 + $0x744] ss:$16 sps:$4 sm:$0xff]  }
 0x121   :  { %5509 = vmatmul.mubr.bf16.gmra.mrb[16].mxu0 %v599_v49  ;;  %6865 = vmatmul.mubr.bf16.gmra.mrb[16].mxu1 %v599_v49  ;;  %v169_v49 = vld [vmem:[#allocation2 + $0x1a0] sm:$0xff] }
 0x122   :  { %5566 = vmatpush1.bf16.msra.mxu0 %v11102_v47  ;;  %6922 = vmatpush1.bf16.msra.mxu1 %v11105_v48  ;;  %v11156_v47 = vld [vmem:[#allocation5 + $0x620] ss:$16 sps:$4 sm:$0xff]   ;;  %v11159_v48 = vld [vmem:[#allocation5 + $0x628] ss:$16 sps:$4 sm:$0xff]  }
 0x123   :  { %5567 = vmatprep.subr.bf16.mxu0 %v11110_v52  ;;  %6923 = vmatprep.subr.bf16.mxu1 %v11113_v53  ;;  %v11167_v52 = vld [vmem:[#allocation5 + $0x64c] ss:$16 sps:$4 sm:$0xff]   ;;  %v11162_v53 = vld [vmem:[#allocation5 + $0x640] ss:$16 sps:$4 sm:$0xff]  }
 0x124   :  { %5518 = vmatprep.mubr.bf16.mxu0 %v624_v55  ;;  %6874 = vmatprep.mubr.bf16.mxu1 %v624_v55  ;;  %v529_v55 = vpack.c.bf16 %v193_v50, %v169_v49  ;;  %v434_v49 = vld [vmem:[#allocation2 + $0x9e8] sm:$0xff]  ;;  %v11218_v50 = vld [vmem:[#allocation5 + $0x764] ss:$16 sps:$4 sm:$0xff]  }
 0x126   :  { %5568 = vmatpush1.bf16.msra.mxu0 %v11108_v54  ;;  %6924 = vmatpush1.bf16.msra.mxu1 %v11111_v56  ;;  %v11165_v54 = vld [vmem:[#allocation5 + $0x648] ss:$16 sps:$4 sm:$0xff]  }
 0x127   :  { %5569 = vmatprep.subr.bf16.mxu0 %v11116_v59  ;;  %6925 = vmatprep.subr.bf16.mxu1 %v11119_v60  ;;  %v218_v56 = vld [vmem:[#allocation2 + $0x328] sm:$0xff]  ;;  %v11168_v60 = vld [vmem:[#allocation5 + $0x660] ss:$16 sps:$4 sm:$0xff]  }
 0x128   :  { %v11173_v59 = vld [vmem:[#allocation5 + $0x66c] ss:$16 sps:$4 sm:$0xff]  }
 0x129   :  { %5519 = vmatmul.mubr.bf16.gmra.mrb[20].mxu0 %v623_v62  ;;  %6875 = vmatmul.mubr.bf16.gmra.mrb[20].mxu1 %v623_v62  ;;  %v11171_v62 = vld [vmem:[#allocation5 + $0x668] ss:$16 sps:$4 sm:$0xff]  }
 0x12a   :  { %5570 = vmatpush1.bf16.msra.mxu0 %v11114_v61  ;;  %6926 = vmatpush1.bf16.msra.mxu1 %v11117_v1  ;;  %v554_v61 = vpack.c.bf16 %v242_v57, %v218_v56  ;;  %v11176_v1 = vld [vmem:[#allocation5 + $0x684] ss:$16 sps:$4 sm:$0xff]  }
 0x12b   :  { %5571 = vmatprep.subr.bf16.mxu0 %v11122_v2  ;;  %6927 = vmatprep.subr.bf16.mxu1 %v11125_v3  ;;  %v11179_v2 = vld [vmem:[#allocation5 + $0x68c] ss:$16 sps:$4 sm:$0xff]   ;;  %v11174_v3 = vld [vmem:[#allocation5 + $0x680] ss:$16 sps:$4 sm:$0xff]   ;;  %v11224_v57 = vld [vmem:[#allocation5 + $0x784] ss:$16 sps:$4 sm:$0xff]  }
 0x12c   :  { %5528 = vmatprep.mubr.bf16.mxu0 %v648_v6  ;;  %6884 = vmatprep.mubr.bf16.mxu1 %v648_v6  ;;  %v290_v6 = vld [vmem:[#allocation2 + $0x568] sm:$0xff]  ;;  %v433_v56 = vld [vmem:[#allocation2 + $0x9e0] sm:$0xff] }
 0x12e   :  { %5572 = vmatpush1.bf16.msra.mxu0 %v11120_v4  ;;  %6928 = vmatpush1.bf16.msra.mxu1 %v11123_v5  ;;  %v553_v4 = vpack.c.bf16 %v241_v0, %v217_v63  ;;  %v266_v5 = vld [vmem:[#allocation2 + $0x4a8] sm:$0xff]  ;;  %v11230_v0 = vld [vmem:[#allocation5 + $0x7a4] ss:$16 sps:$4 sm:$0xff]  }
 0x12f   :  { %5573 = vmatprep.subr.bf16.mxu0 %v11128_v9  ;;  %6929 = vmatprep.subr.bf16.mxu1 %v11131_v10  ;;  %v11185_v9 = vld [vmem:[#allocation5 + $0x6ac] ss:$16 sps:$4 sm:$0xff]   ;;  %v11180_v10 = vld [vmem:[#allocation5 + $0x6a0] ss:$16 sps:$4 sm:$0xff]   ;;  %v578_v12 = vpack.c.bf16 %v290_v6, %v266_v5 }
 0x130   :  { %v482_v63 = vld [vmem:[#allocation2 + $0xb68] sm:$0xff]  ;;  %v457_v5 = vld [vmem:[#allocation2 + $0xaa0] sm:$0xff] }
 0x131   :  { %5529 = vmatmul.mubr.bf16.gmra.mrb[24].mxu0 %v647_v11  ;;  %6885 = vmatmul.mubr.bf16.gmra.mrb[24].mxu1 %v647_v11  ;;  %v11183_v11 = vld [vmem:[#allocation5 + $0x6a8] ss:$16 sps:$4 sm:$0xff]   ;;  %v481_v6 = vld [vmem:[#allocation2 + $0xb60] sm:$0xff] }
 0x132   :  { %5574 = vmatpush1.bf16.msra.mxu0 %v11126_v14  ;;  %6930 = vmatpush1.bf16.msra.mxu1 %v11129_v15  ;;  %v289_v14 = vld [vmem:[#allocation2 + $0x560] sm:$0xff] }
 0x133   :  { %5575 = vmatprep.subr.bf16.mxu0 %v11134_v16  ;;  %6931 = vmatprep.subr.bf16.mxu1 %v11137_v17  ;;  %v11188_v15 = vld [vmem:[#allocation5 + $0x6c4] ss:$16 sps:$4 sm:$0xff]   ;;  %v11191_v16 = vld [vmem:[#allocation5 + $0x6cc] ss:$16 sps:$4 sm:$0xff]   ;;  %v577_v17 = vpack.c.bf16 %v289_v14, %v265_v13  ;;  %v11237_v13 = vld [vmem:[#allocation5 + $0x7c8] ss:$16 sps:$4 sm:$0xff]  }
 0x134   :  { %5538 = vmatprep.mubr.bf16.mxu0 %v672_v20  ;;  %6894 = vmatprep.mubr.bf16.mxu1 %v672_v20  ;;  %v11186_v20 = vld [vmem:[#allocation5 + $0x6c0] ss:$16 sps:$4 sm:$0xff]   ;;  %v11242_v14 = vld [vmem:[#allocation5 + $0x7e4] ss:$16 sps:$4 sm:$0xff]  }
 0x136   :  { %5576 = vmatpush1.bf16.msra.mxu0 %v11132_v18  ;;  %6932 = vmatpush1.bf16.msra.mxu1 %v11135_v19  ;;  %v314_v18 = vld [vmem:[#allocation2 + $0x628] sm:$0xff] }
 0x137   :  { %5577 = vmatprep.subr.bf16.mxu0 %v11140_v23  ;;  %6933 = vmatprep.subr.bf16.mxu1 %v11143_v24  ;;  %v338_v19 = vld [vmem:[#allocation2 + $0x6e8] sm:$0xff]  ;;  %v11192_v24 = vld [vmem:[#allocation5 + $0x6e0] ss:$16 sps:$4 sm:$0xff]  }
 0x138   :  { %v11197_v23 = vld [vmem:[#allocation5 + $0x6ec] ss:$16 sps:$4 sm:$0xff]  }
 0x139   :  { %5539 = vmatmul.mubr.bf16.gmra.mrb[28].mxu0 %v671_v26  ;;  %6895 = vmatmul.mubr.bf16.gmra.mrb[28].mxu1 %v671_v26  ;;  %v602_v26 = vpack.c.bf16 %v338_v19, %v314_v18  ;;  %v123_v19 = vld [vmem:[#allocation2 + $0x30] sm:$0xff] }
 0x13a   :  { %5578 = vmatpush1.bf16.msra.mxu0 %v11138_v25  ;;  %6934 = vmatpush1.bf16.msra.mxu1 %v11141_v27  ;;  %v11195_v25 = vld [vmem:[#allocation5 + $0x6e8] ss:$16 sps:$4 sm:$0xff]   ;;  %v313_v27 = vld [vmem:[#allocation2 + $0x620] sm:$0xff] }
 0x13b   :  { %5579 = vmatprep.subr.bf16.mxu0 %v11146_v30  ;;  %6935 = vmatprep.subr.bf16.mxu1 %v11149_v31  ;;  %v11203_v30 = vld [vmem:[#allocation5 + $0x70c] ss:$16 sps:$4 sm:$0xff]   ;;  %v11198_v31 = vld [vmem:[#allocation5 + $0x700] ss:$16 sps:$4 sm:$0xff]  }
 0x13c   :  { %5581 = vmatprep.mubr.bf16.mxu0 %v506_v33  ;;  %6937 = vmatprep.mubr.bf16.mxu1 %v506_v33  ;;  %v11201_v33 = vld [vmem:[#allocation5 + $0x708] ss:$16 sps:$4 sm:$0xff]  }
 0x13e   :  { %5580 = vmatpush1.bf16.msra.mxu0 %v11144_v32  ;;  %6936 = vmatpush1.bf16.msra.mxu1 %v11147_v34  ;;  %v601_v32 = vpack.c.bf16 %v337_v28, %v313_v27  ;;  %v362_v34 = vld [vmem:[#allocation2 + $0x7a8] sm:$0xff]  ;;  %v11254_v28 = vld [vmem:[#allocation5 + $0x824] ss:$16 sps:$4 sm:$0xff]  }
 0x13f   :  { %5662 = vmatprep.subr.bf16.mxu0 %v11152_v37  ;;  %7018 = vmatprep.subr.bf16.mxu1 %v11155_v38  ;;  %v11209_v37 = vld [vmem:[#allocation5 + $0x72c] ss:$16 sps:$4 sm:$0xff]   ;;  %v11204_v38 = vld [vmem:[#allocation5 + $0x720] ss:$16 sps:$4 sm:$0xff]   ;;  %v11249_v27 = vld [vmem:[#allocation5 + $0x808] ss:$16 sps:$4 sm:$0xff]  }
 0x141   :  { %5582 = vmatmul.mubr.bf16.vlgmr.msra.gmra.mrb[0].mxu0 %v505_v41  ;;  %6938 = vmatmul.mubr.bf16.vlgmr.msra.gmra.mrb[0].mxu1 %v505_v41  ;;  %v361_v41 = vld [vmem:[#allocation2 + $0x7a0] sm:$0xff] }
 0x142   :  { %5663 = vmatpush1.bf16.msra.mxu0 %v11150_v39  ;;  %7019 = vmatpush1.bf16.msra.mxu1 %v11153_v40  ;;  %v626_v39 = vpack.c.bf16 %v386_v35, %v362_v34  ;;  %v11207_v40 = vld [vmem:[#allocation5 + $0x728] ss:$16 sps:$4 sm:$0xff]   ;;  %v195_v34 = vld [vmem:[#allocation2 + $0x270] sm:$0xff] }
 0x143   :  { %5664 = vmatprep.subr.bf16.mxu0 %v11158_v44  ;;  %7020 = vmatprep.subr.bf16.mxu1 %v11161_v45  ;;  %v11215_v44 = vld [vmem:[#allocation5 + $0x74c] ss:$16 sps:$4 sm:$0xff]   ;;  %v11210_v45 = vld [vmem:[#allocation5 + $0x740] ss:$16 sps:$4 sm:$0xff]   ;;  %v11260_v35 = vld [vmem:[#allocation5 + $0x844] ss:$16 sps:$4 sm:$0xff]  }
 0x144   :  { %5591 = vmatprep.mubr.bf16.mxu0 %v530_v46  ;;  %6947 = vmatprep.mubr.bf16.mxu1 %v530_v46  ;;  %v11213_v46 = vld [vmem:[#allocation5 + $0x748] ss:$16 sps:$4 sm:$0xff]  }
 0x146   :  { %5665 = vmatpush1.bf16.msra.mxu0 %v11156_v47  ;;  %7021 = vmatpush1.bf16.msra.mxu1 %v11159_v48  ;;  %v625_v47 = vpack.c.bf16 %v385_v42, %v361_v41  ;;  %v410_v48 = vld [vmem:[#allocation2 + $0x928] sm:$0xff]  ;;  %v244_v41 = vld [vmem:[#allocation2 + $0x3f8] sm:$0xff]  ;;  %v11266_v42 = vld [vmem:[#allocation5 + $0x864] ss:$16 sps:$4 sm:$0xff]  }
 0x147   :  { %5666 = vmatprep.subr.bf16.mxu0 %v11164_v51  ;;  %7022 = vmatprep.subr.bf16.mxu1 %v11167_v52  ;;  %v11221_v51 = vld [vmem:[#allocation5 + $0x76c] ss:$16 sps:$4 sm:$0xff]   ;;  %v650_v52 = vpack.c.bf16 %v434_v49, %v410_v48  ;;  %v243_v48 = vld [vmem:[#allocation2 + $0x3f0] sm:$0xff] }
 0x148   :  { %v11272_v49 = vld [vmem:[#allocation5 + $0x884] ss:$16 sps:$4 sm:$0xff]  }
 0x149   :  { %5592 = vmatmul.mubr.bf16.gmra.mrb[4].mxu0 %v529_v55  ;;  %6948 = vmatmul.mubr.bf16.gmra.mrb[4].mxu1 %v529_v55  ;;  %v409_v55 = vld [vmem:[#allocation2 + $0x920] sm:$0xff] }
 0x14a   :  { %5667 = vmatpush1.bf16.msra.mxu0 %v11162_v53  ;;  %7023 = vmatpush1.bf16.msra.mxu1 %v11165_v54  ;;  %v11216_v53 = vld [vmem:[#allocation5 + $0x760] ss:$16 sps:$4 sm:$0xff]   ;;  %v11219_v54 = vld [vmem:[#allocation5 + $0x768] ss:$16 sps:$4 sm:$0xff]  }
 0x14b   :  { %5668 = vmatprep.subr.bf16.mxu0 %v11170_v58  ;;  %7024 = vmatprep.subr.bf16.mxu1 %v11173_v59  ;;  %v11227_v58 = vld [vmem:[#allocation5 + $0x78c] ss:$16 sps:$4 sm:$0xff]   ;;  %v11222_v59 = vld [vmem:[#allocation5 + $0x780] ss:$16 sps:$4 sm:$0xff]  }
 0x14c   :  { %5601 = vmatprep.mubr.bf16.mxu0 %v554_v61  ;;  %6957 = vmatprep.mubr.bf16.mxu1 %v554_v61  ;;  %v649_v61 = vpack.c.bf16 %v433_v56, %v409_v55  ;;  %v292_v55 = vld [vmem:[#allocation2 + $0x578] sm:$0xff]  ;;  %v11278_v56 = vld [vmem:[#allocation5 + $0x8a4] ss:$16 sps:$4 sm:$0xff]  }
 0x14e   :  { %5669 = vmatpush1.bf16.msra.mxu0 %v11168_v60  ;;  %7025 = vmatpush1.bf16.msra.mxu1 %v11171_v62  ;;  %v11225_v60 = vld [vmem:[#allocation5 + $0x788] ss:$16 sps:$4 sm:$0xff]  }
 0x14f   :  { %5670 = vmatprep.subr.bf16.mxu0 %v11176_v1  ;;  %7026 = vmatprep.subr.bf16.mxu1 %v11179_v2  ;;  %v458_v62 = vld [vmem:[#allocation2 + $0xaa8] sm:$0xff]  ;;  %v11228_v2 = vld [vmem:[#allocation5 + $0x7a0] ss:$16 sps:$4 sm:$0xff]  }
 0x150   :  { %v11233_v1 = vld [vmem:[#allocation5 + $0x7ac] ss:$16 sps:$4 sm:$0xff]  }
 0x151   :  { %5602 = vmatmul.mubr.bf16.gmra.mrb[8].mxu0 %v553_v4  ;;  %6958 = vmatmul.mubr.bf16.gmra.mrb[8].mxu1 %v553_v4  ;;  %v11231_v4 = vld [vmem:[#allocation5 + $0x7a8] ss:$16 sps:$4 sm:$0xff]  }
 0x152   :  { %5671 = vmatpush1.bf16.msra.mxu0 %v11174_v3  ;;  %7027 = vmatpush1.bf16.msra.mxu1 %v11177_v7  ;;  %v674_v3 = vpack.c.bf16 %v482_v63, %v458_v62  ;;  %v11236_v7 = vld [vmem:[#allocation5 + $0x7c4] ss:$16 sps:$4 sm:$0xff]  }
 0x153   :  { %5672 = vmatprep.subr.bf16.mxu0 %v11182_v8  ;;  %7028 = vmatprep.subr.bf16.mxu1 %v11185_v9  ;;  %v11239_v8 = vld [vmem:[#allocation5 + $0x7cc] ss:$16 sps:$4 sm:$0xff]   ;;  %v11234_v9 = vld [vmem:[#allocation5 + $0x7c0] ss:$16 sps:$4 sm:$0xff]   ;;  %v11284_v63 = vld [vmem:[#allocation5 + $0x8c4] ss:$16 sps:$4 sm:$0xff]  }
 0x154   :  { %5611 = vmatprep.mubr.bf16.mxu0 %v578_v12  ;;  %6967 = vmatprep.mubr.bf16.mxu1 %v578_v12  ;;  %v148_v12 = vld [vmem:[#allocation2 + $0xf8] sm:$0xff]  ;;  %v291_v62 = vld [vmem:[#allocation2 + $0x570] sm:$0xff] }
 0x156   :  { %5673 = vmatpush1.bf16.msra.mxu0 %v11180_v10  ;;  %7029 = vmatpush1.bf16.msra.mxu1 %v11183_v11  ;;  %v673_v10 = vpack.c.bf16 %v481_v6, %v457_v5  ;;  %v124_v11 = vld [vmem:[#allocation2 + $0x38] sm:$0xff]  ;;  %v11290_v6 = vld [vmem:[#allocation5 + $0x8e4] ss:$16 sps:$4 sm:$0xff]  }
 0x157   :  { %5674 = vmatprep.subr.bf16.mxu0 %v11188_v15  ;;  %7030 = vmatprep.subr.bf16.mxu1 %v11191_v16  ;;  %v11245_v15 = vld [vmem:[#allocation5 + $0x7ec] ss:$16 sps:$4 sm:$0xff]   ;;  %v11240_v16 = vld [vmem:[#allocation5 + $0x7e0] ss:$16 sps:$4 sm:$0xff]   ;;  %v508_v18 = vpack.c.bf16 %v148_v12, %v124_v11 }
 0x158   :  { %v340_v5 = vld [vmem:[#allocation2 + $0x6f8] sm:$0xff]  ;;  %v315_v11 = vld [vmem:[#allocation2 + $0x630] sm:$0xff] }
 0x159   :  { %5612 = vmatmul.mubr.bf16.gmra.mrb[12].mxu0 %v577_v17  ;;  %6968 = vmatmul.mubr.bf16.gmra.mrb[12].mxu1 %v577_v17  ;;  %v11243_v17 = vld [vmem:[#allocation5 + $0x7e8] ss:$16 sps:$4 sm:$0xff]   ;;  %v339_v12 = vld [vmem:[#allocation2 + $0x6f0] sm:$0xff] }
 0x15a   :  { %5675 = vmatpush1.bf16.msra.mxu0 %v11186_v20  ;;  %7031 = vmatpush1.bf16.msra.mxu1 %v11189_v21  ;;  %v147_v20 = vld [vmem:[#allocation2 + $0xf0] sm:$0xff] }
 0x15b   :  { %5676 = vmatprep.subr.bf16.mxu0 %v11194_v22  ;;  %7032 = vmatprep.subr.bf16.mxu1 %v11197_v23  ;;  %v11248_v21 = vld [vmem:[#allocation5 + $0x804] ss:$16 sps:$4 sm:$0xff]   ;;  %v11251_v22 = vld [vmem:[#allocation5 + $0x80c] ss:$16 sps:$4 sm:$0xff]   ;;  %v507_v23 = vpack.c.bf16 %v147_v20, %v123_v19  ;;  %v11297_v19 = vld [vmem:[#allocation5 + $0x908] ss:$16 sps:$4 sm:$0xff]  }
 0x15c   :  { %5621 = vmatprep.mubr.bf16.mxu0 %v602_v26  ;;  %6977 = vmatprep.mubr.bf16.mxu1 %v602_v26  ;;  %v11246_v26 = vld [vmem:[#allocation5 + $0x800] ss:$16 sps:$4 sm:$0xff]   ;;  %v11302_v20 = vld [vmem:[#allocation5 + $0x924] ss:$16 sps:$4 sm:$0xff]  }
 0x15e   :  { %5677 = vmatpush1.bf16.msra.mxu0 %v11192_v24  ;;  %7033 = vmatpush1.bf16.msra.mxu1 %v11195_v25  ;;  %v172_v24 = vld [vmem:[#allocation2 + $0x1b8] sm:$0xff] }
 0x15f   :  { %5678 = vmatprep.subr.bf16.mxu0 %v11200_v29  ;;  %7034 = vmatprep.subr.bf16.mxu1 %v11203_v30  ;;  %v196_v25 = vld [vmem:[#allocation2 + $0x278] sm:$0xff]  ;;  %v11252_v30 = vld [vmem:[#allocation5 + $0x820] ss:$16 sps:$4 sm:$0xff]  }
 0x160   :  { %v11257_v29 = vld [vmem:[#allocation5 + $0x82c] ss:$16 sps:$4 sm:$0xff]  }
 0x161   :  { %5622 = vmatmul.mubr.bf16.gmra.mrb[16].mxu0 %v601_v32  ;;  %6978 = vmatmul.mubr.bf16.gmra.mrb[16].mxu1 %v601_v32  ;;  %v532_v32 = vpack.c.bf16 %v196_v25, %v172_v24  ;;  %v363_v25 = vld [vmem:[#allocation2 + $0x7b0] sm:$0xff] }
 0x162   :  { %5679 = vmatpush1.bf16.msra.mxu0 %v11198_v31  ;;  %7035 = vmatpush1.bf16.msra.mxu1 %v11201_v33  ;;  %v11255_v31 = vld [vmem:[#allocation5 + $0x828] ss:$16 sps:$4 sm:$0xff]   ;;  %v171_v33 = vld [vmem:[#allocation2 + $0x1b0] sm:$0xff] }
 0x163   :  { %5680 = vmatprep.subr.bf16.mxu0 %v11206_v36  ;;  %7036 = vmatprep.subr.bf16.mxu1 %v11209_v37  ;;  %v11263_v36 = vld [vmem:[#allocation5 + $0x84c] ss:$16 sps:$4 sm:$0xff]   ;;  %v11258_v37 = vld [vmem:[#allocation5 + $0x840] ss:$16 sps:$4 sm:$0xff]  }
 0x164   :  { %5631 = vmatprep.mubr.bf16.mxu0 %v626_v39  ;;  %6987 = vmatprep.mubr.bf16.mxu1 %v626_v39  ;;  %v11261_v39 = vld [vmem:[#allocation5 + $0x848] ss:$16 sps:$4 sm:$0xff]  }
 0x166   :  { %5681 = vmatpush1.bf16.msra.mxu0 %v11204_v38  ;;  %7037 = vmatpush1.bf16.msra.mxu1 %v11207_v40  ;;  %v531_v38 = vpack.c.bf16 %v195_v34, %v171_v33  ;;  %v220_v40 = vld [vmem:[#allocation2 + $0x338] sm:$0xff]  ;;  %v11314_v34 = vld [vmem:[#allocation5 + $0x964] ss:$16 sps:$4 sm:$0xff]  }
 0x167   :  { %5682 = vmatprep.subr.bf16.mxu0 %v11212_v43  ;;  %7038 = vmatprep.subr.bf16.mxu1 %v11215_v44  ;;  %v11269_v43 = vld [vmem:[#allocation5 + $0x86c] ss:$16 sps:$4 sm:$0xff]   ;;  %v11264_v44 = vld [vmem:[#allocation5 + $0x860] ss:$16 sps:$4 sm:$0xff]   ;;  %v11309_v33 = vld [vmem:[#allocation5 + $0x948] ss:$16 sps:$4 sm:$0xff]  }
 0x169   :  { %5632 = vmatmul.mubr.bf16.gmra.mrb[20].mxu0 %v625_v47  ;;  %6988 = vmatmul.mubr.bf16.gmra.mrb[20].mxu1 %v625_v47  ;;  %v219_v47 = vld [vmem:[#allocation2 + $0x330] sm:$0xff] }
 0x16a   :  { %5683 = vmatpush1.bf16.msra.mxu0 %v11210_v45  ;;  %7039 = vmatpush1.bf16.msra.mxu1 %v11213_v46  ;;  %v556_v45 = vpack.c.bf16 %v244_v41, %v220_v40  ;;  %v11267_v46 = vld [vmem:[#allocation5 + $0x868] ss:$16 sps:$4 sm:$0xff]   ;;  %v435_v40 = vld [vmem:[#allocation2 + $0x9f0] sm:$0xff] }
 0x16b   :  { %5684 = vmatprep.subr.bf16.mxu0 %v11218_v50  ;;  %7040 = vmatprep.subr.bf16.mxu1 %v11221_v51  ;;  %v11275_v50 = vld [vmem:[#allocation5 + $0x88c] ss:$16 sps:$4 sm:$0xff]   ;;  %v11270_v51 = vld [vmem:[#allocation5 + $0x880] ss:$16 sps:$4 sm:$0xff]   ;;  %v11320_v41 = vld [vmem:[#allocation5 + $0x984] ss:$16 sps:$4 sm:$0xff]  }
 0x16c   :  { %5641 = vmatprep.mubr.bf16.mxu0 %v650_v52  ;;  %6997 = vmatprep.mubr.bf16.mxu1 %v650_v52  ;;  %v11273_v52 = vld [vmem:[#allocation5 + $0x888] ss:$16 sps:$4 sm:$0xff]  }
 0x16e   :  { %5685 = vmatpush1.bf16.msra.mxu0 %v11216_v53  ;;  %7041 = vmatpush1.bf16.msra.mxu1 %v11219_v54  ;;  %v555_v53 = vpack.c.bf16 %v243_v48, %v219_v47  ;;  %v268_v54 = vld [vmem:[#allocation2 + $0x4b8] sm:$0xff]  ;;  %v11326_v48 = vld [vmem:[#allocation5 + $0x9a4] ss:$16 sps:$4 sm:$0xff]  }
 0x16f   :  { %5686 = vmatprep.subr.bf16.mxu0 %v11224_v57  ;;  %7042 = vmatprep.subr.bf16.mxu1 %v11227_v58  ;;  %v11281_v57 = vld [vmem:[#allocation5 + $0x8ac] ss:$16 sps:$4 sm:$0xff]   ;;  %v580_v58 = vpack.c.bf16 %v292_v55, %v268_v54  ;;  %v483_v54 = vld [vmem:[#allocation2 + $0xb70] sm:$0xff] }
 0x170   :  { %v484_v47 = vld [vmem:[#allocation2 + $0xb78] sm:$0xff]  ;;  %v11332_v55 = vld [vmem:[#allocation5 + $0x9c4] ss:$16 sps:$4 sm:$0xff]  }
 0x171   :  { %5642 = vmatmul.mubr.bf16.gmra.mrb[24].mxu0 %v649_v61  ;;  %6998 = vmatmul.mubr.bf16.gmra.mrb[24].mxu1 %v649_v61  ;;  %v267_v61 = vld [vmem:[#allocation2 + $0x4b0] sm:$0xff] }
 0x172   :  { %5687 = vmatpush1.bf16.msra.mxu0 %v11222_v59  ;;  %7043 = vmatpush1.bf16.msra.mxu1 %v11225_v60  ;;  %v11276_v59 = vld [vmem:[#allocation5 + $0x8a0] ss:$16 sps:$4 sm:$0xff]   ;;  %v11279_v60 = vld [vmem:[#allocation5 + $0x8a8] ss:$16 sps:$4 sm:$0xff]  }
 0x173   :  { %5688 = vmatprep.subr.bf16.mxu0 %v11230_v0  ;;  %7044 = vmatprep.subr.bf16.mxu1 %v11233_v1  ;;  %v11287_v0 = vld [vmem:[#allocation5 + $0x8cc] ss:$16 sps:$4 sm:$0xff]   ;;  %v11282_v1 = vld [vmem:[#allocation5 + $0x8c0] ss:$16 sps:$4 sm:$0xff]  }
 0x174   :  { %5651 = vmatprep.mubr.bf16.mxu0 %v674_v3  ;;  %7007 = vmatprep.mubr.bf16.mxu1 %v674_v3  ;;  %v579_v3 = vpack.c.bf16 %v291_v62, %v267_v61  ;;  %v150_v61 = vld [vmem:[#allocation2 + $0x108] sm:$0xff]  ;;  %v11338_v62 = vld [vmem:[#allocation5 + $0x9e4] ss:$16 sps:$4 sm:$0xff]  }
 0x176   :  { %5689 = vmatpush1.bf16.msra.mxu0 %v11228_v2  ;;  %7045 = vmatpush1.bf16.msra.mxu1 %v11231_v4  ;;  %v11285_v2 = vld [vmem:[#allocation5 + $0x8c8] ss:$16 sps:$4 sm:$0xff]  }
 0x177   :  { %5690 = vmatprep.subr.bf16.mxu0 %v11236_v7  ;;  %7046 = vmatprep.subr.bf16.mxu1 %v11239_v8  ;;  %v316_v4 = vld [vmem:[#allocation2 + $0x638] sm:$0xff]  ;;  %v11288_v8 = vld [vmem:[#allocation5 + $0x8e0] ss:$16 sps:$4 sm:$0xff]  }
 0x178   :  { %v11293_v7 = vld [vmem:[#allocation5 + $0x8ec] ss:$16 sps:$4 sm:$0xff]  }
 0x179   :  { %5652 = vmatmul.mubr.bf16.gmra.mrb[28].mxu0 %v673_v10  ;;  %7008 = vmatmul.mubr.bf16.gmra.mrb[28].mxu1 %v673_v10  ;;  %v11291_v10 = vld [vmem:[#allocation5 + $0x8e8] ss:$16 sps:$4 sm:$0xff]  }
 0x17a   :  { %5691 = vmatpush1.bf16.msra.mxu0 %v11234_v9  ;;  %7047 = vmatpush1.bf16.msra.mxu1 %v11237_v13  ;;  %v604_v9 = vpack.c.bf16 %v340_v5, %v316_v4  ;;  %v11296_v13 = vld [vmem:[#allocation5 + $0x904] ss:$16 sps:$4 sm:$0xff]  }
 0x17b   :  { %5692 = vmatprep.subr.bf16.mxu0 %v11242_v14  ;;  %7048 = vmatprep.subr.bf16.mxu1 %v11245_v15  ;;  %v11299_v14 = vld [vmem:[#allocation5 + $0x90c] ss:$16 sps:$4 sm:$0xff]   ;;  %v11294_v15 = vld [vmem:[#allocation5 + $0x900] ss:$16 sps:$4 sm:$0xff]   ;;  %v11344_v5 = vld [vmem:[#allocation5 + $0xa04] ss:$16 sps:$4 sm:$0xff]  }
 0x17c   :  { %5694 = vmatprep.mubr.bf16.mxu0 %v508_v18  ;;  %7050 = vmatprep.mubr.bf16.mxu1 %v508_v18  ;;  %v388_v18 = vld [vmem:[#allocation2 + $0x878] sm:$0xff]  ;;  %v149_v4 = vld [vmem:[#allocation2 + $0x100] sm:$0xff] }
 0x17e   :  { %5693 = vmatpush1.bf16.msra.mxu0 %v11240_v16  ;;  %7049 = vmatpush1.bf16.msra.mxu1 %v11243_v17  ;;  %v603_v16 = vpack.c.bf16 %v339_v12, %v315_v11  ;;  %v364_v17 = vld [vmem:[#allocation2 + $0x7b8] sm:$0xff]  ;;  %v198_v11 = vld [vmem:[#allocation2 + $0x288] sm:$0xff]  ;;  %v11350_v12 = vld [vmem:[#allocation5 + $0xa24] ss:$16 sps:$4 sm:$0xff]  }
 0x17f   :  { %5775 = vmatprep.subr.bf16.mxu0 %v11248_v21  ;;  %7131 = vmatprep.subr.bf16.mxu1 %v11251_v22  ;;  %v11305_v21 = vld [vmem:[#allocation5 + $0x92c] ss:$16 sps:$4 sm:$0xff]   ;;  %v11300_v22 = vld [vmem:[#allocation5 + $0x920] ss:$16 sps:$4 sm:$0xff]   ;;  %v628_v24 = vpack.c.bf16 %v388_v18, %v364_v17 }
 0x180   :  { %v173_v17 = vld [vmem:[#allocation2 + $0x1c0] sm:$0xff] }
 0x181   :  { %5695 = vmatmul.mubr.bf16.vlgmr.msra.gmra.mrb[0].mxu0 %v507_v23  ;;  %7051 = vmatmul.mubr.bf16.vlgmr.msra.gmra.mrb[0].mxu1 %v507_v23  ;;  %v11303_v23 = vld [vmem:[#allocation5 + $0x928] ss:$16 sps:$4 sm:$0xff]   ;;  %v197_v18 = vld [vmem:[#allocation2 + $0x280] sm:$0xff] }
 0x182   :  { %5776 = vmatpush1.bf16.msra.mxu0 %v11246_v26  ;;  %7132 = vmatpush1.bf16.msra.mxu1 %v11249_v27  ;;  %v387_v26 = vld [vmem:[#allocation2 + $0x870] sm:$0xff] }
 0x183   :  { %5777 = vmatprep.subr.bf16.mxu0 %v11254_v28  ;;  %7133 = vmatprep.subr.bf16.mxu1 %v11257_v29  ;;  %v11308_v27 = vld [vmem:[#allocation5 + $0x944] ss:$16 sps:$4 sm:$0xff]   ;;  %v11311_v28 = vld [vmem:[#allocation5 + $0x94c] ss:$16 sps:$4 sm:$0xff]   ;;  %v627_v29 = vpack.c.bf16 %v387_v26, %v363_v25  ;;  %v11357_v25 = vld [vmem:[#allocation5 + $0xa48] ss:$16 sps:$4 sm:$0xff]  }
 0x184   :  { %5704 = vmatprep.mubr.bf16.mxu0 %v532_v32  ;;  %7060 = vmatprep.mubr.bf16.mxu1 %v532_v32  ;;  %v11306_v32 = vld [vmem:[#allocation5 + $0x940] ss:$16 sps:$4 sm:$0xff]   ;;  %v11362_v26 = vld [vmem:[#allocation5 + $0xa64] ss:$16 sps:$4 sm:$0xff]  }
 0x186   :  { %5778 = vmatpush1.bf16.msra.mxu0 %v11252_v30  ;;  %7134 = vmatpush1.bf16.msra.mxu1 %v11255_v31  ;;  %v412_v30 = vld [vmem:[#allocation2 + $0x938] sm:$0xff] }
 0x187   :  { %5779 = vmatprep.subr.bf16.mxu0 %v11260_v35  ;;  %7135 = vmatprep.subr.bf16.mxu1 %v11263_v36  ;;  %v436_v31 = vld [vmem:[#allocation2 + $0x9f8] sm:$0xff]  ;;  %v11312_v36 = vld [vmem:[#allocation5 + $0x960] ss:$16 sps:$4 sm:$0xff]  }
 0x188   :  { %v11317_v35 = vld [vmem:[#allocation5 + $0x96c] ss:$16 sps:$4 sm:$0xff]  }
 0x189   :  { %5705 = vmatmul.mubr.bf16.gmra.mrb[4].mxu0 %v531_v38  ;;  %7061 = vmatmul.mubr.bf16.gmra.mrb[4].mxu1 %v531_v38  ;;  %v652_v38 = vpack.c.bf16 %v436_v31, %v412_v30  ;;  %v221_v31 = vld [vmem:[#allocation2 + $0x340] sm:$0xff] }
 0x18a   :  { %5780 = vmatpush1.bf16.msra.mxu0 %v11258_v37  ;;  %7136 = vmatpush1.bf16.msra.mxu1 %v11261_v39  ;;  %v11315_v37 = vld [vmem:[#allocation5 + $0x968] ss:$16 sps:$4 sm:$0xff]   ;;  %v411_v39 = vld [vmem:[#allocation2 + $0x930] sm:$0xff] }
 0x18b   :  { %5781 = vmatprep.subr.bf16.mxu0 %v11266_v42  ;;  %7137 = vmatprep.subr.bf16.mxu1 %v11269_v43  ;;  %v11323_v42 = vld [vmem:[#allocation5 + $0x98c] ss:$16 sps:$4 sm:$0xff]   ;;  %v11318_v43 = vld [vmem:[#allocation5 + $0x980] ss:$16 sps:$4 sm:$0xff]  }
 0x18c   :  { %5714 = vmatprep.mubr.bf16.mxu0 %v556_v45  ;;  %7070 = vmatprep.mubr.bf16.mxu1 %v556_v45  ;;  %v11321_v45 = vld [vmem:[#allocation5 + $0x988] ss:$16 sps:$4 sm:$0xff]  }
 0x18e   :  { %5782 = vmatpush1.bf16.msra.mxu0 %v11264_v44  ;;  %7138 = vmatpush1.bf16.msra.mxu1 %v11267_v46  ;;  %v651_v44 = vpack.c.bf16 %v435_v40, %v411_v39  ;;  %v460_v46 = vld [vmem:[#allocation2 + $0xab8] sm:$0xff]  ;;  %v11374_v40 = vld [vmem:[#allocation5 + $0xaa4] ss:$16 sps:$4 sm:$0xff]  }
 0x18f   :  { %5783 = vmatprep.subr.bf16.mxu0 %v11272_v49  ;;  %7139 = vmatprep.subr.bf16.mxu1 %v11275_v50  ;;  %v11329_v49 = vld [vmem:[#allocation5 + $0x9ac] ss:$16 sps:$4 sm:$0xff]   ;;  %v11324_v50 = vld [vmem:[#allocation5 + $0x9a0] ss:$16 sps:$4 sm:$0xff]   ;;  %v11369_v39 = vld [vmem:[#allocation5 + $0xa88] ss:$16 sps:$4 sm:$0xff]  }
 0x191   :  { %5715 = vmatmul.mubr.bf16.gmra.mrb[8].mxu0 %v555_v53  ;;  %7071 = vmatmul.mubr.bf16.gmra.mrb[8].mxu1 %v555_v53  ;;  %v459_v53 = vld [vmem:[#allocation2 + $0xab0] sm:$0xff] }
 0x192   :  { %5784 = vmatpush1.bf16.msra.mxu0 %v11270_v51  ;;  %7140 = vmatpush1.bf16.msra.mxu1 %v11273_v52  ;;  %v676_v51 = vpack.c.bf16 %v484_v47, %v460_v46  ;;  %v11327_v52 = vld [vmem:[#allocation5 + $0x9a8] ss:$16 sps:$4 sm:$0xff]   ;;  %v293_v46 = vld [vmem:[#allocation2 + $0x580] sm:$0xff] }
 0x193   :  { %5785 = vmatprep.subr.bf16.mxu0 %v11278_v56  ;;  %7141 = vmatprep.subr.bf16.mxu1 %v11281_v57  ;;  %v11335_v56 = vld [vmem:[#allocation5 + $0x9cc] ss:$16 sps:$4 sm:$0xff]   ;;  %v11330_v57 = vld [vmem:[#allocation5 + $0x9c0] ss:$16 sps:$4 sm:$0xff]   ;;  %v11380_v47 = vld [vmem:[#allocation5 + $0xac4] ss:$16 sps:$4 sm:$0xff]  }
 0x194   :  { %5724 = vmatprep.mubr.bf16.mxu0 %v580_v58  ;;  %7080 = vmatprep.mubr.bf16.mxu1 %v580_v58  ;;  %v11333_v58 = vld [vmem:[#allocation5 + $0x9c8] ss:$16 sps:$4 sm:$0xff]  }
 0x196   :  { %5786 = vmatpush1.bf16.msra.mxu0 %v11276_v59  ;;  %7142 = vmatpush1.bf16.msra.mxu1 %v11279_v60  ;;  %v675_v59 = vpack.c.bf16 %v483_v54, %v459_v53  ;;  %v126_v60 = vld [vmem:[#allocation2 + $0x48] sm:$0xff]  ;;  %v11386_v54 = vld [vmem:[#allocation5 + $0xae4] ss:$16 sps:$4 sm:$0xff]  }
 0x197   :  { %5787 = vmatprep.subr.bf16.mxu0 %v11284_v63  ;;  %7143 = vmatprep.subr.bf16.mxu1 %v11287_v0  ;;  %v11341_v63 = vld [vmem:[#allocation5 + $0x9ec] ss:$16 sps:$4 sm:$0xff]   ;;  %v510_v0 = vpack.c.bf16 %v150_v61, %v126_v60  ;;  %v341_v60 = vld [vmem:[#allocation2 + $0x700] sm:$0xff] }
 0x198   :  { %v342_v53 = vld [vmem:[#allocation2 + $0x708] sm:$0xff]  ;;  %v11392_v61 = vld [vmem:[#allocation5 + $0xb04] ss:$16 sps:$4 sm:$0xff]  }
 0x199   :  { %5725 = vmatmul.mubr.bf16.gmra.mrb[12].mxu0 %v579_v3  ;;  %7081 = vmatmul.mubr.bf16.gmra.mrb[12].mxu1 %v579_v3  ;;  %v125_v3 = vld [vmem:[#allocation2 + $0x40] sm:$0xff] }
 0x19a   :  { %5788 = vmatpush1.bf16.msra.mxu0 %v11282_v1  ;;  %7144 = vmatpush1.bf16.msra.mxu1 %v11285_v2  ;;  %v11336_v1 = vld [vmem:[#allocation5 + $0x9e0] ss:$16 sps:$4 sm:$0xff]   ;;  %v11339_v2 = vld [vmem:[#allocation5 + $0x9e8] ss:$16 sps:$4 sm:$0xff]  }
 0x19b   :  { %5789 = vmatprep.subr.bf16.mxu0 %v11290_v6  ;;  %7145 = vmatprep.subr.bf16.mxu1 %v11293_v7  ;;  %v11347_v6 = vld [vmem:[#allocation5 + $0xa0c] ss:$16 sps:$4 sm:$0xff]   ;;  %v11342_v7 = vld [vmem:[#allocation5 + $0xa00] ss:$16 sps:$4 sm:$0xff]  }
 0x19c   :  { %5734 = vmatprep.mubr.bf16.mxu0 %v604_v9  ;;  %7090 = vmatprep.mubr.bf16.mxu1 %v604_v9  ;;  %v509_v9 = vpack.c.bf16 %v149_v4, %v125_v3  ;;  %v390_v3 = vld [vmem:[#allocation2 + $0x888] sm:$0xff]  ;;  %v11398_v4 = vld [vmem:[#allocation5 + $0xb24] ss:$16 sps:$4 sm:$0xff]  }
 0x19e   :  { %5790 = vmatpush1.bf16.msra.mxu0 %v11288_v8  ;;  %7146 = vmatpush1.bf16.msra.mxu1 %v11291_v10  ;;  %v11345_v8 = vld [vmem:[#allocation5 + $0xa08] ss:$16 sps:$4 sm:$0xff]  }
 0x19f   :  { %5791 = vmatprep.subr.bf16.mxu0 %v11296_v13  ;;  %7147 = vmatprep.subr.bf16.mxu1 %v11299_v14  ;;  %v174_v10 = vld [vmem:[#allocation2 + $0x1c8] sm:$0xff]  ;;  %v11348_v14 = vld [vmem:[#allocation5 + $0xa20] ss:$16 sps:$4 sm:$0xff]  }
 0x1a0   :  { %v11353_v13 = vld [vmem:[#allocation5 + $0xa2c] ss:$16 sps:$4 sm:$0xff]  }
 0x1a1   :  { %5735 = vmatmul.mubr.bf16.gmra.mrb[16].mxu0 %v603_v16  ;;  %7091 = vmatmul.mubr.bf16.gmra.mrb[16].mxu1 %v603_v16  ;;  %v11351_v16 = vld [vmem:[#allocation5 + $0xa28] ss:$16 sps:$4 sm:$0xff]  }
 0x1a2   :  { %5792 = vmatpush1.bf16.msra.mxu0 %v11294_v15  ;;  %7148 = vmatpush1.bf16.msra.mxu1 %v11297_v19  ;;  %v534_v15 = vpack.c.bf16 %v198_v11, %v174_v10  ;;  %v11356_v19 = vld [vmem:[#allocation5 + $0xa44] ss:$16 sps:$4 sm:$0xff]  }
 0x1a3   :  { %5793 = vmatprep.subr.bf16.mxu0 %v11302_v20  ;;  %7149 = vmatprep.subr.bf16.mxu1 %v11305_v21  ;;  %v11359_v20 = vld [vmem:[#allocation5 + $0xa4c] ss:$16 sps:$4 sm:$0xff]   ;;  %v11354_v21 = vld [vmem:[#allocation5 + $0xa40] ss:$16 sps:$4 sm:$0xff]   ;;  %v11404_v11 = vld [vmem:[#allocation5 + $0xb44] ss:$16 sps:$4 sm:$0xff]  }
 0x1a4   :  { %5744 = vmatprep.mubr.bf16.mxu0 %v628_v24  ;;  %7100 = vmatprep.mubr.bf16.mxu1 %v628_v24  ;;  %v246_v24 = vld [vmem:[#allocation2 + $0x408] sm:$0xff]  ;;  %v389_v10 = vld [vmem:[#allocation2 + $0x880] sm:$0xff] }
 0x1a6   :  { %5794 = vmatpush1.bf16.msra.mxu0 %v11300_v22  ;;  %7150 = vmatpush1.bf16.msra.mxu1 %v11303_v23  ;;  %v533_v22 = vpack.c.bf16 %v197_v18, %v173_v17  ;;  %v222_v23 = vld [vmem:[#allocation2 + $0x348] sm:$0xff]  ;;  %v11410_v18 = vld [vmem:[#allocation5 + $0xb64] ss:$16 sps:$4 sm:$0xff]  }
 0x1a7   :  { %5795 = vmatprep.subr.bf16.mxu0 %v11308_v27  ;;  %7151 = vmatprep.subr.bf16.mxu1 %v11311_v28  ;;  %v11365_v27 = vld [vmem:[#allocation5 + $0xa6c] ss:$16 sps:$4 sm:$0xff]   ;;  %v11360_v28 = vld [vmem:[#allocation5 + $0xa60] ss:$16 sps:$4 sm:$0xff]   ;;  %v558_v30 = vpack.c.bf16 %v246_v24, %v222_v23 }
 0x1a8   :  { %v438_v17 = vld [vmem:[#allocation2 + $0xa08] sm:$0xff]  ;;  %v413_v23 = vld [vmem:[#allocation2 + $0x940] sm:$0xff] }
 0x1a9   :  { %5745 = vmatmul.mubr.bf16.gmra.mrb[20].mxu0 %v627_v29  ;;  %7101 = vmatmul.mubr.bf16.gmra.mrb[20].mxu1 %v627_v29  ;;  %v11363_v29 = vld [vmem:[#allocation5 + $0xa68] ss:$16 sps:$4 sm:$0xff]   ;;  %v437_v24 = vld [vmem:[#allocation2 + $0xa00] sm:$0xff] }
 0x1aa   :  { %5796 = vmatpush1.bf16.msra.mxu0 %v11306_v32  ;;  %7152 = vmatpush1.bf16.msra.mxu1 %v11309_v33  ;;  %v245_v32 = vld [vmem:[#allocation2 + $0x400] sm:$0xff] }
 0x1ab   :  { %5797 = vmatprep.subr.bf16.mxu0 %v11314_v34  ;;  %7153 = vmatprep.subr.bf16.mxu1 %v11317_v35  ;;  %v11368_v33 = vld [vmem:[#allocation5 + $0xa84] ss:$16 sps:$4 sm:$0xff]   ;;  %v11371_v34 = vld [vmem:[#allocation5 + $0xa8c] ss:$16 sps:$4 sm:$0xff]   ;;  %v557_v35 = vpack.c.bf16 %v245_v32, %v221_v31  ;;  %v11417_v31 = vld [vmem:[#allocation5 + $0xb88] ss:$16 sps:$4 sm:$0xff]  }
 0x1ac   :  { %5754 = vmatprep.mubr.bf16.mxu0 %v652_v38  ;;  %7110 = vmatprep.mubr.bf16.mxu1 %v652_v38  ;;  %v11366_v38 = vld [vmem:[#allocation5 + $0xa80] ss:$16 sps:$4 sm:$0xff]   ;;  %v11422_v32 = vld [vmem:[#allocation5 + $0xba4] ss:$16 sps:$4 sm:$0xff]  }
 0x1ae   :  { %5798 = vmatpush1.bf16.msra.mxu0 %v11312_v36  ;;  %7154 = vmatpush1.bf16.msra.mxu1 %v11315_v37  ;;  %v270_v36 = vld [vmem:[#allocation2 + $0x4c8] sm:$0xff] }
 0x1af   :  { %5799 = vmatprep.subr.bf16.mxu0 %v11320_v41  ;;  %7155 = vmatprep.subr.bf16.mxu1 %v11323_v42  ;;  %v294_v37 = vld [vmem:[#allocation2 + $0x588] sm:$0xff]  ;;  %v11372_v42 = vld [vmem:[#allocation5 + $0xaa0] ss:$16 sps:$4 sm:$0xff]  }
 0x1b0   :  { %v11377_v41 = vld [vmem:[#allocation5 + $0xaac] ss:$16 sps:$4 sm:$0xff]  }
 0x1b1   :  { %5755 = vmatmul.mubr.bf16.gmra.mrb[24].mxu0 %v651_v44  ;;  %7111 = vmatmul.mubr.bf16.gmra.mrb[24].mxu1 %v651_v44  ;;  %v582_v44 = vpack.c.bf16 %v294_v37, %v270_v36  ;;  %v461_v37 = vld [vmem:[#allocation2 + $0xac0] sm:$0xff] }
 0x1b2   :  { %5800 = vmatpush1.bf16.msra.mxu0 %v11318_v43  ;;  %7156 = vmatpush1.bf16.msra.mxu1 %v11321_v45  ;;  %v11375_v43 = vld [vmem:[#allocation5 + $0xaa8] ss:$16 sps:$4 sm:$0xff]   ;;  %v269_v45 = vld [vmem:[#allocation2 + $0x4c0] sm:$0xff] }
 0x1b3   :  { %5801 = vmatprep.subr.bf16.mxu0 %v11326_v48  ;;  %7157 = vmatprep.subr.bf16.mxu1 %v11329_v49  ;;  %v11383_v48 = vld [vmem:[#allocation5 + $0xacc] ss:$16 sps:$4 sm:$0xff]   ;;  %v11378_v49 = vld [vmem:[#allocation5 + $0xac0] ss:$16 sps:$4 sm:$0xff]  }
 0x1b4   :  { %5764 = vmatprep.mubr.bf16.mxu0 %v676_v51  ;;  %7120 = vmatprep.mubr.bf16.mxu1 %v676_v51  ;;  %v11381_v51 = vld [vmem:[#allocation5 + $0xac8] ss:$16 sps:$4 sm:$0xff]  }
 0x1b6   :  { %5802 = vmatpush1.bf16.msra.mxu0 %v11324_v50  ;;  %7158 = vmatpush1.bf16.msra.mxu1 %v11327_v52  ;;  %v581_v50 = vpack.c.bf16 %v293_v46, %v269_v45  ;;  %v318_v52 = vld [vmem:[#allocation2 + $0x648] sm:$0xff]  ;;  %v11434_v46 = vld [vmem:[#allocation5 + $0xbe4] ss:$16 sps:$4 sm:$0xff]  }
 0x1b7   :  { %5803 = vmatprep.subr.bf16.mxu0 %v11332_v55  ;;  %7159 = vmatprep.subr.bf16.mxu1 %v11335_v56  ;;  %v11389_v55 = vld [vmem:[#allocation5 + $0xaec] ss:$16 sps:$4 sm:$0xff]   ;;  %v11384_v56 = vld [vmem:[#allocation5 + $0xae0] ss:$16 sps:$4 sm:$0xff]   ;;  %v11429_v45 = vld [vmem:[#allocation5 + $0xbc8] ss:$16 sps:$4 sm:$0xff]  }
 0x1b9   :  { %5765 = vmatmul.mubr.bf16.gmra.mrb[28].mxu0 %v675_v59  ;;  %7121 = vmatmul.mubr.bf16.gmra.mrb[28].mxu1 %v675_v59  ;;  %v317_v59 = vld [vmem:[#allocation2 + $0x640] sm:$0xff] }
 0x1ba   :  { %5804 = vmatpush1.bf16.msra.mxu0 %v11330_v57  ;;  %7160 = vmatpush1.bf16.msra.mxu1 %v11333_v58  ;;  %v606_v57 = vpack.c.bf16 %v342_v53, %v318_v52  ;;  %v11387_v58 = vld [vmem:[#allocation5 + $0xae8] ss:$16 sps:$4 sm:$0xff]   ;;  %v151_v52 = vld [vmem:[#allocation2 + $0x110] sm:$0xff] }
 0x1bb   :  { %5805 = vmatprep.subr.bf16.mxu0 %v11338_v62  ;;  %7161 = vmatprep.subr.bf16.mxu1 %v11341_v63  ;;  %v11395_v62 = vld [vmem:[#allocation5 + $0xb0c] ss:$16 sps:$4 sm:$0xff]   ;;  %v11390_v63 = vld [vmem:[#allocation5 + $0xb00] ss:$16 sps:$4 sm:$0xff]   ;;  %v11440_v53 = vld [vmem:[#allocation5 + $0xc04] ss:$16 sps:$4 sm:$0xff]  }
 0x1bc   :  { %5807 = vmatprep.mubr.bf16.mxu0 %v510_v0  ;;  %7163 = vmatprep.mubr.bf16.mxu1 %v510_v0  ;;  %v11393_v0 = vld [vmem:[#allocation5 + $0xb08] ss:$16 sps:$4 sm:$0xff]  }
 0x1be   :  { %5806 = vmatpush1.bf16.msra.mxu0 %v11336_v1  ;;  %7162 = vmatpush1.bf16.msra.mxu1 %v11339_v2  ;;  %v605_v1 = vpack.c.bf16 %v341_v60, %v317_v59  ;;  %v366_v2 = vld [vmem:[#allocation2 + $0x7c8] sm:$0xff]  ;;  %v200_v59 = vld [vmem:[#allocation2 + $0x298] sm:$0xff]  ;;  %v11446_v60 = vld [vmem:[#allocation5 + $0xc24] ss:$16 sps:$4 sm:$0xff]  }
 0x1bf   :  { %5888 = vmatprep.subr.bf16.mxu0 %v11344_v5  ;;  %7244 = vmatprep.subr.bf16.mxu1 %v11347_v6  ;;  %v11401_v5 = vld [vmem:[#allocation5 + $0xb2c] ss:$16 sps:$4 sm:$0xff]   ;;  %v630_v6 = vpack.c.bf16 %v390_v3, %v366_v2  ;;  %v199_v2 = vld [vmem:[#allocation2 + $0x290] sm:$0xff] }
 0x1c0   :  { %v11452_v3 = vld [vmem:[#allocation5 + $0xc44] ss:$16 sps:$4 sm:$0xff]  }
 0x1c1   :  { %5808 = vmatmul.mubr.bf16.vlgmr.msra.gmra.mrb[0].mxu0 %v509_v9  ;;  %7164 = vmatmul.mubr.bf16.vlgmr.msra.gmra.mrb[0].mxu1 %v509_v9  ;;  %v365_v9 = vld [vmem:[#allocation2 + $0x7c0] sm:$0xff] }
 0x1c2   :  { %5889 = vmatpush1.bf16.msra.mxu0 %v11342_v7  ;;  %7245 = vmatpush1.bf16.msra.mxu1 %v11345_v8  ;;  %v11396_v7 = vld [vmem:[#allocation5 + $0xb20] ss:$16 sps:$4 sm:$0xff]   ;;  %v11399_v8 = vld [vmem:[#allocation5 + $0xb28] ss:$16 sps:$4 sm:$0xff]  }
 0x1c3   :  { %5890 = vmatprep.subr.bf16.mxu0 %v11350_v12  ;;  %7246 = vmatprep.subr.bf16.mxu1 %v11353_v13  ;;  %v11407_v12 = vld [vmem:[#allocation5 + $0xb4c] ss:$16 sps:$4 sm:$0xff]   ;;  %v11402_v13 = vld [vmem:[#allocation5 + $0xb40] ss:$16 sps:$4 sm:$0xff]  }
 0x1c4   :  { %5817 = vmatprep.mubr.bf16.mxu0 %v534_v15  ;;  %7173 = vmatprep.mubr.bf16.mxu1 %v534_v15  ;;  %v629_v15 = vpack.c.bf16 %v389_v10, %v365_v9  ;;  %v248_v9 = vld [vmem:[#allocation2 + $0x418] sm:$0xff]  ;;  %v11458_v10 = vld [vmem:[#allocation5 + $0xc64] ss:$16 sps:$4 sm:$0xff]  }
 0x1c6   :  { %5891 = vmatpush1.bf16.msra.mxu0 %v11348_v14  ;;  %7247 = vmatpush1.bf16.msra.mxu1 %v11351_v16  ;;  %v11405_v14 = vld [vmem:[#allocation5 + $0xb48] ss:$16 sps:$4 sm:$0xff]  }
 0x1c7   :  { %5892 = vmatprep.subr.bf16.mxu0 %v11356_v19  ;;  %7248 = vmatprep.subr.bf16.mxu1 %v11359_v20  ;;  %v414_v16 = vld [vmem:[#allocation2 + $0x948] sm:$0xff]  ;;  %v11408_v20 = vld [vmem:[#allocation5 + $0xb60] ss:$16 sps:$4 sm:$0xff]  }
 0x1c8   :  { %v11413_v19 = vld [vmem:[#allocation5 + $0xb6c] ss:$16 sps:$4 sm:$0xff]  }
 0x1c9   :  { %5818 = vmatmul.mubr.bf16.gmra.mrb[4].mxu0 %v533_v22  ;;  %7174 = vmatmul.mubr.bf16.gmra.mrb[4].mxu1 %v533_v22  ;;  %v11411_v22 = vld [vmem:[#allocation5 + $0xb68] ss:$16 sps:$4 sm:$0xff]  }
 0x1ca   :  { %5893 = vmatpush1.bf16.msra.mxu0 %v11354_v21  ;;  %7249 = vmatpush1.bf16.msra.mxu1 %v11357_v25  ;;  %v654_v21 = vpack.c.bf16 %v438_v17, %v414_v16  ;;  %v11416_v25 = vld [vmem:[#allocation5 + $0xb84] ss:$16 sps:$4 sm:$0xff]  }
 0x1cb   :  { %5894 = vmatprep.subr.bf16.mxu0 %v11362_v26  ;;  %7250 = vmatprep.subr.bf16.mxu1 %v11365_v27  ;;  %v11419_v26 = vld [vmem:[#allocation5 + $0xb8c] ss:$16 sps:$4 sm:$0xff]   ;;  %v11414_v27 = vld [vmem:[#allocation5 + $0xb80] ss:$16 sps:$4 sm:$0xff]   ;;  %v11464_v17 = vld [vmem:[#allocation5 + $0xc84] ss:$16 sps:$4 sm:$0xff]  }
 0x1cc   :  { %5827 = vmatprep.mubr.bf16.mxu0 %v558_v30  ;;  %7183 = vmatprep.mubr.bf16.mxu1 %v558_v30  ;;  %v486_v30 = vld [vmem:[#allocation2 + $0xb88] sm:$0xff]  ;;  %v247_v16 = vld [vmem:[#allocation2 + $0x410] sm:$0xff] }
 0x1ce   :  { %5895 = vmatpush1.bf16.msra.mxu0 %v11360_v28  ;;  %7251 = vmatpush1.bf16.msra.mxu1 %v11363_v29  ;;  %v653_v28 = vpack.c.bf16 %v437_v24, %v413_v23  ;;  %v462_v29 = vld [vmem:[#allocation2 + $0xac8] sm:$0xff]  ;;  %v296_v23 = vld [vmem:[#allocation2 + $0x598] sm:$0xff]  ;;  %v11470_v24 = vld [vmem:[#allocation5 + $0xca4] ss:$16 sps:$4 sm:$0xff]  }
 0x1cf   :  { %5896 = vmatprep.subr.bf16.mxu0 %v11368_v33  ;;  %7252 = vmatprep.subr.bf16.mxu1 %v11371_v34  ;;  %v11425_v33 = vld [vmem:[#allocation5 + $0xbac] ss:$16 sps:$4 sm:$0xff]   ;;  %v11420_v34 = vld [vmem:[#allocation5 + $0xba0] ss:$16 sps:$4 sm:$0xff]   ;;  %v678_v36 = vpack.c.bf16 %v486_v30, %v462_v29 }
 0x1d0   :  { %v271_v29 = vld [vmem:[#allocation2 + $0x4d0] sm:$0xff] }
 0x1d1   :  { %5828 = vmatmul.mubr.bf16.gmra.mrb[8].mxu0 %v557_v35  ;;  %7184 = vmatmul.mubr.bf16.gmra.mrb[8].mxu1 %v557_v35  ;;  %v11423_v35 = vld [vmem:[#allocation5 + $0xba8] ss:$16 sps:$4 sm:$0xff]   ;;  %v295_v30 = vld [vmem:[#allocation2 + $0x590] sm:$0xff] }
 0x1d2   :  { %5897 = vmatpush1.bf16.msra.mxu0 %v11366_v38  ;;  %7253 = vmatpush1.bf16.msra.mxu1 %v11369_v39  ;;  %v485_v38 = vld [vmem:[#allocation2 + $0xb80] sm:$0xff] }
 0x1d3   :  { %5898 = vmatprep.subr.bf16.mxu0 %v11374_v40  ;;  %7254 = vmatprep.subr.bf16.mxu1 %v11377_v41  ;;  %v11428_v39 = vld [vmem:[#allocation5 + $0xbc4] ss:$16 sps:$4 sm:$0xff]   ;;  %v11431_v40 = vld [vmem:[#allocation5 + $0xbcc] ss:$16 sps:$4 sm:$0xff]   ;;  %v677_v41 = vpack.c.bf16 %v485_v38, %v461_v37  ;;  %v11477_v37 = vld [vmem:[#allocation5 + $0xcc8] ss:$16 sps:$4 sm:$0xff]  }
 0x1d4   :  { %5837 = vmatprep.mubr.bf16.mxu0 %v582_v44  ;;  %7193 = vmatprep.mubr.bf16.mxu1 %v582_v44  ;;  %v11426_v44 = vld [vmem:[#allocation5 + $0xbc0] ss:$16 sps:$4 sm:$0xff]   ;;  %v11482_v38 = vld [vmem:[#allocation5 + $0xce4] ss:$16 sps:$4 sm:$0xff]  }
 0x1d6   :  { %5899 = vmatpush1.bf16.msra.mxu0 %v11372_v42  ;;  %7255 = vmatpush1.bf16.msra.mxu1 %v11375_v43  ;;  %v128_v42 = vld [vmem:[#allocation2 + $0x58] sm:$0xff] }
 0x1d7   :  { %5900 = vmatprep.subr.bf16.mxu0 %v11380_v47  ;;  %7256 = vmatprep.subr.bf16.mxu1 %v11383_v48  ;;  %v152_v43 = vld [vmem:[#allocation2 + $0x118] sm:$0xff]  ;;  %v11432_v48 = vld [vmem:[#allocation5 + $0xbe0] ss:$16 sps:$4 sm:$0xff]  }
 0x1d8   :  { %v11437_v47 = vld [vmem:[#allocation5 + $0xbec] ss:$16 sps:$4 sm:$0xff]  }
 0x1d9   :  { %5838 = vmatmul.mubr.bf16.gmra.mrb[12].mxu0 %v581_v50  ;;  %7194 = vmatmul.mubr.bf16.gmra.mrb[12].mxu1 %v581_v50  ;;  %v512_v50 = vpack.c.bf16 %v152_v43, %v128_v42  ;;  %v319_v43 = vld [vmem:[#allocation2 + $0x650] sm:$0xff] }
 0x1da   :  { %5901 = vmatpush1.bf16.msra.mxu0 %v11378_v49  ;;  %7257 = vmatpush1.bf16.msra.mxu1 %v11381_v51  ;;  %v11435_v49 = vld [vmem:[#allocation5 + $0xbe8] ss:$16 sps:$4 sm:$0xff]   ;;  %v127_v51 = vld [vmem:[#allocation2 + $0x50] sm:$0xff] }
 0x1db   :  { %5902 = vmatprep.subr.bf16.mxu0 %v11386_v54  ;;  %7258 = vmatprep.subr.bf16.mxu1 %v11389_v55  ;;  %v11443_v54 = vld [vmem:[#allocation5 + $0xc0c] ss:$16 sps:$4 sm:$0xff]   ;;  %v11438_v55 = vld [vmem:[#allocation5 + $0xc00] ss:$16 sps:$4 sm:$0xff]  }
 0x1dc   :  { %5847 = vmatprep.mubr.bf16.mxu0 %v606_v57  ;;  %7203 = vmatprep.mubr.bf16.mxu1 %v606_v57  ;;  %v11441_v57 = vld [vmem:[#allocation5 + $0xc08] ss:$16 sps:$4 sm:$0xff]  }
 0x1de   :  { %5903 = vmatpush1.bf16.msra.mxu0 %v11384_v56  ;;  %7259 = vmatpush1.bf16.msra.mxu1 %v11387_v58  ;;  %v511_v56 = vpack.c.bf16 %v151_v52, %v127_v51  ;;  %v176_v58 = vld [vmem:[#allocation2 + $0x1d8] sm:$0xff]  ;;  %v11494_v52 = vld [vmem:[#allocation5 + $0xd24] ss:$16 sps:$4 sm:$0xff]  }
 0x1df   :  { %5904 = vmatprep.subr.bf16.mxu0 %v11392_v61  ;;  %7260 = vmatprep.subr.bf16.mxu1 %v11395_v62  ;;  %v11449_v61 = vld [vmem:[#allocation5 + $0xc2c] ss:$16 sps:$4 sm:$0xff]   ;;  %v11444_v62 = vld [vmem:[#allocation5 + $0xc20] ss:$16 sps:$4 sm:$0xff]   ;;  %v11489_v51 = vld [vmem:[#allocation5 + $0xd08] ss:$16 sps:$4 sm:$0xff]  }
 0x1e1   :  { %5848 = vmatmul.mubr.bf16.gmra.mrb[16].mxu0 %v605_v1  ;;  %7204 = vmatmul.mubr.bf16.gmra.mrb[16].mxu1 %v605_v1  ;;  %v175_v1 = vld [vmem:[#allocation2 + $0x1d0] sm:$0xff] }
 0x1e2   :  { %5905 = vmatpush1.bf16.msra.mxu0 %v11390_v63  ;;  %7261 = vmatpush1.bf16.msra.mxu1 %v11393_v0  ;;  %v536_v63 = vpack.c.bf16 %v200_v59, %v176_v58  ;;  %v11447_v0 = vld [vmem:[#allocation5 + $0xc28] ss:$16 sps:$4 sm:$0xff]   ;;  %v391_v58 = vld [vmem:[#allocation2 + $0x890] sm:$0xff] }
 0x1e3   :  { %5906 = vmatprep.subr.bf16.mxu0 %v11398_v4  ;;  %7262 = vmatprep.subr.bf16.mxu1 %v11401_v5  ;;  %v11455_v4 = vld [vmem:[#allocation5 + $0xc4c] ss:$16 sps:$4 sm:$0xff]   ;;  %v11450_v5 = vld [vmem:[#allocation5 + $0xc40] ss:$16 sps:$4 sm:$0xff]   ;;  %v11500_v59 = vld [vmem:[#allocation5 + $0xd44] ss:$16 sps:$4 sm:$0xff]  }
 0x1e4   :  { %5857 = vmatprep.mubr.bf16.mxu0 %v630_v6  ;;  %7213 = vmatprep.mubr.bf16.mxu1 %v630_v6  ;;  %v11453_v6 = vld [vmem:[#allocation5 + $0xc48] ss:$16 sps:$4 sm:$0xff]  }
 0x1e6   :  { %5907 = vmatpush1.bf16.msra.mxu0 %v11396_v7  ;;  %7263 = vmatpush1.bf16.msra.mxu1 %v11399_v8  ;;  %v535_v7 = vpack.c.bf16 %v199_v2, %v175_v1  ;;  %v224_v8 = vld [vmem:[#allocation2 + $0x358] sm:$0xff]  ;;  %v11506_v2 = vld [vmem:[#allocation5 + $0xd64] ss:$16 sps:$4 sm:$0xff]  }
 0x1e7   :  { %5908 = vmatprep.subr.bf16.mxu0 %v11404_v11  ;;  %7264 = vmatprep.subr.bf16.mxu1 %v11407_v12  ;;  %v11461_v11 = vld [vmem:[#allocation5 + $0xc6c] ss:$16 sps:$4 sm:$0xff]   ;;  %v560_v12 = vpack.c.bf16 %v248_v9, %v224_v8  ;;  %v439_v8 = vld [vmem:[#allocation2 + $0xa10] sm:$0xff] }
 0x1e8   :  { %v440_v1 = vld [vmem:[#allocation2 + $0xa18] sm:$0xff]  ;;  %v11512_v9 = vld [vmem:[#allocation5 + $0xd84] ss:$16 sps:$4 sm:$0xff]  }
 0x1e9   :  { %5858 = vmatmul.mubr.bf16.gmra.mrb[20].mxu0 %v629_v15  ;;  %7214 = vmatmul.mubr.bf16.gmra.mrb[20].mxu1 %v629_v15  ;;  %v223_v15 = vld [vmem:[#allocation2 + $0x350] sm:$0xff] }
 0x1ea   :  { %5909 = vmatpush1.bf16.msra.mxu0 %v11402_v13  ;;  %7265 = vmatpush1.bf16.msra.mxu1 %v11405_v14  ;;  %v11456_v13 = vld [vmem:[#allocation5 + $0xc60] ss:$16 sps:$4 sm:$0xff]   ;;  %v11459_v14 = vld [vmem:[#allocation5 + $0xc68] ss:$16 sps:$4 sm:$0xff]  }
 0x1eb   :  { %5910 = vmatprep.subr.bf16.mxu0 %v11410_v18  ;;  %7266 = vmatprep.subr.bf16.mxu1 %v11413_v19  ;;  %v11467_v18 = vld [vmem:[#allocation5 + $0xc8c] ss:$16 sps:$4 sm:$0xff]   ;;  %v11462_v19 = vld [vmem:[#allocation5 + $0xc80] ss:$16 sps:$4 sm:$0xff]  }
 0x1ec   :  { %5867 = vmatprep.mubr.bf16.mxu0 %v654_v21  ;;  %7223 = vmatprep.mubr.bf16.mxu1 %v654_v21  ;;  %v559_v21 = vpack.c.bf16 %v247_v16, %v223_v15  ;;  %v488_v15 = vld [vmem:[#allocation2 + $0xb98] sm:$0xff]  ;;  %v11518_v16 = vld [vmem:[#allocation5 + $0xda4] ss:$16 sps:$4 sm:$0xff]  }
 0x1ee   :  { %5911 = vmatpush1.bf16.msra.mxu0 %v11408_v20  ;;  %7267 = vmatpush1.bf16.msra.mxu1 %v11411_v22  ;;  %v11465_v20 = vld [vmem:[#allocation5 + $0xc88] ss:$16 sps:$4 sm:$0xff]  }
 0x1ef   :  { %5912 = vmatprep.subr.bf16.mxu0 %v11416_v25  ;;  %7268 = vmatprep.subr.bf16.mxu1 %v11419_v26  ;;  %v272_v22 = vld [vmem:[#allocation2 + $0x4d8] sm:$0xff]  ;;  %v11468_v26 = vld [vmem:[#allocation5 + $0xca0] ss:$16 sps:$4 sm:$0xff]  }
 0x1f0   :  { %v11473_v25 = vld [vmem:[#allocation5 + $0xcac] ss:$16 sps:$4 sm:$0xff]  }
 0x1f1   :  { %5868 = vmatmul.mubr.bf16.gmra.mrb[24].mxu0 %v653_v28  ;;  %7224 = vmatmul.mubr.bf16.gmra.mrb[24].mxu1 %v653_v28  ;;  %v11471_v28 = vld [vmem:[#allocation5 + $0xca8] ss:$16 sps:$4 sm:$0xff]  }
 0x1f2   :  { %5913 = vmatpush1.bf16.msra.mxu0 %v11414_v27  ;;  %7269 = vmatpush1.bf16.msra.mxu1 %v11417_v31  ;;  %v584_v27 = vpack.c.bf16 %v296_v23, %v272_v22  ;;  %v11476_v31 = vld [vmem:[#allocation5 + $0xcc4] ss:$16 sps:$4 sm:$0xff]  }
 0x1f3   :  { %5914 = vmatprep.subr.bf16.mxu0 %v11422_v32  ;;  %7270 = vmatprep.subr.bf16.mxu1 %v11425_v33  ;;  %v11479_v32 = vld [vmem:[#allocation5 + $0xccc] ss:$16 sps:$4 sm:$0xff]   ;;  %v11474_v33 = vld [vmem:[#allocation5 + $0xcc0] ss:$16 sps:$4 sm:$0xff]   ;;  %v11524_v23 = vld [vmem:[#allocation5 + $0xdc4] ss:$16 sps:$4 sm:$0xff]  }
 0x1f4   :  { %5877 = vmatprep.mubr.bf16.mxu0 %v678_v36  ;;  %7233 = vmatprep.mubr.bf16.mxu1 %v678_v36  ;;  %v344_v36 = vld [vmem:[#allocation2 + $0x718] sm:$0xff]  ;;  %v487_v22 = vld [vmem:[#allocation2 + $0xb90] sm:$0xff] }
 0x1f6   :  { %5915 = vmatpush1.bf16.msra.mxu0 %v11420_v34  ;;  %7271 = vmatpush1.bf16.msra.mxu1 %v11423_v35  ;;  %v583_v34 = vpack.c.bf16 %v295_v30, %v271_v29  ;;  %v320_v35 = vld [vmem:[#allocation2 + $0x658] sm:$0xff]  ;;  %v154_v29 = vld [vmem:[#allocation2 + $0x128] sm:$0xff]  ;;  %v11530_v30 = vld [vmem:[#allocation5 + $0xde4] ss:$16 sps:$4 sm:$0xff]  }
 0x1f7   :  { %5916 = vmatprep.subr.bf16.mxu0 %v11428_v39  ;;  %7272 = vmatprep.subr.bf16.mxu1 %v11431_v40  ;;  %v11485_v39 = vld [vmem:[#allocation5 + $0xcec] ss:$16 sps:$4 sm:$0xff]   ;;  %v11480_v40 = vld [vmem:[#allocation5 + $0xce0] ss:$16 sps:$4 sm:$0xff]   ;;  %v608_v42 = vpack.c.bf16 %v344_v36, %v320_v35 }
 0x1f8   :  { %v129_v35 = vld [vmem:[#allocation2 + $0x60] sm:$0xff] }
 0x1f9   :  { %5878 = vmatmul.mubr.bf16.gmra.mrb[28].mxu0 %v677_v41  ;;  %7234 = vmatmul.mubr.bf16.gmra.mrb[28].mxu1 %v677_v41  ;;  %v11483_v41 = vld [vmem:[#allocation5 + $0xce8] ss:$16 sps:$4 sm:$0xff]   ;;  %v153_v36 = vld [vmem:[#allocation2 + $0x120] sm:$0xff] }
 0x1fa   :  { %5917 = vmatpush1.bf16.msra.mxu0 %v11426_v44  ;;  %7273 = vmatpush1.bf16.msra.mxu1 %v11429_v45  ;;  %v343_v44 = vld [vmem:[#allocation2 + $0x710] sm:$0xff] }
 0x1fb   :  { %5918 = vmatprep.subr.bf16.mxu0 %v11434_v46  ;;  %7274 = vmatprep.subr.bf16.mxu1 %v11437_v47  ;;  %v11488_v45 = vld [vmem:[#allocation5 + $0xd04] ss:$16 sps:$4 sm:$0xff]   ;;  %v11491_v46 = vld [vmem:[#allocation5 + $0xd0c] ss:$16 sps:$4 sm:$0xff]   ;;  %v607_v47 = vpack.c.bf16 %v343_v44, %v319_v43  ;;  %v11537_v43 = vld [vmem:[#allocation5 + $0xe08] ss:$16 sps:$4 sm:$0xff]  }
 0x1fc   :  { %5920 = vmatprep.mubr.bf16.mxu0 %v512_v50  ;;  %7276 = vmatprep.mubr.bf16.mxu1 %v512_v50  ;;  %v11486_v50 = vld [vmem:[#allocation5 + $0xd00] ss:$16 sps:$4 sm:$0xff]   ;;  %v11542_v44 = vld [vmem:[#allocation5 + $0xe24] ss:$16 sps:$4 sm:$0xff]  }
 0x1fe   :  { %5919 = vmatpush1.bf16.msra.mxu0 %v11432_v48  ;;  %7275 = vmatpush1.bf16.msra.mxu1 %v11435_v49  ;;  %v368_v48 = vld [vmem:[#allocation2 + $0x7d8] sm:$0xff] }
 0x1ff   :  { %6001 = vmatprep.subr.bf16.mxu0 %v11440_v53  ;;  %7357 = vmatprep.subr.bf16.mxu1 %v11443_v54  ;;  %v392_v49 = vld [vmem:[#allocation2 + $0x898] sm:$0xff]  ;;  %v11492_v54 = vld [vmem:[#allocation5 + $0xd20] ss:$16 sps:$4 sm:$0xff]  }
 0x200   :  { %v11497_v53 = vld [vmem:[#allocation5 + $0xd2c] ss:$16 sps:$4 sm:$0xff]  }
 0x201   :  { %5921 = vmatmul.mubr.bf16.vlgmr.msra.gmra.mrb[0].mxu0 %v511_v56  ;;  %7277 = vmatmul.mubr.bf16.vlgmr.msra.gmra.mrb[0].mxu1 %v511_v56  ;;  %v632_v56 = vpack.c.bf16 %v392_v49, %v368_v48  ;;  %v177_v49 = vld [vmem:[#allocation2 + $0x1e0] sm:$0xff] }
 0x202   :  { %6002 = vmatpush1.bf16.msra.mxu0 %v11438_v55  ;;  %7358 = vmatpush1.bf16.msra.mxu1 %v11441_v57  ;;  %v11495_v55 = vld [vmem:[#allocation5 + $0xd28] ss:$16 sps:$4 sm:$0xff]   ;;  %v367_v57 = vld [vmem:[#allocation2 + $0x7d0] sm:$0xff] }
 0x203   :  { %6003 = vmatprep.subr.bf16.mxu0 %v11446_v60  ;;  %7359 = vmatprep.subr.bf16.mxu1 %v11449_v61  ;;  %v11503_v60 = vld [vmem:[#allocation5 + $0xd4c] ss:$16 sps:$4 sm:$0xff]   ;;  %v11498_v61 = vld [vmem:[#allocation5 + $0xd40] ss:$16 sps:$4 sm:$0xff]  }
 0x204   :  { %5930 = vmatprep.mubr.bf16.mxu0 %v536_v63  ;;  %7286 = vmatprep.mubr.bf16.mxu1 %v536_v63  ;;  %v11501_v63 = vld [vmem:[#allocation5 + $0xd48] ss:$16 sps:$4 sm:$0xff]  }
 0x206   :  { %6004 = vmatpush1.bf16.msra.mxu0 %v11444_v62  ;;  %7360 = vmatpush1.bf16.msra.mxu1 %v11447_v0  ;;  %v631_v62 = vpack.c.bf16 %v391_v58, %v367_v57  ;;  %v416_v0 = vld [vmem:[#allocation2 + $0x958] sm:$0xff]  ;;  %v11554_v58 = vld [vmem:[#allocation5 + $0xe64] ss:$16 sps:$4 sm:$0xff]  }
 0x207   :  { %6005 = vmatprep.subr.bf16.mxu0 %v11452_v3  ;;  %7361 = vmatprep.subr.bf16.mxu1 %v11455_v4  ;;  %v11509_v3 = vld [vmem:[#allocation5 + $0xd6c] ss:$16 sps:$4 sm:$0xff]   ;;  %v11504_v4 = vld [vmem:[#allocation5 + $0xd60] ss:$16 sps:$4 sm:$0xff]   ;;  %v11549_v57 = vld [vmem:[#allocation5 + $0xe48] ss:$16 sps:$4 sm:$0xff]  }
 0x209   :  { %5931 = vmatmul.mubr.bf16.gmra.mrb[4].mxu0 %v535_v7  ;;  %7287 = vmatmul.mubr.bf16.gmra.mrb[4].mxu1 %v535_v7  ;;  %v415_v7 = vld [vmem:[#allocation2 + $0x950] sm:$0xff] }
 0x20a   :  { %6006 = vmatpush1.bf16.msra.mxu0 %v11450_v5  ;;  %7362 = vmatpush1.bf16.msra.mxu1 %v11453_v6  ;;  %v656_v5 = vpack.c.bf16 %v440_v1, %v416_v0  ;;  %v11507_v6 = vld [vmem:[#allocation5 + $0xd68] ss:$16 sps:$4 sm:$0xff]   ;;  %v249_v0 = vld [vmem:[#allocation2 + $0x420] sm:$0xff] }
 0x20b   :  { %6007 = vmatprep.subr.bf16.mxu0 %v11458_v10  ;;  %7363 = vmatprep.subr.bf16.mxu1 %v11461_v11  ;;  %v11515_v10 = vld [vmem:[#allocation5 + $0xd8c] ss:$16 sps:$4 sm:$0xff]   ;;  %v11510_v11 = vld [vmem:[#allocation5 + $0xd80] ss:$16 sps:$4 sm:$0xff]   ;;  %v11560_v1 = vld [vmem:[#allocation5 + $0xe84] ss:$16 sps:$4 sm:$0xff]  }
 0x20c   :  { %5940 = vmatprep.mubr.bf16.mxu0 %v560_v12  ;;  %7296 = vmatprep.mubr.bf16.mxu1 %v560_v12  ;;  %v11513_v12 = vld [vmem:[#allocation5 + $0xd88] ss:$16 sps:$4 sm:$0xff]  }
 0x20e   :  { %6008 = vmatpush1.bf16.msra.mxu0 %v11456_v13  ;;  %7364 = vmatpush1.bf16.msra.mxu1 %v11459_v14  ;;  %v655_v13 = vpack.c.bf16 %v439_v8, %v415_v7  ;;  %v464_v14 = vld [vmem:[#allocation2 + $0xad8] sm:$0xff]  ;;  %v298_v7 = vld [vmem:[#allocation2 + $0x5a8] sm:$0xff]  ;;  %v11566_v8 = vld [vmem:[#allocation5 + $0xea4] ss:$16 sps:$4 sm:$0xff]  }
 0x20f   :  { %6009 = vmatprep.subr.bf16.mxu0 %v11464_v17  ;;  %7365 = vmatprep.subr.bf16.mxu1 %v11467_v18  ;;  %v11521_v17 = vld [vmem:[#allocation5 + $0xdac] ss:$16 sps:$4 sm:$0xff]   ;;  %v680_v18 = vpack.c.bf16 %v488_v15, %v464_v14  ;;  %v297_v14 = vld [vmem:[#allocation2 + $0x5a0] sm:$0xff] }
 0x210   :  { %v11572_v15 = vld [vmem:[#allocation5 + $0xec4] ss:$16 sps:$4 sm:$0xff]  }
 0x211   :  { %5941 = vmatmul.mubr.bf16.gmra.mrb[8].mxu0 %v559_v21  ;;  %7297 = vmatmul.mubr.bf16.gmra.mrb[8].mxu1 %v559_v21  ;;  %v463_v21 = vld [vmem:[#allocation2 + $0xad0] sm:$0xff] }
 0x212   :  { %6010 = vmatpush1.bf16.msra.mxu0 %v11462_v19  ;;  %7366 = vmatpush1.bf16.msra.mxu1 %v11465_v20  ;;  %v11516_v19 = vld [vmem:[#allocation5 + $0xda0] ss:$16 sps:$4 sm:$0xff]   ;;  %v11519_v20 = vld [vmem:[#allocation5 + $0xda8] ss:$16 sps:$4 sm:$0xff]  }
 0x213   :  { %6011 = vmatprep.subr.bf16.mxu0 %v11470_v24  ;;  %7367 = vmatprep.subr.bf16.mxu1 %v11473_v25  ;;  %v11527_v24 = vld [vmem:[#allocation5 + $0xdcc] ss:$16 sps:$4 sm:$0xff]   ;;  %v11522_v25 = vld [vmem:[#allocation5 + $0xdc0] ss:$16 sps:$4 sm:$0xff]  }
 0x214   :  { %5950 = vmatprep.mubr.bf16.mxu0 %v584_v27  ;;  %7306 = vmatprep.mubr.bf16.mxu1 %v584_v27  ;;  %v679_v27 = vpack.c.bf16 %v487_v22, %v463_v21  ;;  %v346_v21 = vld [vmem:[#allocation2 + $0x728] sm:$0xff]  ;;  %v11578_v22 = vld [vmem:[#allocation5 + $0xee4] ss:$16 sps:$4 sm:$0xff]  }
 0x216   :  { %6012 = vmatpush1.bf16.msra.mxu0 %v11468_v26  ;;  %7368 = vmatpush1.bf16.msra.mxu1 %v11471_v28  ;;  %v11525_v26 = vld [vmem:[#allocation5 + $0xdc8] ss:$16 sps:$4 sm:$0xff]  }
 0x217   :  { %6013 = vmatprep.subr.bf16.mxu0 %v11476_v31  ;;  %7369 = vmatprep.subr.bf16.mxu1 %v11479_v32  ;;  %v130_v28 = vld [vmem:[#allocation2 + $0x68] sm:$0xff]  ;;  %v11528_v32 = vld [vmem:[#allocation5 + $0xde0] ss:$16 sps:$4 sm:$0xff]  }
 0x218   :  { %v11533_v31 = vld [vmem:[#allocation5 + $0xdec] ss:$16 sps:$4 sm:$0xff]  }
 0x219   :  { %5951 = vmatmul.mubr.bf16.gmra.mrb[12].mxu0 %v583_v34  ;;  %7307 = vmatmul.mubr.bf16.gmra.mrb[12].mxu1 %v583_v34  ;;  %v11531_v34 = vld [vmem:[#allocation5 + $0xde8] ss:$16 sps:$4 sm:$0xff]  }
 0x21a   :  { %6014 = vmatpush1.bf16.msra.mxu0 %v11474_v33  ;;  %7370 = vmatpush1.bf16.msra.mxu1 %v11477_v37  ;;  %v514_v33 = vpack.c.bf16 %v154_v29, %v130_v28  ;;  %v11536_v37 = vld [vmem:[#allocation5 + $0xe04] ss:$16 sps:$4 sm:$0xff]  }
 0x21b   :  { %6015 = vmatprep.subr.bf16.mxu0 %v11482_v38  ;;  %7371 = vmatprep.subr.bf16.mxu1 %v11485_v39  ;;  %v11539_v38 = vld [vmem:[#allocation5 + $0xe0c] ss:$16 sps:$4 sm:$0xff]   ;;  %v11534_v39 = vld [vmem:[#allocation5 + $0xe00] ss:$16 sps:$4 sm:$0xff]   ;;  %v11584_v29 = vld [vmem:[#allocation5 + $0xf04] ss:$16 sps:$4 sm:$0xff]  }
 0x21c   :  { %5960 = vmatprep.mubr.bf16.mxu0 %v608_v42  ;;  %7316 = vmatprep.mubr.bf16.mxu1 %v608_v42  ;;  %v202_v42 = vld [vmem:[#allocation2 + $0x2a8] sm:$0xff]  ;;  %v345_v28 = vld [vmem:[#allocation2 + $0x720] sm:$0xff] }
 0x21e   :  { %6016 = vmatpush1.bf16.msra.mxu0 %v11480_v40  ;;  %7372 = vmatpush1.bf16.msra.mxu1 %v11483_v41  ;;  %v513_v40 = vpack.c.bf16 %v153_v36, %v129_v35  ;;  %v178_v41 = vld [vmem:[#allocation2 + $0x1e8] sm:$0xff]  ;;  %v11590_v36 = vld [vmem:[#allocation5 + $0xf24] ss:$16 sps:$4 sm:$0xff]  }
 0x21f   :  { %6017 = vmatprep.subr.bf16.mxu0 %v11488_v45  ;;  %7373 = vmatprep.subr.bf16.mxu1 %v11491_v46  ;;  %v11545_v45 = vld [vmem:[#allocation5 + $0xe2c] ss:$16 sps:$4 sm:$0xff]   ;;  %v11540_v46 = vld [vmem:[#allocation5 + $0xe20] ss:$16 sps:$4 sm:$0xff]   ;;  %v538_v48 = vpack.c.bf16 %v202_v42, %v178_v41 }
 0x220   :  { %v394_v35 = vld [vmem:[#allocation2 + $0x8a8] sm:$0xff]  ;;  %v369_v41 = vld [vmem:[#allocation2 + $0x7e0] sm:$0xff] }
 0x221   :  { %5961 = vmatmul.mubr.bf16.gmra.mrb[16].mxu0 %v607_v47  ;;  %7317 = vmatmul.mubr.bf16.gmra.mrb[16].mxu1 %v607_v47  ;;  %v11543_v47 = vld [vmem:[#allocation5 + $0xe28] ss:$16 sps:$4 sm:$0xff]   ;;  %v393_v42 = vld [vmem:[#allocation2 + $0x8a0] sm:$0xff] }
 0x222   :  { %6018 = vmatpush1.bf16.msra.mxu0 %v11486_v50  ;;  %7374 = vmatpush1.bf16.msra.mxu1 %v11489_v51  ;;  %v201_v50 = vld [vmem:[#allocation2 + $0x2a0] sm:$0xff] }
 0x223   :  { %6019 = vmatprep.subr.bf16.mxu0 %v11494_v52  ;;  %7375 = vmatprep.subr.bf16.mxu1 %v11497_v53  ;;  %v11548_v51 = vld [vmem:[#allocation5 + $0xe44] ss:$16 sps:$4 sm:$0xff]   ;;  %v11551_v52 = vld [vmem:[#allocation5 + $0xe4c] ss:$16 sps:$4 sm:$0xff]   ;;  %v537_v53 = vpack.c.bf16 %v201_v50, %v177_v49  ;;  %v11597_v49 = vld [vmem:[#allocation5 + $0xf48] ss:$16 sps:$4 sm:$0xff]  }
 0x224   :  { %5970 = vmatprep.mubr.bf16.mxu0 %v632_v56  ;;  %7326 = vmatprep.mubr.bf16.mxu1 %v632_v56  ;;  %v11546_v56 = vld [vmem:[#allocation5 + $0xe40] ss:$16 sps:$4 sm:$0xff]   ;;  %v11602_v50 = vld [vmem:[#allocation5 + $0xf64] ss:$16 sps:$4 sm:$0xff]  }
 0x226   :  { %6020 = vmatpush1.bf16.msra.mxu0 %v11492_v54  ;;  %7376 = vmatpush1.bf16.msra.mxu1 %v11495_v55  ;;  %v226_v54 = vld [vmem:[#allocation2 + $0x368] sm:$0xff] }
 0x227   :  { %6021 = vmatprep.subr.bf16.mxu0 %v11500_v59  ;;  %7377 = vmatprep.subr.bf16.mxu1 %v11503_v60  ;;  %v250_v55 = vld [vmem:[#allocation2 + $0x428] sm:$0xff]  ;;  %v11552_v60 = vld [vmem:[#allocation5 + $0xe60] ss:$16 sps:$4 sm:$0xff]  }
 0x228   :  { %v11557_v59 = vld [vmem:[#allocation5 + $0xe6c] ss:$16 sps:$4 sm:$0xff]  }
 0x229   :  { %5971 = vmatmul.mubr.bf16.gmra.mrb[20].mxu0 %v631_v62  ;;  %7327 = vmatmul.mubr.bf16.gmra.mrb[20].mxu1 %v631_v62  ;;  %v562_v62 = vpack.c.bf16 %v250_v55, %v226_v54  ;;  %v417_v55 = vld [vmem:[#allocation2 + $0x960] sm:$0xff] }
 0x22a   :  { %6022 = vmatpush1.bf16.msra.mxu0 %v11498_v61  ;;  %7378 = vmatpush1.bf16.msra.mxu1 %v11501_v63  ;;  %v11555_v61 = vld [vmem:[#allocation5 + $0xe68] ss:$16 sps:$4 sm:$0xff]   ;;  %v225_v63 = vld [vmem:[#allocation2 + $0x360] sm:$0xff] }
 0x22b   :  { %6023 = vmatprep.subr.bf16.mxu0 %v11506_v2  ;;  %7379 = vmatprep.subr.bf16.mxu1 %v11509_v3  ;;  %v11563_v2 = vld [vmem:[#allocation5 + $0xe8c] ss:$16 sps:$4 sm:$0xff]   ;;  %v11558_v3 = vld [vmem:[#allocation5 + $0xe80] ss:$16 sps:$4 sm:$0xff]  }
 0x22c   :  { %5980 = vmatprep.mubr.bf16.mxu0 %v656_v5  ;;  %7336 = vmatprep.mubr.bf16.mxu1 %v656_v5  ;;  %v11561_v5 = vld [vmem:[#allocation5 + $0xe88] ss:$16 sps:$4 sm:$0xff]  }
 0x22e   :  { %6024 = vmatpush1.bf16.msra.mxu0 %v11504_v4  ;;  %7380 = vmatpush1.bf16.msra.mxu1 %v11507_v6  ;;  %v561_v4 = vpack.c.bf16 %v249_v0, %v225_v63  ;;  %v274_v6 = vld [vmem:[#allocation2 + $0x4e8] sm:$0xff]  ;;  %v11614_v0 = vld [vmem:[#allocation5 + $0xfa4] ss:$16 sps:$4 sm:$0xff]  }
 0x22f   :  { %6025 = vmatprep.subr.bf16.mxu0 %v11512_v9  ;;  %7381 = vmatprep.subr.bf16.mxu1 %v11515_v10  ;;  %v11569_v9 = vld [vmem:[#allocation5 + $0xeac] ss:$16 sps:$4 sm:$0xff]   ;;  %v11564_v10 = vld [vmem:[#allocation5 + $0xea0] ss:$16 sps:$4 sm:$0xff]   ;;  %v11609_v63 = vld [vmem:[#allocation5 + $0xf88] ss:$16 sps:$4 sm:$0xff]  }
 0x231   :  { %5981 = vmatmul.mubr.bf16.gmra.mrb[24].mxu0 %v655_v13  ;;  %7337 = vmatmul.mubr.bf16.gmra.mrb[24].mxu1 %v655_v13  ;;  %v273_v13 = vld [vmem:[#allocation2 + $0x4e0] sm:$0xff] }
 0x232   :  { %6026 = vmatpush1.bf16.msra.mxu0 %v11510_v11  ;;  %7382 = vmatpush1.bf16.msra.mxu1 %v11513_v12  ;;  %v586_v11 = vpack.c.bf16 %v298_v7, %v274_v6  ;;  %v11567_v12 = vld [vmem:[#allocation5 + $0xea8] ss:$16 sps:$4 sm:$0xff]   ;;  %v489_v6 = vld [vmem:[#allocation2 + $0xba0] sm:$0xff] }
 0x233   :  { %6027 = vmatprep.subr.bf16.mxu0 %v11518_v16  ;;  %7383 = vmatprep.subr.bf16.mxu1 %v11521_v17  ;;  %v11575_v16 = vld [vmem:[#allocation5 + $0xecc] ss:$16 sps:$4 sm:$0xff]   ;;  %v11570_v17 = vld [vmem:[#allocation5 + $0xec0] ss:$16 sps:$4 sm:$0xff]   ;;  %v11620_v7 = vld [vmem:[#allocation5 + $0xfc4] ss:$16 sps:$4 sm:$0xff]  }
 0x234   :  { %5990 = vmatprep.mubr.bf16.mxu0 %v680_v18  ;;  %7346 = vmatprep.mubr.bf16.mxu1 %v680_v18  ;;  %v11573_v18 = vld [vmem:[#allocation5 + $0xec8] ss:$16 sps:$4 sm:$0xff]  }
 0x236   :  { %6028 = vmatpush1.bf16.msra.mxu0 %v11516_v19  ;;  %7384 = vmatpush1.bf16.msra.mxu1 %v11519_v20  ;;  %v585_v19 = vpack.c.bf16 %v297_v14, %v273_v13  ;;  %v322_v20 = vld [vmem:[#allocation2 + $0x668] sm:$0xff]  ;;  %v156_v13 = vld [vmem:[#allocation2 + $0x138] sm:$0xff]  ;;  %v11626_v14 = vld [vmem:[#allocation5 + $0xfe4] ss:$16 sps:$4 sm:$0xff]  }
 0x237   :  { %6029 = vmatprep.subr.bf16.mxu0 %v11524_v23  ;;  %7385 = vmatprep.subr.bf16.mxu1 %v11527_v24  ;;  %v11581_v23 = vld [vmem:[#allocation5 + $0xeec] ss:$16 sps:$4 sm:$0xff]   ;;  %v610_v24 = vpack.c.bf16 %v346_v21, %v322_v20  ;;  %v155_v20 = vld [vmem:[#allocation2 + $0x130] sm:$0xff] }
 0x238   :  { %v11632_v21 = vld [vmem:[#allocation5 + $0x1004] ss:$16 sps:$4 sm:$0xff]  }
 0x239   :  { %5991 = vmatmul.mubr.bf16.gmra.mrb[28].mxu0 %v679_v27  ;;  %7347 = vmatmul.mubr.bf16.gmra.mrb[28].mxu1 %v679_v27  ;;  %v321_v27 = vld [vmem:[#allocation2 + $0x660] sm:$0xff] }
 0x23a   :  { %6030 = vmatpush1.bf16.msra.mxu0 %v11522_v25  ;;  %7386 = vmatpush1.bf16.msra.mxu1 %v11525_v26  ;;  %v11576_v25 = vld [vmem:[#allocation5 + $0xee0] ss:$16 sps:$4 sm:$0xff]   ;;  %v11579_v26 = vld [vmem:[#allocation5 + $0xee8] ss:$16 sps:$4 sm:$0xff]  }
 0x23b   :  { %6031 = vmatprep.subr.bf16.mxu0 %v11530_v30  ;;  %7387 = vmatprep.subr.bf16.mxu1 %v11533_v31  ;;  %v11587_v30 = vld [vmem:[#allocation5 + $0xf0c] ss:$16 sps:$4 sm:$0xff]   ;;  %v11582_v31 = vld [vmem:[#allocation5 + $0xf00] ss:$16 sps:$4 sm:$0xff]  }
 0x23c   :  { %6033 = vmatprep.mubr.bf16.mxu0 %v514_v33  ;;  %7389 = vmatprep.mubr.bf16.mxu1 %v514_v33  ;;  %v609_v33 = vpack.c.bf16 %v345_v28, %v321_v27  ;;  %v204_v27 = vld [vmem:[#allocation2 + $0x2b8] sm:$0xff]  ;;  %v11638_v28 = vld [vmem:[#allocation5 + $0x1024] ss:$16 sps:$4 sm:$0xff]  }
 0x23e   :  { %6032 = vmatpush1.bf16.msra.mxu0 %v11528_v32  ;;  %7388 = vmatpush1.bf16.msra.mxu1 %v11531_v34  ;;  %v11585_v32 = vld [vmem:[#allocation5 + $0xf08] ss:$16 sps:$4 sm:$0xff]  }
 0x23f   :  { %6114 = vmatprep.subr.bf16.mxu0 %v11536_v37  ;;  %7470 = vmatprep.subr.bf16.mxu1 %v11539_v38  ;;  %v370_v34 = vld [vmem:[#allocation2 + $0x7e8] sm:$0xff]  ;;  %v11588_v38 = vld [vmem:[#allocation5 + $0xf20] ss:$16 sps:$4 sm:$0xff]  }
 0x240   :  { %v11593_v37 = vld [vmem:[#allocation5 + $0xf2c] ss:$16 sps:$4 sm:$0xff]  }
 0x241   :  { %6034 = vmatmul.mubr.bf16.vlgmr.msra.gmra.mrb[0].mxu0 %v513_v40  ;;  %7390 = vmatmul.mubr.bf16.vlgmr.msra.gmra.mrb[0].mxu1 %v513_v40  ;;  %v11591_v40 = vld [vmem:[#allocation5 + $0xf28] ss:$16 sps:$4 sm:$0xff]  }
 0x242   :  { %6115 = vmatpush1.bf16.msra.mxu0 %v11534_v39  ;;  %7471 = vmatpush1.bf16.msra.mxu1 %v11537_v43  ;;  %v634_v39 = vpack.c.bf16 %v394_v35, %v370_v34  ;;  %v11596_v43 = vld [vmem:[#allocation5 + $0xf44] ss:$16 sps:$4 sm:$0xff]  }
 0x243   :  { %6116 = vmatprep.subr.bf16.mxu0 %v11542_v44  ;;  %7472 = vmatprep.subr.bf16.mxu1 %v11545_v45  ;;  %v11599_v44 = vld [vmem:[#allocation5 + $0xf4c] ss:$16 sps:$4 sm:$0xff]   ;;  %v11594_v45 = vld [vmem:[#allocation5 + $0xf40] ss:$16 sps:$4 sm:$0xff]   ;;  %v11644_v35 = vld [vmem:[#allocation5 + $0x1044] ss:$16 sps:$4 sm:$0xff]  }
 0x244   :  { %6043 = vmatprep.mubr.bf16.mxu0 %v538_v48  ;;  %7399 = vmatprep.mubr.bf16.mxu1 %v538_v48  ;;  %v442_v48 = vld [vmem:[#allocation2 + $0xa28] sm:$0xff]  ;;  %v203_v34 = vld [vmem:[#allocation2 + $0x2b0] sm:$0xff] }
 0x246   :  { %6117 = vmatpush1.bf16.msra.mxu0 %v11540_v46  ;;  %7473 = vmatpush1.bf16.msra.mxu1 %v11543_v47  ;;  %v633_v46 = vpack.c.bf16 %v393_v42, %v369_v41  ;;  %v418_v47 = vld [vmem:[#allocation2 + $0x968] sm:$0xff]  ;;  %v252_v41 = vld [vmem:[#allocation2 + $0x438] sm:$0xff]  ;;  %v11650_v42 = vld [vmem:[#allocation5 + $0x1064] ss:$16 sps:$4 sm:$0xff]  }
 0x247   :  { %6118 = vmatprep.subr.bf16.mxu0 %v11548_v51  ;;  %7474 = vmatprep.subr.bf16.mxu1 %v11551_v52  ;;  %v11605_v51 = vld [vmem:[#allocation5 + $0xf6c] ss:$16 sps:$4 sm:$0xff]   ;;  %v11600_v52 = vld [vmem:[#allocation5 + $0xf60] ss:$16 sps:$4 sm:$0xff]   ;;  %v658_v54 = vpack.c.bf16 %v442_v48, %v418_v47 }
 0x248   :  { %v227_v47 = vld [vmem:[#allocation2 + $0x370] sm:$0xff] }
 0x249   :  { %6044 = vmatmul.mubr.bf16.gmra.mrb[4].mxu0 %v537_v53  ;;  %7400 = vmatmul.mubr.bf16.gmra.mrb[4].mxu1 %v537_v53  ;;  %v11603_v53 = vld [vmem:[#allocation5 + $0xf68] ss:$16 sps:$4 sm:$0xff]   ;;  %v251_v48 = vld [vmem:[#allocation2 + $0x430] sm:$0xff] }
 0x24a   :  { %6119 = vmatpush1.bf16.msra.mxu0 %v11546_v56  ;;  %7475 = vmatpush1.bf16.msra.mxu1 %v11549_v57  ;;  %v441_v56 = vld [vmem:[#allocation2 + $0xa20] sm:$0xff] }
 0x24b   :  { %6120 = vmatprep.subr.bf16.mxu0 %v11554_v58  ;;  %7476 = vmatprep.subr.bf16.mxu1 %v11557_v59  ;;  %v11608_v57 = vld [vmem:[#allocation5 + $0xf84] ss:$16 sps:$4 sm:$0xff]   ;;  %v11611_v58 = vld [vmem:[#allocation5 + $0xf8c] ss:$16 sps:$4 sm:$0xff]   ;;  %v657_v59 = vpack.c.bf16 %v441_v56, %v417_v55  ;;  %v11657_v55 = vld [vmem:[#allocation5 + $0x1088] ss:$16 sps:$4 sm:$0xff]  }
 0x24c   :  { %6053 = vmatprep.mubr.bf16.mxu0 %v562_v62  ;;  %7409 = vmatprep.mubr.bf16.mxu1 %v562_v62  ;;  %v11606_v62 = vld [vmem:[#allocation5 + $0xf80] ss:$16 sps:$4 sm:$0xff]   ;;  %v11662_v56 = vld [vmem:[#allocation5 + $0x10a4] ss:$16 sps:$4 sm:$0xff]  }
 0x24e   :  { %6121 = vmatpush1.bf16.msra.mxu0 %v11552_v60  ;;  %7477 = vmatpush1.bf16.msra.mxu1 %v11555_v61  ;;  %v466_v60 = vld [vmem:[#allocation2 + $0xae8] sm:$0xff] }
 0x24f   :  { %6122 = vmatprep.subr.bf16.mxu0 %v11560_v1  ;;  %7478 = vmatprep.subr.bf16.mxu1 %v11563_v2  ;;  %v490_v61 = vld [vmem:[#allocation2 + $0xba8] sm:$0xff]  ;;  %v11612_v2 = vld [vmem:[#allocation5 + $0xfa0] ss:$16 sps:$4 sm:$0xff]  }
 0x250   :  { %v11617_v1 = vld [vmem:[#allocation5 + $0xfac] ss:$16 sps:$4 sm:$0xff]  }
 0x251   :  { %6054 = vmatmul.mubr.bf16.gmra.mrb[8].mxu0 %v561_v4  ;;  %7410 = vmatmul.mubr.bf16.gmra.mrb[8].mxu1 %v561_v4  ;;  %v682_v4 = vpack.c.bf16 %v490_v61, %v466_v60  ;;  %v275_v61 = vld [vmem:[#allocation2 + $0x4f0] sm:$0xff] }
 0x252   :  { %6123 = vmatpush1.bf16.msra.mxu0 %v11558_v3  ;;  %7479 = vmatpush1.bf16.msra.mxu1 %v11561_v5  ;;  %v11615_v3 = vld [vmem:[#allocation5 + $0xfa8] ss:$16 sps:$4 sm:$0xff]   ;;  %v465_v5 = vld [vmem:[#allocation2 + $0xae0] sm:$0xff] }
 0x253   :  { %6124 = vmatprep.subr.bf16.mxu0 %v11566_v8  ;;  %7480 = vmatprep.subr.bf16.mxu1 %v11569_v9  ;;  %v11623_v8 = vld [vmem:[#allocation5 + $0xfcc] ss:$16 sps:$4 sm:$0xff]   ;;  %v11618_v9 = vld [vmem:[#allocation5 + $0xfc0] ss:$16 sps:$4 sm:$0xff]  }
 0x254   :  { %6063 = vmatprep.mubr.bf16.mxu0 %v586_v11  ;;  %7419 = vmatprep.mubr.bf16.mxu1 %v586_v11  ;;  %v11621_v11 = vld [vmem:[#allocation5 + $0xfc8] ss:$16 sps:$4 sm:$0xff]  }
 0x256   :  { %6125 = vmatpush1.bf16.msra.mxu0 %v11564_v10  ;;  %7481 = vmatpush1.bf16.msra.mxu1 %v11567_v12  ;;  %v681_v10 = vpack.c.bf16 %v489_v6, %v465_v5  ;;  %v132_v12 = vld [vmem:[#allocation2 + $0x78] sm:$0xff]  ;;  %v11674_v6 = vld [vmem:[#allocation5 + $0x10e4] ss:$16 sps:$4 sm:$0xff]  }
 0x257   :  { %6126 = vmatprep.subr.bf16.mxu0 %v11572_v15  ;;  %7482 = vmatprep.subr.bf16.mxu1 %v11575_v16  ;;  %v11629_v15 = vld [vmem:[#allocation5 + $0xfec] ss:$16 sps:$4 sm:$0xff]   ;;  %v11624_v16 = vld [vmem:[#allocation5 + $0xfe0] ss:$16 sps:$4 sm:$0xff]   ;;  %v11669_v5 = vld [vmem:[#allocation5 + $0x10c8] ss:$16 sps:$4 sm:$0xff]  }
 0x259   :  { %6064 = vmatmul.mubr.bf16.gmra.mrb[12].mxu0 %v585_v19  ;;  %7420 = vmatmul.mubr.bf16.gmra.mrb[12].mxu1 %v585_v19  ;;  %v131_v19 = vld [vmem:[#allocation2 + $0x70] sm:$0xff] }
 0x25a   :  { %6127 = vmatpush1.bf16.msra.mxu0 %v11570_v17  ;;  %7483 = vmatpush1.bf16.msra.mxu1 %v11573_v18  ;;  %v516_v17 = vpack.c.bf16 %v156_v13, %v132_v12  ;;  %v11627_v18 = vld [vmem:[#allocation5 + $0xfe8] ss:$16 sps:$4 sm:$0xff]   ;;  %v347_v12 = vld [vmem:[#allocation2 + $0x730] sm:$0xff] }
 0x25b   :  { %6128 = vmatprep.subr.bf16.mxu0 %v11578_v22  ;;  %7484 = vmatprep.subr.bf16.mxu1 %v11581_v23  ;;  %v11635_v22 = vld [vmem:[#allocation5 + $0x100c] ss:$16 sps:$4 sm:$0xff]   ;;  %v11630_v23 = vld [vmem:[#allocation5 + $0x1000] ss:$16 sps:$4 sm:$0xff]   ;;  %v11680_v13 = vld [vmem:[#allocation5 + $0x1104] ss:$16 sps:$4 sm:$0xff]  }
 0x25c   :  { %6073 = vmatprep.mubr.bf16.mxu0 %v610_v24  ;;  %7429 = vmatprep.mubr.bf16.mxu1 %v610_v24  ;;  %v11633_v24 = vld [vmem:[#allocation5 + $0x1008] ss:$16 sps:$4 sm:$0xff]  }
 0x25e   :  { %6129 = vmatpush1.bf16.msra.mxu0 %v11576_v25  ;;  %7485 = vmatpush1.bf16.msra.mxu1 %v11579_v26  ;;  %v515_v25 = vpack.c.bf16 %v155_v20, %v131_v19  ;;  %v180_v26 = vld [vmem:[#allocation2 + $0x1f8] sm:$0xff]  ;;  %v11686_v20 = vld [vmem:[#allocation5 + $0x1124] ss:$16 sps:$4 sm:$0xff]  }
 0x25f   :  { %6130 = vmatprep.subr.bf16.mxu0 %v11584_v29  ;;  %7486 = vmatprep.subr.bf16.mxu1 %v11587_v30  ;;  %v11641_v29 = vld [vmem:[#allocation5 + $0x102c] ss:$16 sps:$4 sm:$0xff]   ;;  %v540_v30 = vpack.c.bf16 %v204_v27, %v180_v26  ;;  %v395_v26 = vld [vmem:[#allocation2 + $0x8b0] sm:$0xff] }
 0x260   :  { %v396_v19 = vld [vmem:[#allocation2 + $0x8b8] sm:$0xff]  ;;  %v11692_v27 = vld [vmem:[#allocation5 + $0x1144] ss:$16 sps:$4 sm:$0xff]  }
 0x261   :  { %6074 = vmatmul.mubr.bf16.gmra.mrb[16].mxu0 %v609_v33  ;;  %7430 = vmatmul.mubr.bf16.gmra.mrb[16].mxu1 %v609_v33  ;;  %v179_v33 = vld [vmem:[#allocation2 + $0x1f0] sm:$0xff] }
 0x262   :  { %6131 = vmatpush1.bf16.msra.mxu0 %v11582_v31  ;;  %7487 = vmatpush1.bf16.msra.mxu1 %v11585_v32  ;;  %v11636_v31 = vld [vmem:[#allocation5 + $0x1020] ss:$16 sps:$4 sm:$0xff]   ;;  %v11639_v32 = vld [vmem:[#allocation5 + $0x1028] ss:$16 sps:$4 sm:$0xff]  }
 0x263   :  { %6132 = vmatprep.subr.bf16.mxu0 %v11590_v36  ;;  %7488 = vmatprep.subr.bf16.mxu1 %v11593_v37  ;;  %v11647_v36 = vld [vmem:[#allocation5 + $0x104c] ss:$16 sps:$4 sm:$0xff]   ;;  %v11642_v37 = vld [vmem:[#allocation5 + $0x1040] ss:$16 sps:$4 sm:$0xff]  }
 0x264   :  { %6083 = vmatprep.mubr.bf16.mxu0 %v634_v39  ;;  %7439 = vmatprep.mubr.bf16.mxu1 %v634_v39  ;;  %v539_v39 = vpack.c.bf16 %v203_v34, %v179_v33  ;;  %v444_v33 = vld [vmem:[#allocation2 + $0xa38] sm:$0xff]  ;;  %v11698_v34 = vld [vmem:[#allocation5 + $0x1164] ss:$16 sps:$4 sm:$0xff]  }
 0x266   :  { %6133 = vmatpush1.bf16.msra.mxu0 %v11588_v38  ;;  %7489 = vmatpush1.bf16.msra.mxu1 %v11591_v40  ;;  %v11645_v38 = vld [vmem:[#allocation5 + $0x1048] ss:$16 sps:$4 sm:$0xff]  }
 0x267   :  { %6134 = vmatprep.subr.bf16.mxu0 %v11596_v43  ;;  %7490 = vmatprep.subr.bf16.mxu1 %v11599_v44  ;;  %v228_v40 = vld [vmem:[#allocation2 + $0x378] sm:$0xff]  ;;  %v11648_v44 = vld [vmem:[#allocation5 + $0x1060] ss:$16 sps:$4 sm:$0xff]  }
 0x268   :  { %v11653_v43 = vld [vmem:[#allocation5 + $0x106c] ss:$16 sps:$4 sm:$0xff]  }
 0x269   :  { %6084 = vmatmul.mubr.bf16.gmra.mrb[20].mxu0 %v633_v46  ;;  %7440 = vmatmul.mubr.bf16.gmra.mrb[20].mxu1 %v633_v46  ;;  %v11651_v46 = vld [vmem:[#allocation5 + $0x1068] ss:$16 sps:$4 sm:$0xff]  }
 0x26a   :  { %6135 = vmatpush1.bf16.msra.mxu0 %v11594_v45  ;;  %7491 = vmatpush1.bf16.msra.mxu1 %v11597_v49  ;;  %v564_v45 = vpack.c.bf16 %v252_v41, %v228_v40  ;;  %v11656_v49 = vld [vmem:[#allocation5 + $0x1084] ss:$16 sps:$4 sm:$0xff]  }
 0x26b   :  { %6136 = vmatprep.subr.bf16.mxu0 %v11602_v50  ;;  %7492 = vmatprep.subr.bf16.mxu1 %v11605_v51  ;;  %v11659_v50 = vld [vmem:[#allocation5 + $0x108c] ss:$16 sps:$4 sm:$0xff]   ;;  %v11654_v51 = vld [vmem:[#allocation5 + $0x1080] ss:$16 sps:$4 sm:$0xff]   ;;  %v11704_v41 = vld [vmem:[#allocation5 + $0x1184] ss:$16 sps:$4 sm:$0xff]  }
 0x26c   :  { %6093 = vmatprep.mubr.bf16.mxu0 %v658_v54  ;;  %7449 = vmatprep.mubr.bf16.mxu1 %v658_v54  ;;  %v300_v54 = vld [vmem:[#allocation2 + $0x5b8] sm:$0xff]  ;;  %v443_v40 = vld [vmem:[#allocation2 + $0xa30] sm:$0xff] }
 0x26e   :  { %6137 = vmatpush1.bf16.msra.mxu0 %v11600_v52  ;;  %7493 = vmatpush1.bf16.msra.mxu1 %v11603_v53  ;;  %v563_v52 = vpack.c.bf16 %v251_v48, %v227_v47  ;;  %v276_v53 = vld [vmem:[#allocation2 + $0x4f8] sm:$0xff]  ;;  %v11710_v48 = vld [vmem:[#allocation5 + $0x11a4] ss:$16 sps:$4 sm:$0xff]  }
 0x26f   :  { %6138 = vmatprep.subr.bf16.mxu0 %v11608_v57  ;;  %7494 = vmatprep.subr.bf16.mxu1 %v11611_v58  ;;  %v11665_v57 = vld [vmem:[#allocation5 + $0x10ac] ss:$16 sps:$4 sm:$0xff]   ;;  %v11660_v58 = vld [vmem:[#allocation5 + $0x10a0] ss:$16 sps:$4 sm:$0xff]   ;;  %v588_v60 = vpack.c.bf16 %v300_v54, %v276_v53 }
 0x270   :  { %v492_v47 = vld [vmem:[#allocation2 + $0xbb8] sm:$0xff]  ;;  %v467_v53 = vld [vmem:[#allocation2 + $0xaf0] sm:$0xff] }
 0x271   :  { %6094 = vmatmul.mubr.bf16.gmra.mrb[24].mxu0 %v657_v59  ;;  %7450 = vmatmul.mubr.bf16.gmra.mrb[24].mxu1 %v657_v59  ;;  %v11663_v59 = vld [vmem:[#allocation5 + $0x10a8] ss:$16 sps:$4 sm:$0xff]   ;;  %v491_v54 = vld [vmem:[#allocation2 + $0xbb0] sm:$0xff] }
 0x272   :  { %6139 = vmatpush1.bf16.msra.mxu0 %v11606_v62  ;;  %7495 = vmatpush1.bf16.msra.mxu1 %v11609_v63  ;;  %v299_v62 = vld [vmem:[#allocation2 + $0x5b0] sm:$0xff] }
 0x273   :  { %6140 = vmatprep.subr.bf16.mxu0 %v11614_v0  ;;  %7496 = vmatprep.subr.bf16.mxu1 %v11617_v1  ;;  %v11668_v63 = vld [vmem:[#allocation5 + $0x10c4] ss:$16 sps:$4 sm:$0xff]   ;;  %v11671_v0 = vld [vmem:[#allocation5 + $0x10cc] ss:$16 sps:$4 sm:$0xff]   ;;  %v587_v1 = vpack.c.bf16 %v299_v62, %v275_v61  ;;  %v11717_v61 = vld [vmem:[#allocation5 + $0x11c8] ss:$16 sps:$4 sm:$0xff]  }
 0x274   :  { %6103 = vmatprep.mubr.bf16.mxu0 %v682_v4  ;;  %7459 = vmatprep.mubr.bf16.mxu1 %v682_v4  ;;  %v11666_v4 = vld [vmem:[#allocation5 + $0x10c0] ss:$16 sps:$4 sm:$0xff]   ;;  %v11722_v62 = vld [vmem:[#allocation5 + $0x11e4] ss:$16 sps:$4 sm:$0xff]  }
 0x276   :  { %6141 = vmatpush1.bf16.msra.mxu0 %v11612_v2  ;;  %7497 = vmatpush1.bf16.msra.mxu1 %v11615_v3  ;;  %v324_v2 = vld [vmem:[#allocation2 + $0x678] sm:$0xff] }
 0x277   :  { %6142 = vmatprep.subr.bf16.mxu0 %v11620_v7  ;;  %7498 = vmatprep.subr.bf16.mxu1 %v11623_v8  ;;  %v348_v3 = vld [vmem:[#allocation2 + $0x738] sm:$0xff]  ;;  %v11672_v8 = vld [vmem:[#allocation5 + $0x10e0] ss:$16 sps:$4 sm:$0xff]  }
 0x278   :  { %v11677_v7 = vld [vmem:[#allocation5 + $0x10ec] ss:$16 sps:$4 sm:$0xff]  }
 0x279   :  { %6104 = vmatmul.mubr.bf16.gmra.mrb[28].mxu0 %v681_v10  ;;  %7460 = vmatmul.mubr.bf16.gmra.mrb[28].mxu1 %v681_v10  ;;  %v612_v10 = vpack.c.bf16 %v348_v3, %v324_v2  ;;  %v133_v3 = vld [vmem:[#allocation2 + $0x80] sm:$0xff] }
 0x27a   :  { %6143 = vmatpush1.bf16.msra.mxu0 %v11618_v9  ;;  %7499 = vmatpush1.bf16.msra.mxu1 %v11621_v11  ;;  %v11675_v9 = vld [vmem:[#allocation5 + $0x10e8] ss:$16 sps:$4 sm:$0xff]   ;;  %v323_v11 = vld [vmem:[#allocation2 + $0x670] sm:$0xff] }
 0x27b   :  { %6144 = vmatprep.subr.bf16.mxu0 %v11626_v14  ;;  %7500 = vmatprep.subr.bf16.mxu1 %v11629_v15  ;;  %v11683_v14 = vld [vmem:[#allocation5 + $0x110c] ss:$16 sps:$4 sm:$0xff]   ;;  %v11678_v15 = vld [vmem:[#allocation5 + $0x1100] ss:$16 sps:$4 sm:$0xff]  }
 0x27c   :  { %6146 = vmatprep.mubr.bf16.mxu0 %v516_v17  ;;  %7502 = vmatprep.mubr.bf16.mxu1 %v516_v17  ;;  %v11681_v17 = vld [vmem:[#allocation5 + $0x1108] ss:$16 sps:$4 sm:$0xff]  }
 0x27e   :  { %6145 = vmatpush1.bf16.msra.mxu0 %v11624_v16  ;;  %7501 = vmatpush1.bf16.msra.mxu1 %v11627_v18  ;;  %v611_v16 = vpack.c.bf16 %v347_v12, %v323_v11  ;;  %v372_v18 = vld [vmem:[#allocation2 + $0x7f8] sm:$0xff]  ;;  %v11734_v12 = vld [vmem:[#allocation5 + $0x1224] ss:$16 sps:$4 sm:$0xff]  }
 0x27f   :  { %6227 = vmatprep.subr.bf16.mxu0 %v11632_v21  ;;  %7583 = vmatprep.subr.bf16.mxu1 %v11635_v22  ;;  %v11689_v21 = vld [vmem:[#allocation5 + $0x112c] ss:$16 sps:$4 sm:$0xff]   ;;  %v11684_v22 = vld [vmem:[#allocation5 + $0x1120] ss:$16 sps:$4 sm:$0xff]   ;;  %v11729_v11 = vld [vmem:[#allocation5 + $0x1208] ss:$16 sps:$4 sm:$0xff]  }
 0x281   :  { %6147 = vmatmul.mubr.bf16.vlgmr.msra.gmra.mrb[0].mxu0 %v515_v25  ;;  %7503 = vmatmul.mubr.bf16.vlgmr.msra.gmra.mrb[0].mxu1 %v515_v25  ;;  %v371_v25 = vld [vmem:[#allocation2 + $0x7f0] sm:$0xff] }
 0x282   :  { %6228 = vmatpush1.bf16.msra.mxu0 %v11630_v23  ;;  %7584 = vmatpush1.bf16.msra.mxu1 %v11633_v24  ;;  %v636_v23 = vpack.c.bf16 %v396_v19, %v372_v18  ;;  %v11687_v24 = vld [vmem:[#allocation5 + $0x1128] ss:$16 sps:$4 sm:$0xff]   ;;  %v205_v18 = vld [vmem:[#allocation2 + $0x2c0] sm:$0xff] }
 0x283   :  { %6229 = vmatprep.subr.bf16.mxu0 %v11638_v28  ;;  %7585 = vmatprep.subr.bf16.mxu1 %v11641_v29  ;;  %v11695_v28 = vld [vmem:[#allocation5 + $0x114c] ss:$16 sps:$4 sm:$0xff]   ;;  %v11690_v29 = vld [vmem:[#allocation5 + $0x1140] ss:$16 sps:$4 sm:$0xff]   ;;  %v11740_v19 = vld [vmem:[#allocation5 + $0x1244] ss:$16 sps:$4 sm:$0xff]  }
 0x284   :  { %6156 = vmatprep.mubr.bf16.mxu0 %v540_v30  ;;  %7512 = vmatprep.mubr.bf16.mxu1 %v540_v30  ;;  %v11693_v30 = vld [vmem:[#allocation5 + $0x1148] ss:$16 sps:$4 sm:$0xff]  }
 0x286   :  { %6230 = vmatpush1.bf16.msra.mxu0 %v11636_v31  ;;  %7586 = vmatpush1.bf16.msra.mxu1 %v11639_v32  ;;  %v635_v31 = vpack.c.bf16 %v395_v26, %v371_v25  ;;  %v420_v32 = vld [vmem:[#allocation2 + $0x978] sm:$0xff]  ;;  %v11746_v26 = vld [vmem:[#allocation5 + $0x1264] ss:$16 sps:$4 sm:$0xff]  }
 0x287   :  { %6231 = vmatprep.subr.bf16.mxu0 %v11644_v35  ;;  %7587 = vmatprep.subr.bf16.mxu1 %v11647_v36  ;;  %v11701_v35 = vld [vmem:[#allocation5 + $0x116c] ss:$16 sps:$4 sm:$0xff]   ;;  %v660_v36 = vpack.c.bf16 %v444_v33, %v420_v32  ;;  %v11741_v25 = vld [vmem:[#allocation5 + $0x1248] ss:$16 sps:$4 sm:$0xff]   ;;  %v253_v32 = vld [vmem:[#allocation2 + $0x440] sm:$0xff] }
 0x288   :  { %v11752_v33 = vld [vmem:[#allocation5 + $0x1284] ss:$16 sps:$4 sm:$0xff]  }
 0x289   :  { %6157 = vmatmul.mubr.bf16.gmra.mrb[4].mxu0 %v539_v39  ;;  %7513 = vmatmul.mubr.bf16.gmra.mrb[4].mxu1 %v539_v39  ;;  %v419_v39 = vld [vmem:[#allocation2 + $0x970] sm:$0xff] }
 0x28a   :  { %6232 = vmatpush1.bf16.msra.mxu0 %v11642_v37  ;;  %7588 = vmatpush1.bf16.msra.mxu1 %v11645_v38  ;;  %v11696_v37 = vld [vmem:[#allocation5 + $0x1160] ss:$16 sps:$4 sm:$0xff]   ;;  %v11699_v38 = vld [vmem:[#allocation5 + $0x1168] ss:$16 sps:$4 sm:$0xff]  }
 0x28b   :  { %6233 = vmatprep.subr.bf16.mxu0 %v11650_v42  ;;  %7589 = vmatprep.subr.bf16.mxu1 %v11653_v43  ;;  %v11707_v42 = vld [vmem:[#allocation5 + $0x118c] ss:$16 sps:$4 sm:$0xff]   ;;  %v11702_v43 = vld [vmem:[#allocation5 + $0x1180] ss:$16 sps:$4 sm:$0xff]  }
 0x28c   :  { %6166 = vmatprep.mubr.bf16.mxu0 %v564_v45  ;;  %7522 = vmatprep.mubr.bf16.mxu1 %v564_v45  ;;  %v659_v45 = vpack.c.bf16 %v443_v40, %v419_v39  ;;  %v11753_v39 = vld [vmem:[#allocation5 + $0x1288] ss:$16 sps:$4 sm:$0xff]   ;;  %v11758_v40 = vld [vmem:[#allocation5 + $0x12a4] ss:$16 sps:$4 sm:$0xff]  }
 0x28e   :  { %6234 = vmatpush1.bf16.msra.mxu0 %v11648_v44  ;;  %7590 = vmatpush1.bf16.msra.mxu1 %v11651_v46  ;;  %v11705_v44 = vld [vmem:[#allocation5 + $0x1188] ss:$16 sps:$4 sm:$0xff]  }
 0x28f   :  { %6235 = vmatprep.subr.bf16.mxu0 %v11656_v49  ;;  %7591 = vmatprep.subr.bf16.mxu1 %v11659_v50  ;;  %v468_v46 = vld [vmem:[#allocation2 + $0xaf8] sm:$0xff]  ;;  %v11708_v50 = vld [vmem:[#allocation5 + $0x11a0] ss:$16 sps:$4 sm:$0xff]  }
 0x290   :  { %v11713_v49 = vld [vmem:[#allocation5 + $0x11ac] ss:$16 sps:$4 sm:$0xff]  }
 0x291   :  { %6167 = vmatmul.mubr.bf16.gmra.mrb[8].mxu0 %v563_v52  ;;  %7523 = vmatmul.mubr.bf16.gmra.mrb[8].mxu1 %v563_v52  ;;  %v11711_v52 = vld [vmem:[#allocation5 + $0x11a8] ss:$16 sps:$4 sm:$0xff]  }
 0x292   :  { %6236 = vmatpush1.bf16.msra.mxu0 %v11654_v51  ;;  %7592 = vmatpush1.bf16.msra.mxu1 %v11657_v55  ;;  %v684_v51 = vpack.c.bf16 %v492_v47, %v468_v46  ;;  %v11716_v55 = vld [vmem:[#allocation5 + $0x11c4] ss:$16 sps:$4 sm:$0xff]  }
 0x293   :  { %6237 = vmatprep.subr.bf16.mxu0 %v11662_v56  ;;  %7593 = vmatprep.subr.bf16.mxu1 %v11665_v57  ;;  %v11719_v56 = vld [vmem:[#allocation5 + $0x11cc] ss:$16 sps:$4 sm:$0xff]   ;;  %v11714_v57 = vld [vmem:[#allocation5 + $0x11c0] ss:$16 sps:$4 sm:$0xff]   ;;  %v11764_v47 = vld [vmem:[#allocation5 + $0x12c4] ss:$16 sps:$4 sm:$0xff]  }
 0x294   :  { %6176 = vmatprep.mubr.bf16.mxu0 %v588_v60  ;;  %7532 = vmatprep.mubr.bf16.mxu1 %v588_v60  ;;  %v158_v60 = vld [vmem:[#allocation2 + $0x148] sm:$0xff]  ;;  %v301_v46 = vld [vmem:[#allocation2 + $0x5c0] sm:$0xff] }
 0x296   :  { %6238 = vmatpush1.bf16.msra.mxu0 %v11660_v58  ;;  %7594 = vmatpush1.bf16.msra.mxu1 %v11663_v59  ;;  %v683_v58 = vpack.c.bf16 %v491_v54, %v467_v53  ;;  %v134_v59 = vld [vmem:[#allocation2 + $0x88] sm:$0xff]  ;;  %v11770_v54 = vld [vmem:[#allocation5 + $0x12e4] ss:$16 sps:$4 sm:$0xff]  }
 0x297   :  { %6239 = vmatprep.subr.bf16.mxu0 %v11668_v63  ;;  %7595 = vmatprep.subr.bf16.mxu1 %v11671_v0  ;;  %v11725_v63 = vld [vmem:[#allocation5 + $0x11ec] ss:$16 sps:$4 sm:$0xff]   ;;  %v11720_v0 = vld [vmem:[#allocation5 + $0x11e0] ss:$16 sps:$4 sm:$0xff]   ;;  %v518_v2 = vpack.c.bf16 %v158_v60, %v134_v59  ;;  %v11765_v53 = vld [vmem:[#allocation5 + $0x12c8] ss:$16 sps:$4 sm:$0xff]  }
 0x298   :  { %v325_v59 = vld [vmem:[#allocation2 + $0x680] sm:$0xff] }
 0x299   :  { %6177 = vmatmul.mubr.bf16.gmra.mrb[12].mxu0 %v587_v1  ;;  %7533 = vmatmul.mubr.bf16.gmra.mrb[12].mxu1 %v587_v1  ;;  %v11723_v1 = vld [vmem:[#allocation5 + $0x11e8] ss:$16 sps:$4 sm:$0xff]   ;;  %v349_v60 = vld [vmem:[#allocation2 + $0x740] sm:$0xff] }
 0x29a   :  { %6240 = vmatpush1.bf16.msra.mxu0 %v11666_v4  ;;  %7596 = vmatpush1.bf16.msra.mxu1 %v11669_v5  ;;  %v157_v4 = vld [vmem:[#allocation2 + $0x140] sm:$0xff] }
 0x29b   :  { %6241 = vmatprep.subr.bf16.mxu0 %v11674_v6  ;;  %7597 = vmatprep.subr.bf16.mxu1 %v11677_v7  ;;  %v11728_v5 = vld [vmem:[#allocation5 + $0x1204] ss:$16 sps:$4 sm:$0xff]   ;;  %v11731_v6 = vld [vmem:[#allocation5 + $0x120c] ss:$16 sps:$4 sm:$0xff]   ;;  %v517_v7 = vpack.c.bf16 %v157_v4, %v133_v3  ;;  %v11777_v3 = vld [vmem:[#allocation5 + $0x1308] ss:$16 sps:$4 sm:$0xff]  }
 0x29c   :  { %6186 = vmatprep.mubr.bf16.mxu0 %v612_v10  ;;  %7542 = vmatprep.mubr.bf16.mxu1 %v612_v10  ;;  %v11726_v10 = vld [vmem:[#allocation5 + $0x1200] ss:$16 sps:$4 sm:$0xff]   ;;  %v11782_v4 = vld [vmem:[#allocation5 + $0x1324] ss:$16 sps:$4 sm:$0xff]  }
 0x29e   :  { %6242 = vmatpush1.bf16.msra.mxu0 %v11672_v8  ;;  %7598 = vmatpush1.bf16.msra.mxu1 %v11675_v9  ;;  %v182_v8 = vld [vmem:[#allocation2 + $0x208] sm:$0xff] }
 0x29f   :  { %6243 = vmatprep.subr.bf16.mxu0 %v11680_v13  ;;  %7599 = vmatprep.subr.bf16.mxu1 %v11683_v14  ;;  %v206_v9 = vld [vmem:[#allocation2 + $0x2c8] sm:$0xff]  ;;  %v11732_v14 = vld [vmem:[#allocation5 + $0x1220] ss:$16 sps:$4 sm:$0xff]  }
 0x2a0   :  { %v11737_v13 = vld [vmem:[#allocation5 + $0x122c] ss:$16 sps:$4 sm:$0xff]  }
 0x2a1   :  { %6187 = vmatmul.mubr.bf16.gmra.mrb[16].mxu0 %v611_v16  ;;  %7543 = vmatmul.mubr.bf16.gmra.mrb[16].mxu1 %v611_v16  ;;  %v542_v16 = vpack.c.bf16 %v206_v9, %v182_v8  ;;  %v373_v9 = vld [vmem:[#allocation2 + $0x800] sm:$0xff] }
 0x2a2   :  { %6244 = vmatpush1.bf16.msra.mxu0 %v11678_v15  ;;  %7600 = vmatpush1.bf16.msra.mxu1 %v11681_v17  ;;  %v11735_v15 = vld [vmem:[#allocation5 + $0x1228] ss:$16 sps:$4 sm:$0xff]   ;;  %v181_v17 = vld [vmem:[#allocation2 + $0x200] sm:$0xff] }
 0x2a3   :  { %6245 = vmatprep.subr.bf16.mxu0 %v11686_v20  ;;  %7601 = vmatprep.subr.bf16.mxu1 %v11689_v21  ;;  %v11743_v20 = vld [vmem:[#allocation5 + $0x124c] ss:$16 sps:$4 sm:$0xff]   ;;  %v541_v21 = vpack.c.bf16 %v205_v18, %v181_v17  ;;  %v11789_v17 = vld [vmem:[#allocation5 + $0x1348] ss:$16 sps:$4 sm:$0xff]   ;;  %v11794_v18 = vld [vmem:[#allocation5 + $0x1364] ss:$16 sps:$4 sm:$0xff]  }
 0x2a4   :  { %6196 = vmatprep.mubr.bf16.mxu0 %v636_v23  ;;  %7552 = vmatprep.mubr.bf16.mxu1 %v636_v23  ;;  %v254_v23 = vld [vmem:[#allocation2 + $0x448] sm:$0xff] }
 0x2a6   :  { %6246 = vmatpush1.bf16.msra.mxu0 %v11684_v22  ;;  %7602 = vmatpush1.bf16.msra.mxu1 %v11687_v24  ;;  %v230_v22 = vld [vmem:[#allocation2 + $0x388] sm:$0xff]  ;;  %v11738_v24 = vld [vmem:[#allocation5 + $0x1240] ss:$16 sps:$4 sm:$0xff]  }
 0x2a7   :  { %6247 = vmatprep.subr.bf16.mxu0 %v11692_v27  ;;  %7603 = vmatprep.subr.bf16.mxu1 %v11695_v28  ;;  %v11749_v27 = vld [vmem:[#allocation5 + $0x126c] ss:$16 sps:$4 sm:$0xff]   ;;  %v11744_v28 = vld [vmem:[#allocation5 + $0x1260] ss:$16 sps:$4 sm:$0xff]  }
 0x2a9   :  { %6197 = vmatmul.mubr.bf16.gmra.mrb[20].mxu0 %v635_v31  ;;  %7553 = vmatmul.mubr.bf16.gmra.mrb[20].mxu1 %v635_v31  ;;  %v229_v31 = vld [vmem:[#allocation2 + $0x380] sm:$0xff] }
 0x2aa   :  { %6248 = vmatpush1.bf16.msra.mxu0 %v11690_v29  ;;  %7604 = vmatpush1.bf16.msra.mxu1 %v11693_v30  ;;  %v11747_v29 = vld [vmem:[#allocation5 + $0x1268] ss:$16 sps:$4 sm:$0xff]   ;;  %v566_v30 = vpack.c.bf16 %v254_v23, %v230_v22  ;;  %v421_v23 = vld [vmem:[#allocation2 + $0x980] sm:$0xff] }
 0x2ab   :  { %6249 = vmatprep.subr.bf16.mxu0 %v11698_v34  ;;  %7605 = vmatprep.subr.bf16.mxu1 %v11701_v35  ;;  %v11755_v34 = vld [vmem:[#allocation5 + $0x128c] ss:$16 sps:$4 sm:$0xff]   ;;  %v565_v35 = vpack.c.bf16 %v253_v32, %v229_v31  ;;  %v11801_v31 = vld [vmem:[#allocation5 + $0x1388] ss:$16 sps:$4 sm:$0xff]   ;;  %v11806_v32 = vld [vmem:[#allocation5 + $0x13a4] ss:$16 sps:$4 sm:$0xff]  }
 0x2ac   :  { %6206 = vmatprep.mubr.bf16.mxu0 %v660_v36  ;;  %7562 = vmatprep.mubr.bf16.mxu1 %v660_v36  ;;  %v278_v36 = vld [vmem:[#allocation2 + $0x508] sm:$0xff] }
 0x2ae   :  { %6250 = vmatpush1.bf16.msra.mxu0 %v11696_v37  ;;  %7606 = vmatpush1.bf16.msra.mxu1 %v11699_v38  ;;  %v302_v37 = vld [vmem:[#allocation2 + $0x5c8] sm:$0xff]  ;;  %v11750_v38 = vld [vmem:[#allocation5 + $0x1280] ss:$16 sps:$4 sm:$0xff]  }
 0x2af   :  { %6251 = vmatprep.subr.bf16.mxu0 %v11704_v41  ;;  %7607 = vmatprep.subr.bf16.mxu1 %v11707_v42  ;;  %v11761_v41 = vld [vmem:[#allocation5 + $0x12ac] ss:$16 sps:$4 sm:$0xff]   ;;  %v11756_v42 = vld [vmem:[#allocation5 + $0x12a0] ss:$16 sps:$4 sm:$0xff]  }
 0x2b1   :  { %6207 = vmatmul.mubr.bf16.gmra.mrb[24].mxu0 %v659_v45  ;;  %7563 = vmatmul.mubr.bf16.gmra.mrb[24].mxu1 %v659_v45  ;;  %v277_v45 = vld [vmem:[#allocation2 + $0x500] sm:$0xff] }
 0x2b2   :  { %6252 = vmatpush1.bf16.msra.mxu0 %v11702_v43  ;;  %7608 = vmatpush1.bf16.msra.mxu1 %v11705_v44  ;;  %v11759_v43 = vld [vmem:[#allocation5 + $0x12a8] ss:$16 sps:$4 sm:$0xff]   ;;  %v590_v44 = vpack.c.bf16 %v302_v37, %v278_v36  ;;  %v469_v37 = vld [vmem:[#allocation2 + $0xb00] sm:$0xff] }
 0x2b3   :  { %6253 = vmatprep.subr.bf16.mxu0 %v11710_v48  ;;  %7609 = vmatprep.subr.bf16.mxu1 %v11713_v49  ;;  %v11767_v48 = vld [vmem:[#allocation5 + $0x12cc] ss:$16 sps:$4 sm:$0xff]   ;;  %v589_v49 = vpack.c.bf16 %v301_v46, %v277_v45  ;;  %v11813_v45 = vld [vmem:[#allocation5 + $0x13c8] ss:$16 sps:$4 sm:$0xff]   ;;  %v11818_v46 = vld [vmem:[#allocation5 + $0x13e4] ss:$16 sps:$4 sm:$0xff]  }
 0x2b4   :  { %6216 = vmatprep.mubr.bf16.mxu0 %v684_v51  ;;  %7572 = vmatprep.mubr.bf16.mxu1 %v684_v51  ;;  %v350_v51 = vld [vmem:[#allocation2 + $0x748] sm:$0xff] }
 0x2b6   :  { %6254 = vmatpush1.bf16.msra.mxu0 %v11708_v50  ;;  %7610 = vmatpush1.bf16.msra.mxu1 %v11711_v52  ;;  %v326_v50 = vld [vmem:[#allocation2 + $0x688] sm:$0xff]  ;;  %v11762_v52 = vld [vmem:[#allocation5 + $0x12c0] ss:$16 sps:$4 sm:$0xff]  }
 0x2b7   :  { %6255 = vmatprep.subr.bf16.mxu0 %v11716_v55  ;;  %7611 = vmatprep.subr.bf16.mxu1 %v11719_v56  ;;  %v11773_v55 = vld [vmem:[#allocation5 + $0x12ec] ss:$16 sps:$4 sm:$0xff]   ;;  %v11768_v56 = vld [vmem:[#allocation5 + $0x12e0] ss:$16 sps:$4 sm:$0xff]  }
 0x2b9   :  { %6217 = vmatmul.mubr.bf16.gmra.mrb[28].mxu0 %v683_v58  ;;  %7573 = vmatmul.mubr.bf16.gmra.mrb[28].mxu1 %v683_v58  ;;  %v614_v58 = vpack.c.bf16 %v350_v51, %v326_v50  ;;  %v135_v51 = vld [vmem:[#allocation2 + $0x90] sm:$0xff] }
 0x2ba   :  { %6256 = vmatpush1.bf16.msra.mxu0 %v11714_v57  ;;  %7612 = vmatpush1.bf16.msra.mxu1 %v11717_v61  ;;  %v11771_v57 = vld [vmem:[#allocation5 + $0x12e8] ss:$16 sps:$4 sm:$0xff]   ;;  %v11776_v61 = vld [vmem:[#allocation5 + $0x1304] ss:$16 sps:$4 sm:$0xff]  }
 0x2bb   :  { %6257 = vmatprep.subr.bf16.mxu0 %v11722_v62  ;;  %7613 = vmatprep.subr.bf16.mxu1 %v11725_v63  ;;  %v11779_v62 = vld [vmem:[#allocation5 + $0x130c] ss:$16 sps:$4 sm:$0xff]   ;;  %v613_v63 = vpack.c.bf16 %v349_v60, %v325_v59  ;;  %v11830_v60 = vld [vmem:[#allocation5 + $0x1424] ss:$16 sps:$4 sm:$0xff]  }
 0x2bc   :  { %6259 = vmatprep.mubr.bf16.mxu0 %v518_v2  ;;  %7615 = vmatprep.mubr.bf16.mxu1 %v518_v2  ;;  %v11774_v2 = vld [vmem:[#allocation5 + $0x1300] ss:$16 sps:$4 sm:$0xff]   ;;  %v208_v59 = vld [vmem:[#allocation2 + $0x2d8] sm:$0xff] }
 0x2be   :  { %6258 = vmatpush1.bf16.msra.mxu0 %v11720_v0  ;;  %7614 = vmatpush1.bf16.msra.mxu1 %v11723_v1  ;;  %v374_v0 = vld [vmem:[#allocation2 + $0x808] sm:$0xff] }
 0x2bf   :  { %6340 = vmatprep.subr.bf16.mxu0 %v11728_v5  ;;  %7696 = vmatprep.subr.bf16.mxu1 %v11731_v6  ;;  %v398_v1 = vld [vmem:[#allocation2 + $0x8c8] sm:$0xff]  ;;  %v11780_v6 = vld [vmem:[#allocation5 + $0x1320] ss:$16 sps:$4 sm:$0xff]  }
 0x2c0   :  { %v11785_v5 = vld [vmem:[#allocation5 + $0x132c] ss:$16 sps:$4 sm:$0xff]   ;;  %v638_v8 = vpack.c.bf16 %v398_v1, %v374_v0  ;;  %v183_v1 = vld [vmem:[#allocation2 + $0x210] sm:$0xff] }
 0x2c1   :  { %6260 = vmatmul.mubr.bf16.vlgmr.msra.gmra.mrb[0].mxu0 %v517_v7  ;;  %7616 = vmatmul.mubr.bf16.vlgmr.msra.gmra.mrb[0].mxu1 %v517_v7  ;;  %v11783_v7 = vld [vmem:[#allocation5 + $0x1328] ss:$16 sps:$4 sm:$0xff]  }
 0x2c2   :  { %6341 = vmatpush1.bf16.msra.mxu0 %v11726_v10  ;;  %7697 = vmatpush1.bf16.msra.mxu1 %v11729_v11  ;;  %v397_v10 = vld [vmem:[#allocation2 + $0x8c0] sm:$0xff] }
 0x2c3   :  { %6342 = vmatprep.subr.bf16.mxu0 %v11734_v12  ;;  %7698 = vmatprep.subr.bf16.mxu1 %v11737_v13  ;;  %v11788_v11 = vld [vmem:[#allocation5 + $0x1344] ss:$16 sps:$4 sm:$0xff]   ;;  %v11791_v12 = vld [vmem:[#allocation5 + $0x134c] ss:$16 sps:$4 sm:$0xff]   ;;  %v637_v13 = vpack.c.bf16 %v397_v10, %v373_v9 }
 0x2c4   :  { %6269 = vmatprep.mubr.bf16.mxu0 %v542_v16  ;;  %7625 = vmatprep.mubr.bf16.mxu1 %v542_v16  ;;  %v11786_v16 = vld [vmem:[#allocation5 + $0x1340] ss:$16 sps:$4 sm:$0xff]   ;;  %v11842_v10 = vld [vmem:[#allocation5 + $0x1464] ss:$16 sps:$4 sm:$0xff]  }
 0x2c6   :  { %6343 = vmatpush1.bf16.msra.mxu0 %v11732_v14  ;;  %7699 = vmatpush1.bf16.msra.mxu1 %v11735_v15  ;;  %v422_v14 = vld [vmem:[#allocation2 + $0x988] sm:$0xff] }
 0x2c7   :  { %6344 = vmatprep.subr.bf16.mxu0 %v11740_v19  ;;  %7700 = vmatprep.subr.bf16.mxu1 %v11743_v20  ;;  %v446_v15 = vld [vmem:[#allocation2 + $0xa48] sm:$0xff]  ;;  %v11792_v20 = vld [vmem:[#allocation5 + $0x1360] ss:$16 sps:$4 sm:$0xff]  }
 0x2c8   :  { %v11797_v19 = vld [vmem:[#allocation5 + $0x136c] ss:$16 sps:$4 sm:$0xff]   ;;  %v662_v22 = vpack.c.bf16 %v446_v15, %v422_v14  ;;  %v231_v15 = vld [vmem:[#allocation2 + $0x390] sm:$0xff] }
 0x2c9   :  { %6270 = vmatmul.mubr.bf16.gmra.mrb[4].mxu0 %v541_v21  ;;  %7626 = vmatmul.mubr.bf16.gmra.mrb[4].mxu1 %v541_v21  ;;  %v11795_v21 = vld [vmem:[#allocation5 + $0x1368] ss:$16 sps:$4 sm:$0xff]  }
 0x2ca   :  { %6345 = vmatpush1.bf16.msra.mxu0 %v11738_v24  ;;  %7701 = vmatpush1.bf16.msra.mxu1 %v11741_v25  ;;  %v445_v24 = vld [vmem:[#allocation2 + $0xa40] sm:$0xff] }
 0x2cb   :  { %6346 = vmatprep.subr.bf16.mxu0 %v11746_v26  ;;  %7702 = vmatprep.subr.bf16.mxu1 %v11749_v27  ;;  %v11800_v25 = vld [vmem:[#allocation5 + $0x1384] ss:$16 sps:$4 sm:$0xff]   ;;  %v11803_v26 = vld [vmem:[#allocation5 + $0x138c] ss:$16 sps:$4 sm:$0xff]   ;;  %v661_v27 = vpack.c.bf16 %v445_v24, %v421_v23 }
 0x2cc   :  { %6279 = vmatprep.mubr.bf16.mxu0 %v566_v30  ;;  %7635 = vmatprep.mubr.bf16.mxu1 %v566_v30  ;;  %v11798_v30 = vld [vmem:[#allocation5 + $0x1380] ss:$16 sps:$4 sm:$0xff]   ;;  %v11854_v24 = vld [vmem:[#allocation5 + $0x14a4] ss:$16 sps:$4 sm:$0xff]  }
 0x2ce   :  { %6347 = vmatpush1.bf16.msra.mxu0 %v11744_v28  ;;  %7703 = vmatpush1.bf16.msra.mxu1 %v11747_v29  ;;  %v470_v28 = vld [vmem:[#allocation2 + $0xb08] sm:$0xff] }
 0x2cf   :  { %6348 = vmatprep.subr.bf16.mxu0 %v11752_v33  ;;  %7704 = vmatprep.subr.bf16.mxu1 %v11755_v34  ;;  %v494_v29 = vld [vmem:[#allocation2 + $0xbc8] sm:$0xff]  ;;  %v11804_v34 = vld [vmem:[#allocation5 + $0x13a0] ss:$16 sps:$4 sm:$0xff]  }
 0x2d0   :  { %v11809_v33 = vld [vmem:[#allocation5 + $0x13ac] ss:$16 sps:$4 sm:$0xff]   ;;  %v686_v36 = vpack.c.bf16 %v494_v29, %v470_v28  ;;  %v279_v29 = vld [vmem:[#allocation2 + $0x510] sm:$0xff] }
 0x2d1   :  { %6280 = vmatmul.mubr.bf16.gmra.mrb[8].mxu0 %v565_v35  ;;  %7636 = vmatmul.mubr.bf16.gmra.mrb[8].mxu1 %v565_v35  ;;  %v11807_v35 = vld [vmem:[#allocation5 + $0x13a8] ss:$16 sps:$4 sm:$0xff]  }
 0x2d2   :  { %6349 = vmatpush1.bf16.msra.mxu0 %v11750_v38  ;;  %7705 = vmatpush1.bf16.msra.mxu1 %v11753_v39  ;;  %v493_v38 = vld [vmem:[#allocation2 + $0xbc0] sm:$0xff] }
 0x2d3   :  { %6350 = vmatprep.subr.bf16.mxu0 %v11758_v40  ;;  %7706 = vmatprep.subr.bf16.mxu1 %v11761_v41  ;;  %v11812_v39 = vld [vmem:[#allocation5 + $0x13c4] ss:$16 sps:$4 sm:$0xff]   ;;  %v11815_v40 = vld [vmem:[#allocation5 + $0x13cc] ss:$16 sps:$4 sm:$0xff]   ;;  %v685_v41 = vpack.c.bf16 %v493_v38, %v469_v37 }
 0x2d4   :  { %6289 = vmatprep.mubr.bf16.mxu0 %v590_v44  ;;  %7645 = vmatprep.mubr.bf16.mxu1 %v590_v44  ;;  %v11810_v44 = vld [vmem:[#allocation5 + $0x13c0] ss:$16 sps:$4 sm:$0xff]   ;;  %v11866_v38 = vld [vmem:[#allocation5 + $0x14e4] ss:$16 sps:$4 sm:$0xff]  }
 0x2d6   :  { %6351 = vmatpush1.bf16.msra.mxu0 %v11756_v42  ;;  %7707 = vmatpush1.bf16.msra.mxu1 %v11759_v43  ;;  %v136_v42 = vld [vmem:[#allocation2 + $0x98] sm:$0xff] }
 0x2d7   :  { %6352 = vmatprep.subr.bf16.mxu0 %v11764_v47  ;;  %7708 = vmatprep.subr.bf16.mxu1 %v11767_v48  ;;  %v160_v43 = vld [vmem:[#allocation2 + $0x158] sm:$0xff]  ;;  %v11816_v48 = vld [vmem:[#allocation5 + $0x13e0] ss:$16 sps:$4 sm:$0xff]  }
 0x2d8   :  { %v11821_v47 = vld [vmem:[#allocation5 + $0x13ec] ss:$16 sps:$4 sm:$0xff]   ;;  %v520_v50 = vpack.c.bf16 %v160_v43, %v136_v42  ;;  %v11867_v42 = vld [vmem:[#allocation5 + $0x14e8] ss:$16 sps:$4 sm:$0xff]   ;;  %v327_v43 = vld [vmem:[#allocation2 + $0x690] sm:$0xff] }
 0x2d9   :  { %6290 = vmatmul.mubr.bf16.gmra.mrb[12].mxu0 %v589_v49  ;;  %7646 = vmatmul.mubr.bf16.gmra.mrb[12].mxu1 %v589_v49  ;;  %v11819_v49 = vld [vmem:[#allocation5 + $0x13e8] ss:$16 sps:$4 sm:$0xff]  }
 0x2da   :  { %6353 = vmatpush1.bf16.msra.mxu0 %v11762_v52  ;;  %7709 = vmatpush1.bf16.msra.mxu1 %v11765_v53  ;;  %v159_v52 = vld [vmem:[#allocation2 + $0x150] sm:$0xff] }
 0x2db   :  { %6354 = vmatprep.subr.bf16.mxu0 %v11770_v54  ;;  %7710 = vmatprep.subr.bf16.mxu1 %v11773_v55  ;;  %v11824_v53 = vld [vmem:[#allocation5 + $0x1404] ss:$16 sps:$4 sm:$0xff]   ;;  %v11827_v54 = vld [vmem:[#allocation5 + $0x140c] ss:$16 sps:$4 sm:$0xff]   ;;  %v11822_v55 = vld [vmem:[#allocation5 + $0x1400] ss:$16 sps:$4 sm:$0xff]  }
 0x2dc   :  { %6299 = vmatprep.mubr.bf16.mxu0 %v614_v58  ;;  %7655 = vmatprep.mubr.bf16.mxu1 %v614_v58  ;;  %v184_v58 = vld [vmem:[#allocation2 + $0x218] sm:$0xff] }
 0x2dd   :  { %v544_v0 = vpack.c.bf16 %v208_v59, %v184_v58  ;;  %v399_v58 = vld [vmem:[#allocation2 + $0x8d0] sm:$0xff] }
 0x2de   :  { %6355 = vmatpush1.bf16.msra.mxu0 %v11768_v56  ;;  %7711 = vmatpush1.bf16.msra.mxu1 %v11771_v57  ;;  %v11825_v56 = vld [vmem:[#allocation5 + $0x1408] ss:$16 sps:$4 sm:$0xff]   ;;  %v519_v57 = vpack.c.bf16 %v159_v52, %v135_v51  ;;  %v11878_v52 = vld [vmem:[#allocation5 + $0x1524] ss:$16 sps:$4 sm:$0xff]  }
 0x2df   :  { %6356 = vmatprep.subr.bf16.mxu0 %v11776_v61  ;;  %7712 = vmatprep.subr.bf16.mxu1 %v11779_v62  ;;  %v11833_v61 = vld [vmem:[#allocation5 + $0x142c] ss:$16 sps:$4 sm:$0xff]   ;;  %v11828_v62 = vld [vmem:[#allocation5 + $0x1420] ss:$16 sps:$4 sm:$0xff]   ;;  %v11873_v51 = vld [vmem:[#allocation5 + $0x1508] ss:$16 sps:$4 sm:$0xff]  }
 0x2e0   :  { %v11884_v59 = vld [vmem:[#allocation5 + $0x1544] ss:$16 sps:$4 sm:$0xff]  }
 0x2e1   :  { %6300 = vmatmul.mubr.bf16.gmra.mrb[16].mxu0 %v613_v63  ;;  %7656 = vmatmul.mubr.bf16.gmra.mrb[16].mxu1 %v613_v63  ;;  %v11831_v63 = vld [vmem:[#allocation5 + $0x1428] ss:$16 sps:$4 sm:$0xff]  }
 0x2e2   :  { %6357 = vmatpush1.bf16.msra.mxu0 %v11774_v2  ;;  %7713 = vmatpush1.bf16.msra.mxu1 %v11777_v3  ;;  %v207_v2 = vld [vmem:[#allocation2 + $0x2d0] sm:$0xff] }
 0x2e3   :  { %6358 = vmatprep.subr.bf16.mxu0 %v11782_v4  ;;  %7714 = vmatprep.subr.bf16.mxu1 %v11785_v5  ;;  %v11836_v3 = vld [vmem:[#allocation5 + $0x1444] ss:$16 sps:$4 sm:$0xff]   ;;  %v11839_v4 = vld [vmem:[#allocation5 + $0x144c] ss:$16 sps:$4 sm:$0xff]   ;;  %v543_v9 = vpack.c.bf16 %v207_v2, %v183_v1  ;;  %v11885_v1 = vld [vmem:[#allocation5 + $0x1548] ss:$16 sps:$4 sm:$0xff]  }
 0x2e4   :  { %6309 = vmatprep.mubr.bf16.mxu0 %v638_v8  ;;  %7665 = vmatprep.mubr.bf16.mxu1 %v638_v8  ;;  %v232_v5 = vld [vmem:[#allocation2 + $0x398] sm:$0xff]  ;;  %v11890_v2 = vld [vmem:[#allocation5 + $0x1564] ss:$16 sps:$4 sm:$0xff]  }
 0x2e5   :  { %v11837_v8 = vld [vmem:[#allocation5 + $0x1448] ss:$16 sps:$4 sm:$0xff]  }
 0x2e6   :  { %6359 = vmatpush1.bf16.msra.mxu0 %v11780_v6  ;;  %7715 = vmatpush1.bf16.msra.mxu1 %v11783_v7  ;;  %v256_v6 = vld [vmem:[#allocation2 + $0x458] sm:$0xff]  ;;  %v11834_v7 = vld [vmem:[#allocation5 + $0x1440] ss:$16 sps:$4 sm:$0xff]  }
 0x2e7   :  { %6360 = vmatprep.subr.bf16.mxu0 %v11788_v11  ;;  %7716 = vmatprep.subr.bf16.mxu1 %v11791_v12  ;;  %v11845_v11 = vld [vmem:[#allocation5 + $0x146c] ss:$16 sps:$4 sm:$0xff]   ;;  %v11840_v12 = vld [vmem:[#allocation5 + $0x1460] ss:$16 sps:$4 sm:$0xff]   ;;  %v568_v14 = vpack.c.bf16 %v256_v6, %v232_v5  ;;  %v11891_v6 = vld [vmem:[#allocation5 + $0x1568] ss:$16 sps:$4 sm:$0xff]  }
 0x2e8   :  { %v11888_v5 = vld [vmem:[#allocation5 + $0x1560] ss:$16 sps:$4 sm:$0xff]  }
 0x2e9   :  { %6310 = vmatmul.mubr.bf16.gmra.mrb[20].mxu0 %v637_v13  ;;  %7666 = vmatmul.mubr.bf16.gmra.mrb[20].mxu1 %v637_v13  ;;  %v11843_v13 = vld [vmem:[#allocation5 + $0x1468] ss:$16 sps:$4 sm:$0xff]  }
 0x2ea   :  { %6361 = vmatpush1.bf16.msra.mxu0 %v11786_v16  ;;  %7717 = vmatpush1.bf16.msra.mxu1 %v11789_v17  ;;  %v255_v16 = vld [vmem:[#allocation2 + $0x450] sm:$0xff] }
 0x2eb   :  { %6362 = vmatprep.subr.bf16.mxu0 %v11794_v18  ;;  %7718 = vmatprep.subr.bf16.mxu1 %v11797_v19  ;;  %v11848_v17 = vld [vmem:[#allocation5 + $0x1484] ss:$16 sps:$4 sm:$0xff]   ;;  %v11851_v18 = vld [vmem:[#allocation5 + $0x148c] ss:$16 sps:$4 sm:$0xff]   ;;  %v567_v23 = vpack.c.bf16 %v255_v16, %v231_v15  ;;  %v11897_v15 = vld [vmem:[#allocation5 + $0x1588] ss:$16 sps:$4 sm:$0xff]  }
 0x2ec   :  { %6319 = vmatprep.mubr.bf16.mxu0 %v662_v22  ;;  %7675 = vmatprep.mubr.bf16.mxu1 %v662_v22  ;;  %v280_v19 = vld [vmem:[#allocation2 + $0x518] sm:$0xff]  ;;  %v11902_v16 = vld [vmem:[#allocation5 + $0x15a4] ss:$16 sps:$4 sm:$0xff]  }
 0x2ed   :  { %v11849_v22 = vld [vmem:[#allocation5 + $0x1488] ss:$16 sps:$4 sm:$0xff]  }
 0x2ee   :  { %6363 = vmatpush1.bf16.msra.mxu0 %v11792_v20  ;;  %7719 = vmatpush1.bf16.msra.mxu1 %v11795_v21  ;;  %v304_v20 = vld [vmem:[#allocation2 + $0x5d8] sm:$0xff]  ;;  %v11846_v21 = vld [vmem:[#allocation5 + $0x1480] ss:$16 sps:$4 sm:$0xff]  }
 0x2ef   :  { %6364 = vmatprep.subr.bf16.mxu0 %v11800_v25  ;;  %7720 = vmatprep.subr.bf16.mxu1 %v11803_v26  ;;  %v11857_v25 = vld [vmem:[#allocation5 + $0x14ac] ss:$16 sps:$4 sm:$0xff]   ;;  %v11852_v26 = vld [vmem:[#allocation5 + $0x14a0] ss:$16 sps:$4 sm:$0xff]   ;;  %v592_v28 = vpack.c.bf16 %v304_v20, %v280_v19  ;;  %v11903_v20 = vld [vmem:[#allocation5 + $0x15a8] ss:$16 sps:$4 sm:$0xff]  }
 0x2f0   :  { %v11900_v19 = vld [vmem:[#allocation5 + $0x15a0] ss:$16 sps:$4 sm:$0xff]  }
 0x2f1   :  { %6320 = vmatmul.mubr.bf16.gmra.mrb[24].mxu0 %v661_v27  ;;  %7676 = vmatmul.mubr.bf16.gmra.mrb[24].mxu1 %v661_v27  ;;  %v11855_v27 = vld [vmem:[#allocation5 + $0x14a8] ss:$16 sps:$4 sm:$0xff]  }
 0x2f2   :  { %6365 = vmatpush1.bf16.msra.mxu0 %v11798_v30  ;;  %7721 = vmatpush1.bf16.msra.mxu1 %v11801_v31  ;;  %v303_v30 = vld [vmem:[#allocation2 + $0x5d0] sm:$0xff] }
 0x2f3   :  { %6366 = vmatprep.subr.bf16.mxu0 %v11806_v32  ;;  %7722 = vmatprep.subr.bf16.mxu1 %v11809_v33  ;;  %v11860_v31 = vld [vmem:[#allocation5 + $0x14c4] ss:$16 sps:$4 sm:$0xff]   ;;  %v11863_v32 = vld [vmem:[#allocation5 + $0x14cc] ss:$16 sps:$4 sm:$0xff]   ;;  %v591_v37 = vpack.c.bf16 %v303_v30, %v279_v29  ;;  %v11909_v29 = vld [vmem:[#allocation5 + $0x15c8] ss:$16 sps:$4 sm:$0xff]  }
 0x2f4   :  { %6329 = vmatprep.mubr.bf16.mxu0 %v686_v36  ;;  %7685 = vmatprep.mubr.bf16.mxu1 %v686_v36  ;;  %v328_v33 = vld [vmem:[#allocation2 + $0x698] sm:$0xff]  ;;  %v11914_v30 = vld [vmem:[#allocation5 + $0x15e4] ss:$16 sps:$4 sm:$0xff]  }
 0x2f5   :  { %v11861_v36 = vld [vmem:[#allocation5 + $0x14c8] ss:$16 sps:$4 sm:$0xff]  }
 0x2f6   :  { %6367 = vmatpush1.bf16.msra.mxu0 %v11804_v34  ;;  %7723 = vmatpush1.bf16.msra.mxu1 %v11807_v35  ;;  %v352_v34 = vld [vmem:[#allocation2 + $0x758] sm:$0xff]  ;;  %v11858_v35 = vld [vmem:[#allocation5 + $0x14c0] ss:$16 sps:$4 sm:$0xff]  }
 0x2f7   :  { %6368 = vmatprep.subr.bf16.mxu0 %v11812_v39  ;;  %7724 = vmatprep.subr.bf16.mxu1 %v11815_v40  ;;  %v11869_v39 = vld [vmem:[#allocation5 + $0x14ec] ss:$16 sps:$4 sm:$0xff]   ;;  %v616_v40 = vpack.c.bf16 %v352_v34, %v328_v33  ;;  %v11912_v33 = vld [vmem:[#allocation5 + $0x15e0] ss:$16 sps:$4 sm:$0xff]   ;;  %v11915_v34 = vld [vmem:[#allocation5 + $0x15e8] ss:$16 sps:$4 sm:$0xff]  }
 0x2f9   :  { %6330 = vmatmul.mubr.bf16.gmra.mrb[28].mxu0 %v685_v41  ;;  %7686 = vmatmul.mubr.bf16.gmra.mrb[28].mxu1 %v685_v41  ;;  %v11864_v41 = vld [vmem:[#allocation5 + $0x14e0] ss:$16 sps:$4 sm:$0xff]  }
 0x2fa   :  { %6369 = vmatpush1.bf16.msra.mxu0 %v11810_v44  ;;  %7725 = vmatpush1.bf16.msra.mxu1 %v11813_v45  ;;  %v351_v44 = vld [vmem:[#allocation2 + $0x750] sm:$0xff] }
 0x2fb   :  { %6370 = vmatprep.subr.bf16.mxu0 %v11818_v46  ;;  %7726 = vmatprep.subr.bf16.mxu1 %v11821_v47  ;;  %v11872_v45 = vld [vmem:[#allocation5 + $0x1504] ss:$16 sps:$4 sm:$0xff]   ;;  %v11875_v46 = vld [vmem:[#allocation5 + $0x150c] ss:$16 sps:$4 sm:$0xff]   ;;  %v615_v47 = vpack.c.bf16 %v351_v44, %v327_v43  ;;  %v11921_v43 = vld [vmem:[#allocation5 + $0x1608] ss:$16 sps:$4 sm:$0xff]  }
 0x2fc   :  { %6372 = vmatprep.mubr.bf16.mxu0 %v520_v50  ;;  %7728 = vmatprep.mubr.bf16.mxu1 %v520_v50  ;;  %v11870_v50 = vld [vmem:[#allocation5 + $0x1500] ss:$16 sps:$4 sm:$0xff]   ;;  %v11926_v44 = vld [vmem:[#allocation5 + $0x1624] ss:$16 sps:$4 sm:$0xff]  }
 0x2fe   :  { %6371 = vmatpush1.bf16.msra.mxu0 %v11816_v48  ;;  %7727 = vmatpush1.bf16.msra.mxu1 %v11819_v49  ;;  %v376_v48 = vld [vmem:[#allocation2 + $0x818] sm:$0xff] }
 0x2ff   :  { %6453 = vmatprep.subr.bf16.mxu0 %v11824_v53  ;;  %7809 = vmatprep.subr.bf16.mxu1 %v11827_v54  ;;  %v400_v49 = vld [vmem:[#allocation2 + $0x8d8] sm:$0xff] }
 0x300   :  { %v11881_v53 = vld [vmem:[#allocation5 + $0x152c] ss:$16 sps:$4 sm:$0xff]   ;;  %v640_v54 = vpack.c.bf16 %v400_v49, %v376_v48  ;;  %v11927_v48 = vld [vmem:[#allocation5 + $0x1628] ss:$16 sps:$4 sm:$0xff]   ;;  %v185_v49 = vld [vmem:[#allocation2 + $0x220] sm:$0xff] }
 0x301   :  { %6373 = vmatmul.mubr.bf16.vlgmr.msra.gmra.mrb[0].mxu0 %v519_v57  ;;  %7729 = vmatmul.mubr.bf16.vlgmr.msra.gmra.mrb[0].mxu1 %v519_v57  ;;  %v375_v57 = vld [vmem:[#allocation2 + $0x810] sm:$0xff] }
 0x302   :  { %6454 = vmatpush1.bf16.msra.mxu0 %v11822_v55  ;;  %7810 = vmatpush1.bf16.msra.mxu1 %v11825_v56  ;;  %v11876_v55 = vld [vmem:[#allocation5 + $0x1520] ss:$16 sps:$4 sm:$0xff]   ;;  %v11879_v56 = vld [vmem:[#allocation5 + $0x1528] ss:$16 sps:$4 sm:$0xff]  }
 0x303   :  { %6455 = vmatprep.subr.bf16.mxu0 %v11830_v60  ;;  %7811 = vmatprep.subr.bf16.mxu1 %v11833_v61  ;;  %v11887_v60 = vld [vmem:[#allocation5 + $0x154c] ss:$16 sps:$4 sm:$0xff]   ;;  %v639_v61 = vpack.c.bf16 %v399_v58, %v375_v57  ;;  %v11933_v57 = vld [vmem:[#allocation5 + $0x1648] ss:$16 sps:$4 sm:$0xff]   ;;  %v11938_v58 = vld [vmem:[#allocation5 + $0x1664] ss:$16 sps:$4 sm:$0xff]  }
 0x304   :  { %6382 = vmatprep.mubr.bf16.mxu0 %v544_v0  ;;  %7738 = vmatprep.mubr.bf16.mxu1 %v544_v0  ;;  %v11882_v0 = vld [vmem:[#allocation5 + $0x1540] ss:$16 sps:$4 sm:$0xff]  }
 0x306   :  { %6456 = vmatpush1.bf16.msra.mxu0 %v11828_v62  ;;  %7812 = vmatpush1.bf16.msra.mxu1 %v11831_v63  ;;  %v424_v62 = vld [vmem:[#allocation2 + $0x998] sm:$0xff] }
 0x307   :  { %6457 = vmatprep.subr.bf16.mxu0 %v11836_v3  ;;  %7813 = vmatprep.subr.bf16.mxu1 %v11839_v4  ;;  %v448_v63 = vld [vmem:[#allocation2 + $0xa58] sm:$0xff] }
 0x308   :  { %v11893_v3 = vld [vmem:[#allocation5 + $0x156c] ss:$16 sps:$4 sm:$0xff]   ;;  %v664_v4 = vpack.c.bf16 %v448_v63, %v424_v62  ;;  %v11939_v62 = vld [vmem:[#allocation5 + $0x1668] ss:$16 sps:$4 sm:$0xff]   ;;  %v233_v63 = vld [vmem:[#allocation2 + $0x3a0] sm:$0xff] }
 0x309   :  { %6383 = vmatmul.mubr.bf16.gmra.mrb[4].mxu0 %v543_v9  ;;  %7739 = vmatmul.mubr.bf16.gmra.mrb[4].mxu1 %v543_v9  ;;  %v11896_v9 = vld [vmem:[#allocation5 + $0x1584] ss:$16 sps:$4 sm:$0xff]  }
 0x30a   :  { %6458 = vmatpush1.bf16.msra.mxu0 %v11834_v7  ;;  %7814 = vmatpush1.bf16.msra.mxu1 %v11837_v8  ;;  %v423_v7 = vld [vmem:[#allocation2 + $0x990] sm:$0xff] }
 0x30b   :  { %6459 = vmatprep.subr.bf16.mxu0 %v11842_v10  ;;  %7815 = vmatprep.subr.bf16.mxu1 %v11845_v11  ;;  %v447_v8 = vld [vmem:[#allocation2 + $0xa50] sm:$0xff]  ;;  %v11899_v10 = vld [vmem:[#allocation5 + $0x158c] ss:$16 sps:$4 sm:$0xff]  }
 0x30c   :  { %6392 = vmatprep.mubr.bf16.mxu0 %v568_v14  ;;  %7748 = vmatprep.mubr.bf16.mxu1 %v568_v14  ;;  %v663_v11 = vpack.c.bf16 %v447_v8, %v423_v7  ;;  %v11894_v14 = vld [vmem:[#allocation5 + $0x1580] ss:$16 sps:$4 sm:$0xff]   ;;  %v11945_v7 = vld [vmem:[#allocation5 + $0x1688] ss:$16 sps:$4 sm:$0xff]   ;;  %v11950_v8 = vld [vmem:[#allocation5 + $0x16a4] ss:$16 sps:$4 sm:$0xff]  }
 0x30e   :  { %6460 = vmatpush1.bf16.msra.mxu0 %v11840_v12  ;;  %7816 = vmatpush1.bf16.msra.mxu1 %v11843_v13  ;;  %v472_v12 = vld [vmem:[#allocation2 + $0xb18] sm:$0xff] }
 0x30f   :  { %6461 = vmatprep.subr.bf16.mxu0 %v11848_v17  ;;  %7817 = vmatprep.subr.bf16.mxu1 %v11851_v18  ;;  %v496_v13 = vld [vmem:[#allocation2 + $0xbd8] sm:$0xff] }
 0x310   :  { %v11905_v17 = vld [vmem:[#allocation5 + $0x15ac] ss:$16 sps:$4 sm:$0xff]   ;;  %v688_v18 = vpack.c.bf16 %v496_v13, %v472_v12  ;;  %v11951_v12 = vld [vmem:[#allocation5 + $0x16a8] ss:$16 sps:$4 sm:$0xff]   ;;  %v281_v13 = vld [vmem:[#allocation2 + $0x520] sm:$0xff] }
 0x311   :  { %6393 = vmatmul.mubr.bf16.gmra.mrb[8].mxu0 %v567_v23  ;;  %7749 = vmatmul.mubr.bf16.gmra.mrb[8].mxu1 %v567_v23  ;;  %v11908_v23 = vld [vmem:[#allocation5 + $0x15c4] ss:$16 sps:$4 sm:$0xff]  }
 0x312   :  { %6462 = vmatpush1.bf16.msra.mxu0 %v11846_v21  ;;  %7818 = vmatpush1.bf16.msra.mxu1 %v11849_v22  ;;  %v471_v21 = vld [vmem:[#allocation2 + $0xb10] sm:$0xff] }
 0x313   :  { %6463 = vmatprep.subr.bf16.mxu0 %v11854_v24  ;;  %7819 = vmatprep.subr.bf16.mxu1 %v11857_v25  ;;  %v495_v22 = vld [vmem:[#allocation2 + $0xbd0] sm:$0xff]  ;;  %v11911_v24 = vld [vmem:[#allocation5 + $0x15cc] ss:$16 sps:$4 sm:$0xff]  }
 0x314   :  { %6402 = vmatprep.mubr.bf16.mxu0 %v592_v28  ;;  %7758 = vmatprep.mubr.bf16.mxu1 %v592_v28  ;;  %v687_v25 = vpack.c.bf16 %v495_v22, %v471_v21  ;;  %v11906_v28 = vld [vmem:[#allocation5 + $0x15c0] ss:$16 sps:$4 sm:$0xff]   ;;  %v11957_v21 = vld [vmem:[#allocation5 + $0x16c8] ss:$16 sps:$4 sm:$0xff]   ;;  %v11962_v22 = vld [vmem:[#allocation5 + $0x16e4] ss:$16 sps:$4 sm:$0xff]  }
 0x316   :  { %6464 = vmatpush1.bf16.msra.mxu0 %v11852_v26  ;;  %7820 = vmatpush1.bf16.msra.mxu1 %v11855_v27  ;;  %v138_v26 = vld [vmem:[#allocation2 + $0xa8] sm:$0xff] }
 0x317   :  { %6465 = vmatprep.subr.bf16.mxu0 %v11860_v31  ;;  %7821 = vmatprep.subr.bf16.mxu1 %v11863_v32  ;;  %v162_v27 = vld [vmem:[#allocation2 + $0x168] sm:$0xff] }
 0x318   :  { %v11917_v31 = vld [vmem:[#allocation5 + $0x15ec] ss:$16 sps:$4 sm:$0xff]   ;;  %v522_v32 = vpack.c.bf16 %v162_v27, %v138_v26  ;;  %v11963_v26 = vld [vmem:[#allocation5 + $0x16e8] ss:$16 sps:$4 sm:$0xff]   ;;  %v329_v27 = vld [vmem:[#allocation2 + $0x6a0] sm:$0xff] }
 0x319   :  { %6403 = vmatmul.mubr.bf16.gmra.mrb[12].mxu0 %v591_v37  ;;  %7759 = vmatmul.mubr.bf16.gmra.mrb[12].mxu1 %v591_v37  ;;  %v11920_v37 = vld [vmem:[#allocation5 + $0x1604] ss:$16 sps:$4 sm:$0xff]  }
 0x31a   :  { %6466 = vmatpush1.bf16.msra.mxu0 %v11858_v35  ;;  %7822 = vmatpush1.bf16.msra.mxu1 %v11861_v36  ;;  %v137_v35 = vld [vmem:[#allocation2 + $0xa0] sm:$0xff] }
 0x31b   :  { %6467 = vmatprep.subr.bf16.mxu0 %v11866_v38  ;;  %7823 = vmatprep.subr.bf16.mxu1 %v11869_v39  ;;  %v161_v36 = vld [vmem:[#allocation2 + $0x160] sm:$0xff]  ;;  %v11923_v38 = vld [vmem:[#allocation5 + $0x160c] ss:$16 sps:$4 sm:$0xff]  }
 0x31c   :  { %6412 = vmatprep.mubr.bf16.mxu0 %v616_v40  ;;  %7768 = vmatprep.mubr.bf16.mxu1 %v616_v40  ;;  %v521_v39 = vpack.c.bf16 %v161_v36, %v137_v35  ;;  %v186_v40 = vld [vmem:[#allocation2 + $0x228] sm:$0xff]  ;;  %v11974_v36 = vld [vmem:[#allocation5 + $0x1724] ss:$16 sps:$4 sm:$0xff]  }
 0x31d   :  { %v11969_v35 = vld [vmem:[#allocation5 + $0x1708] ss:$16 sps:$4 sm:$0xff]  }
 0x31e   :  { %6468 = vmatpush1.bf16.msra.mxu0 %v11864_v41  ;;  %7824 = vmatpush1.bf16.msra.mxu1 %v11867_v42  ;;  %v210_v41 = vld [vmem:[#allocation2 + $0x2e8] sm:$0xff]  ;;  %v11918_v42 = vld [vmem:[#allocation5 + $0x1600] ss:$16 sps:$4 sm:$0xff]  }
 0x31f   :  { %6469 = vmatprep.subr.bf16.mxu0 %v11872_v45  ;;  %7825 = vmatprep.subr.bf16.mxu1 %v11875_v46  ;;  %v11929_v45 = vld [vmem:[#allocation5 + $0x162c] ss:$16 sps:$4 sm:$0xff]   ;;  %v546_v46 = vpack.c.bf16 %v210_v41, %v186_v40  ;;  %v11975_v40 = vld [vmem:[#allocation5 + $0x1728] ss:$16 sps:$4 sm:$0xff]   ;;  %v377_v41 = vld [vmem:[#allocation2 + $0x820] sm:$0xff] }
 0x321   :  { %6413 = vmatmul.mubr.bf16.gmra.mrb[16].mxu0 %v615_v47  ;;  %7769 = vmatmul.mubr.bf16.gmra.mrb[16].mxu1 %v615_v47  ;;  %v11924_v47 = vld [vmem:[#allocation5 + $0x1620] ss:$16 sps:$4 sm:$0xff]  }
 0x322   :  { %6470 = vmatpush1.bf16.msra.mxu0 %v11870_v50  ;;  %7826 = vmatpush1.bf16.msra.mxu1 %v11873_v51  ;;  %v209_v50 = vld [vmem:[#allocation2 + $0x2e0] sm:$0xff] }
 0x323   :  { %6471 = vmatprep.subr.bf16.mxu0 %v11878_v52  ;;  %7827 = vmatprep.subr.bf16.mxu1 %v11881_v53  ;;  %v11932_v51 = vld [vmem:[#allocation5 + $0x1644] ss:$16 sps:$4 sm:$0xff]   ;;  %v11935_v52 = vld [vmem:[#allocation5 + $0x164c] ss:$16 sps:$4 sm:$0xff]   ;;  %v545_v53 = vpack.c.bf16 %v209_v50, %v185_v49  ;;  %v11981_v49 = vld [vmem:[#allocation5 + $0x1748] ss:$16 sps:$4 sm:$0xff]  }
 0x324   :  { %6422 = vmatprep.mubr.bf16.mxu0 %v640_v54  ;;  %7778 = vmatprep.mubr.bf16.mxu1 %v640_v54  ;;  %v234_v54 = vld [vmem:[#allocation2 + $0x3a8] sm:$0xff]  ;;  %v11986_v50 = vld [vmem:[#allocation5 + $0x1764] ss:$16 sps:$4 sm:$0xff]  }
 0x326   :  { %6472 = vmatpush1.bf16.msra.mxu0 %v11876_v55  ;;  %7828 = vmatpush1.bf16.msra.mxu1 %v11879_v56  ;;  %v258_v55 = vld [vmem:[#allocation2 + $0x468] sm:$0xff]  ;;  %v11930_v56 = vld [vmem:[#allocation5 + $0x1640] ss:$16 sps:$4 sm:$0xff]  }
 0x327   :  { %6473 = vmatprep.subr.bf16.mxu0 %v11884_v59  ;;  %7829 = vmatprep.subr.bf16.mxu1 %v11887_v60  ;;  %v11941_v59 = vld [vmem:[#allocation5 + $0x166c] ss:$16 sps:$4 sm:$0xff]   ;;  %v570_v60 = vpack.c.bf16 %v258_v55, %v234_v54  ;;  %v11987_v54 = vld [vmem:[#allocation5 + $0x1768] ss:$16 sps:$4 sm:$0xff]   ;;  %v425_v55 = vld [vmem:[#allocation2 + $0x9a0] sm:$0xff] }
 0x329   :  { %6423 = vmatmul.mubr.bf16.gmra.mrb[20].mxu0 %v639_v61  ;;  %7779 = vmatmul.mubr.bf16.gmra.mrb[20].mxu1 %v639_v61  ;;  %v11936_v61 = vld [vmem:[#allocation5 + $0x1660] ss:$16 sps:$4 sm:$0xff]  }
 0x32a   :  { %6474 = vmatpush1.bf16.msra.mxu0 %v11882_v0  ;;  %7830 = vmatpush1.bf16.msra.mxu1 %v11885_v1  ;;  %v257_v0 = vld [vmem:[#allocation2 + $0x460] sm:$0xff] }
 0x32b   :  { %6475 = vmatprep.subr.bf16.mxu0 %v11890_v2  ;;  %7831 = vmatprep.subr.bf16.mxu1 %v11893_v3  ;;  %v11944_v1 = vld [vmem:[#allocation5 + $0x1684] ss:$16 sps:$4 sm:$0xff]   ;;  %v11947_v2 = vld [vmem:[#allocation5 + $0x168c] ss:$16 sps:$4 sm:$0xff]   ;;  %v569_v3 = vpack.c.bf16 %v257_v0, %v233_v63  ;;  %v11993_v63 = vld [vmem:[#allocation5 + $0x1788] ss:$16 sps:$4 sm:$0xff]  }
 0x32c   :  { %6432 = vmatprep.mubr.bf16.mxu0 %v664_v4  ;;  %7788 = vmatprep.mubr.bf16.mxu1 %v664_v4  ;;  %v282_v4 = vld [vmem:[#allocation2 + $0x528] sm:$0xff]  ;;  %v11998_v0 = vld [vmem:[#allocation5 + $0x17a4] ss:$16 sps:$4 sm:$0xff]  }
 0x32e   :  { %6476 = vmatpush1.bf16.msra.mxu0 %v11888_v5  ;;  %7832 = vmatpush1.bf16.msra.mxu1 %v11891_v6  ;;  %v306_v5 = vld [vmem:[#allocation2 + $0x5e8] sm:$0xff]  ;;  %v11942_v6 = vld [vmem:[#allocation5 + $0x1680] ss:$16 sps:$4 sm:$0xff]  }
 0x32f   :  { %6477 = vmatprep.subr.bf16.mxu0 %v11896_v9  ;;  %7833 = vmatprep.subr.bf16.mxu1 %v11899_v10  ;;  %v11953_v9 = vld [vmem:[#allocation5 + $0x16ac] ss:$16 sps:$4 sm:$0xff]   ;;  %v594_v10 = vpack.c.bf16 %v306_v5, %v282_v4  ;;  %v11999_v4 = vld [vmem:[#allocation5 + $0x17a8] ss:$16 sps:$4 sm:$0xff]   ;;  %v473_v5 = vld [vmem:[#allocation2 + $0xb20] sm:$0xff] }
 0x331   :  { %6433 = vmatmul.mubr.bf16.gmra.mrb[24].mxu0 %v663_v11  ;;  %7789 = vmatmul.mubr.bf16.gmra.mrb[24].mxu1 %v663_v11  ;;  %v11948_v11 = vld [vmem:[#allocation5 + $0x16a0] ss:$16 sps:$4 sm:$0xff]  }
 0x332   :  { %6478 = vmatpush1.bf16.msra.mxu0 %v11894_v14  ;;  %7834 = vmatpush1.bf16.msra.mxu1 %v11897_v15  ;;  %v305_v14 = vld [vmem:[#allocation2 + $0x5e0] sm:$0xff] }
 0x333   :  { %6479 = vmatprep.subr.bf16.mxu0 %v11902_v16  ;;  %7835 = vmatprep.subr.bf16.mxu1 %v11905_v17  ;;  %v11956_v15 = vld [vmem:[#allocation5 + $0x16c4] ss:$16 sps:$4 sm:$0xff]   ;;  %v11959_v16 = vld [vmem:[#allocation5 + $0x16cc] ss:$16 sps:$4 sm:$0xff]   ;;  %v593_v17 = vpack.c.bf16 %v305_v14, %v281_v13  ;;  %v12005_v13 = vld [vmem:[#allocation5 + $0x17c8] ss:$16 sps:$4 sm:$0xff]  }
 0x334   :  { %6442 = vmatprep.mubr.bf16.mxu0 %v688_v18  ;;  %7798 = vmatprep.mubr.bf16.mxu1 %v688_v18  ;;  %v330_v18 = vld [vmem:[#allocation2 + $0x6a8] sm:$0xff]  ;;  %v12010_v14 = vld [vmem:[#allocation5 + $0x17e4] ss:$16 sps:$4 sm:$0xff]  }
 0x336   :  { %6480 = vmatpush1.bf16.msra.mxu0 %v11900_v19  ;;  %7836 = vmatpush1.bf16.msra.mxu1 %v11903_v20  ;;  %v354_v19 = vld [vmem:[#allocation2 + $0x768] sm:$0xff]  ;;  %v11954_v20 = vld [vmem:[#allocation5 + $0x16c0] ss:$16 sps:$4 sm:$0xff]  }
 0x337   :  { %6481 = vmatprep.subr.bf16.mxu0 %v11908_v23  ;;  %7837 = vmatprep.subr.bf16.mxu1 %v11911_v24  ;;  %v11965_v23 = vld [vmem:[#allocation5 + $0x16ec] ss:$16 sps:$4 sm:$0xff]   ;;  %v618_v24 = vpack.c.bf16 %v354_v19, %v330_v18  ;;  %v12011_v18 = vld [vmem:[#allocation5 + $0x17e8] ss:$16 sps:$4 sm:$0xff]   ;;  %v139_v19 = vld [vmem:[#allocation2 + $0xb0] sm:$0xff] }
 0x339   :  { %6443 = vmatmul.mubr.bf16.gmra.mrb[28].mxu0 %v687_v25  ;;  %7799 = vmatmul.mubr.bf16.gmra.mrb[28].mxu1 %v687_v25  ;;  %v11960_v25 = vld [vmem:[#allocation5 + $0x16e0] ss:$16 sps:$4 sm:$0xff]  }
 0x33a   :  { %6482 = vmatpush1.bf16.msra.mxu0 %v11906_v28  ;;  %7838 = vmatpush1.bf16.msra.mxu1 %v11909_v29  ;;  %v353_v28 = vld [vmem:[#allocation2 + $0x760] sm:$0xff] }
 0x33b   :  { %6483 = vmatprep.subr.bf16.mxu0 %v11914_v30  ;;  %7839 = vmatprep.subr.bf16.mxu1 %v11917_v31  ;;  %v11968_v29 = vld [vmem:[#allocation5 + $0x1704] ss:$16 sps:$4 sm:$0xff]   ;;  %v11971_v30 = vld [vmem:[#allocation5 + $0x170c] ss:$16 sps:$4 sm:$0xff]   ;;  %v617_v31 = vpack.c.bf16 %v353_v28, %v329_v27 }
 0x33c   :  { %6485 = vmatprep.mubr.bf16.mxu0 %v522_v32  ;;  %7841 = vmatprep.mubr.bf16.mxu1 %v522_v32  ;;  %v378_v32 = vld [vmem:[#allocation2 + $0x828] sm:$0xff] }
 0x33d   :  { %v12014_v27 = vld [vmem:[#allocation8] ss:$8 sps:$4 sm:$0xff]  }
 0x33e   :  { %6484 = vmatpush1.bf16.msra.mxu0 %v11912_v33  ;;  %7840 = vmatpush1.bf16.msra.mxu1 %v11915_v34  ;;  %v402_v33 = vld [vmem:[#allocation2 + $0x8e8] sm:$0xff]  ;;  %v11966_v34 = vld [vmem:[#allocation5 + $0x1700] ss:$16 sps:$4 sm:$0xff]  }
 0x33f   :  { %6566 = vmatprep.subr.bf16.mxu0 %v11920_v37  ;;  %7922 = vmatprep.subr.bf16.mxu1 %v11923_v38  ;;  %v11977_v37 = vld [vmem:[#allocation5 + $0x172c] ss:$16 sps:$4 sm:$0xff]   ;;  %v642_v38 = vpack.c.bf16 %v402_v33, %v378_v32  ;;  %v211_v32 = vld [vmem:[#allocation2 + $0x2f0] sm:$0xff] }
 0x340   :  { %v12457_v28 = vld [vmem:[#allocation8 + $0x100] ss:$8 sps:$4 sm:$0xff]   ;;  %v236_v33 = vld [vmem:[#allocation2 + $0x3b8] sm:$0xff] }
 0x341   :  { %6486 = vmatmul.mubr.bf16.vlgmr.msra.gmra.mrb[0].mxu0 %v521_v39  ;;  %7842 = vmatmul.mubr.bf16.vlgmr.msra.gmra.mrb[0].mxu1 %v521_v39  ;;  %v11972_v39 = vld [vmem:[#allocation5 + $0x1720] ss:$16 sps:$4 sm:$0xff]  }
 0x342   :  { %6567 = vmatpush1.bf16.msra.mxu0 %v11918_v42  ;;  %7923 = vmatpush1.bf16.msra.mxu1 %v11921_v43  ;;  %v401_v42 = vld [vmem:[#allocation2 + $0x8e0] sm:$0xff] }
 0x343   :  { %6568 = vmatprep.subr.bf16.mxu0 %v11926_v44  ;;  %7924 = vmatprep.subr.bf16.mxu1 %v11929_v45  ;;  %v11980_v43 = vld [vmem:[#allocation5 + $0x1744] ss:$16 sps:$4 sm:$0xff]   ;;  %v11983_v44 = vld [vmem:[#allocation5 + $0x174c] ss:$16 sps:$4 sm:$0xff]   ;;  %v641_v45 = vpack.c.bf16 %v401_v42, %v377_v41 }
 0x344   :  { %6495 = vmatprep.mubr.bf16.mxu0 %v546_v46  ;;  %7851 = vmatprep.mubr.bf16.mxu1 %v546_v46  ;;  %v426_v46 = vld [vmem:[#allocation2 + $0x9a8] sm:$0xff] }
 0x345   :  { %v12020_v41 = vld [vmem:[#allocation8 + $0x20] ss:$8 sps:$4 sm:$0xff]  }
 0x346   :  { %6569 = vmatpush1.bf16.msra.mxu0 %v11924_v47  ;;  %7925 = vmatpush1.bf16.msra.mxu1 %v11927_v48  ;;  %v450_v47 = vld [vmem:[#allocation2 + $0xa68] sm:$0xff]  ;;  %v11978_v48 = vld [vmem:[#allocation5 + $0x1740] ss:$16 sps:$4 sm:$0xff]  }
 0x347   :  { %6570 = vmatprep.subr.bf16.mxu0 %v11932_v51  ;;  %7926 = vmatprep.subr.bf16.mxu1 %v11935_v52  ;;  %v11989_v51 = vld [vmem:[#allocation5 + $0x176c] ss:$16 sps:$4 sm:$0xff]   ;;  %v666_v52 = vpack.c.bf16 %v450_v47, %v426_v46  ;;  %v259_v46 = vld [vmem:[#allocation2 + $0x470] sm:$0xff] }
 0x348   :  { %v12469_v42 = vld [vmem:[#allocation8 + $0x120] ss:$8 sps:$4 sm:$0xff]   ;;  %v284_v47 = vld [vmem:[#allocation2 + $0x538] sm:$0xff] }
 0x349   :  { %6496 = vmatmul.mubr.bf16.gmra.mrb[4].mxu0 %v545_v53  ;;  %7852 = vmatmul.mubr.bf16.gmra.mrb[4].mxu1 %v545_v53  ;;  %v11984_v53 = vld [vmem:[#allocation5 + $0x1760] ss:$16 sps:$4 sm:$0xff]  }
 0x34a   :  { %6571 = vmatpush1.bf16.msra.mxu0 %v11930_v56  ;;  %7927 = vmatpush1.bf16.msra.mxu1 %v11933_v57  ;;  %v449_v56 = vld [vmem:[#allocation2 + $0xa60] sm:$0xff] }
 0x34b   :  { %6572 = vmatprep.subr.bf16.mxu0 %v11938_v58  ;;  %7928 = vmatprep.subr.bf16.mxu1 %v11941_v59  ;;  %v11992_v57 = vld [vmem:[#allocation5 + $0x1784] ss:$16 sps:$4 sm:$0xff]   ;;  %v11995_v58 = vld [vmem:[#allocation5 + $0x178c] ss:$16 sps:$4 sm:$0xff]   ;;  %v665_v59 = vpack.c.bf16 %v449_v56, %v425_v55 }
 0x34c   :  { %6505 = vmatprep.mubr.bf16.mxu0 %v570_v60  ;;  %7861 = vmatprep.mubr.bf16.mxu1 %v570_v60  ;;  %v474_v60 = vld [vmem:[#allocation2 + $0xb28] sm:$0xff] }
 0x34d   :  { %v12026_v55 = vld [vmem:[#allocation8 + $0x40] ss:$8 sps:$4 sm:$0xff]  }
 0x34e   :  { %6573 = vmatpush1.bf16.msra.mxu0 %v11936_v61  ;;  %7929 = vmatpush1.bf16.msra.mxu1 %v11939_v62  ;;  %v498_v61 = vld [vmem:[#allocation2 + $0xbe8] sm:$0xff]  ;;  %v11990_v62 = vld [vmem:[#allocation5 + $0x1780] ss:$16 sps:$4 sm:$0xff]  }
 0x34f   :  { %6574 = vmatprep.subr.bf16.mxu0 %v11944_v1  ;;  %7930 = vmatprep.subr.bf16.mxu1 %v11947_v2  ;;  %v12001_v1 = vld [vmem:[#allocation5 + $0x17ac] ss:$16 sps:$4 sm:$0xff]   ;;  %v690_v2 = vpack.c.bf16 %v498_v61, %v474_v60  ;;  %v307_v60 = vld [vmem:[#allocation2 + $0x5f0] sm:$0xff] }
 0x350   :  { %v12481_v56 = vld [vmem:[#allocation8 + $0x140] ss:$8 sps:$4 sm:$0xff]   ;;  %v332_v61 = vld [vmem:[#allocation2 + $0x6b8] sm:$0xff] }
 0x351   :  { %6506 = vmatmul.mubr.bf16.gmra.mrb[8].mxu0 %v569_v3  ;;  %7862 = vmatmul.mubr.bf16.gmra.mrb[8].mxu1 %v569_v3  ;;  %v11996_v3 = vld [vmem:[#allocation5 + $0x17a0] ss:$16 sps:$4 sm:$0xff]  }
 0x352   :  { %6575 = vmatpush1.bf16.msra.mxu0 %v11942_v6  ;;  %7931 = vmatpush1.bf16.msra.mxu1 %v11945_v7  ;;  %v497_v6 = vld [vmem:[#allocation2 + $0xbe0] sm:$0xff] }
 0x353   :  { %6576 = vmatprep.subr.bf16.mxu0 %v11950_v8  ;;  %7932 = vmatprep.subr.bf16.mxu1 %v11953_v9  ;;  %v12004_v7 = vld [vmem:[#allocation5 + $0x17c4] ss:$16 sps:$4 sm:$0xff]   ;;  %v12007_v8 = vld [vmem:[#allocation5 + $0x17cc] ss:$16 sps:$4 sm:$0xff]   ;;  %v689_v9 = vpack.c.bf16 %v497_v6, %v473_v5  ;;  %v12037_v5 = vld [vmem:[#allocation8 + $0x74] ss:$8 sps:$4 sm:$0xff]  }
 0x354   :  { %6515 = vmatprep.mubr.bf16.mxu0 %v594_v10  ;;  %7871 = vmatprep.mubr.bf16.mxu1 %v594_v10  ;;  %v140_v10 = vld [vmem:[#allocation2 + $0xb8] sm:$0xff]  ;;  %v331_v6 = vld [vmem:[#allocation2 + $0x6b0] sm:$0xff] }
 0x356   :  { %6577 = vmatpush1.bf16.msra.mxu0 %v11948_v11  ;;  %7933 = vmatpush1.bf16.msra.mxu1 %v11951_v12  ;;  %v164_v11 = vld [vmem:[#allocation2 + $0x178] sm:$0xff]  ;;  %v12002_v12 = vld [vmem:[#allocation5 + $0x17c0] ss:$16 sps:$4 sm:$0xff]  }
 0x357   :  { %6578 = vmatprep.subr.bf16.mxu0 %v11956_v15  ;;  %7934 = vmatprep.subr.bf16.mxu1 %v11959_v16  ;;  %v12013_v15 = vld [vmem:[#allocation5 + $0x17ec] ss:$16 sps:$4 sm:$0xff]   ;;  %v524_v16 = vpack.c.bf16 %v164_v11, %v140_v10  ;;  %v12040_v11 = vld [vmem:[#allocation8 + $0x84] ss:$8 sps:$4 sm:$0xff]  }
 0x358   :  { %v12035_v10 = vld [vmem:[#allocation8 + $0x70] ss:$8 sps:$4 sm:$0xff]  }
 0x359   :  { %6516 = vmatmul.mubr.bf16.gmra.mrb[12].mxu0 %v593_v17  ;;  %7872 = vmatmul.mubr.bf16.gmra.mrb[12].mxu1 %v593_v17  ;;  %v12008_v17 = vld [vmem:[#allocation5 + $0x17e0] ss:$16 sps:$4 sm:$0xff]  }
 0x35a   :  { %6579 = vmatpush1.bf16.msra.mxu0 %v11954_v20  ;;  %7935 = vmatpush1.bf16.msra.mxu1 %v11957_v21  ;;  %v163_v20 = vld [vmem:[#allocation2 + $0x170] sm:$0xff]  ;;  %v188_v21 = vld [vmem:[#allocation2 + $0x238] sm:$0xff] }
 0x35b   :  { %6580 = vmatprep.subr.bf16.mxu0 %v11962_v22  ;;  %7936 = vmatprep.subr.bf16.mxu1 %v11965_v23  ;;  %v212_v22 = vld [vmem:[#allocation2 + $0x2f8] sm:$0xff]  ;;  %v12016_v23 = vld [vmem:[#allocation8 + $0x4] ss:$8 sps:$4 sm:$0xff]  }
 0x35c   :  { %6525 = vmatprep.mubr.bf16.mxu0 %v618_v24  ;;  %7881 = vmatprep.mubr.bf16.mxu1 %v618_v24  ;;  %v12455_v24 = vld [vmem:[#allocation8 + $0x104] ss:$8 sps:$4 sm:$0xff]  }
 0x35e   :  { %6581 = vmatpush1.bf16.msra.mxu0 %v11960_v25  ;;  %7937 = vmatpush1.bf16.msra.mxu1 %v11963_v26  ;;  %v523_v25 = vpack.c.bf16 %v163_v20, %v139_v19  ;;  %v548_v26 = vpack.c.bf16 %v212_v22, %v188_v21  ;;  %v452_v19 = vld [vmem:[#allocation2 + $0xa78] sm:$0xff]  ;;  %v12052_v21 = vld [vmem:[#allocation8 + $0xa4] ss:$8 sps:$4 sm:$0xff]  }
 0x35f   :  { %6582 = vmatprep.subr.bf16.mxu0 %v11968_v29  ;;  %7938 = vmatprep.subr.bf16.mxu1 %v11971_v30  ;;  %v12019_v29 = vld [vmem:[#allocation8 + $0x14] ss:$8 sps:$4 sm:$0xff]   ;;  %v12044_v20 = vld [vmem:[#allocation8 + $0x90] ss:$8 sps:$4 sm:$0xff]  }
 0x360   :  { %v12460_v30 = vld [vmem:[#allocation8 + $0x114] ss:$8 sps:$4 sm:$0xff]  }
 0x361   :  { %6526 = vmatmul.mubr.bf16.gmra.mrb[16].mxu0 %v617_v31  ;;  %7882 = vmatmul.mubr.bf16.gmra.mrb[16].mxu1 %v617_v31  ;;  %v187_v31 = vld [vmem:[#allocation2 + $0x230] sm:$0xff] }
 0x362   :  { %6583 = vmatpush1.bf16.msra.mxu0 %v11966_v34  ;;  %7939 = vmatpush1.bf16.msra.mxu1 %v11969_v35  ;;  %v260_v34 = vld [vmem:[#allocation2 + $0x478] sm:$0xff] }
 0x363   :  { %6584 = vmatprep.subr.bf16.mxu0 %v11974_v36  ;;  %7940 = vmatprep.subr.bf16.mxu1 %v11977_v37  ;;  %v12017_v35 = vld [vmem:[#allocation8 + $0x10] ss:$8 sps:$4 sm:$0xff]   ;;  %v12022_v37 = vld [vmem:[#allocation8 + $0x24] ss:$8 sps:$4 sm:$0xff]  }
 0x364   :  { %6535 = vmatprep.mubr.bf16.mxu0 %v642_v38  ;;  %7891 = vmatprep.mubr.bf16.mxu1 %v642_v38  ;;  %v12463_v36 = vld [vmem:[#allocation8 + $0x110] ss:$8 sps:$4 sm:$0xff]   ;;  %v12466_v38 = vld [vmem:[#allocation8 + $0x124] ss:$8 sps:$4 sm:$0xff]  }
 0x366   :  { %6585 = vmatpush1.bf16.msra.mxu0 %v11972_v39  ;;  %7941 = vmatpush1.bf16.msra.mxu1 %v11975_v40  ;;  %v547_v39 = vpack.c.bf16 %v211_v32, %v187_v31  ;;  %v572_v40 = vpack.c.bf16 %v260_v34, %v236_v33  ;;  %v476_v31 = vld [vmem:[#allocation2 + $0xb38] sm:$0xff]  ;;  %v12064_v34 = vld [vmem:[#allocation8 + $0xc4] ss:$8 sps:$4 sm:$0xff]  }
 0x367   :  { %6586 = vmatprep.subr.bf16.mxu0 %v11980_v43  ;;  %7942 = vmatprep.subr.bf16.mxu1 %v11983_v44  ;;  %v12025_v43 = vld [vmem:[#allocation8 + $0x34] ss:$8 sps:$4 sm:$0xff]   ;;  %v12056_v33 = vld [vmem:[#allocation8 + $0xb0] ss:$8 sps:$4 sm:$0xff]  }
 0x368   :  { %v12472_v44 = vld [vmem:[#allocation8 + $0x134] ss:$8 sps:$4 sm:$0xff]  }
 0x369   :  { %6536 = vmatmul.mubr.bf16.gmra.mrb[20].mxu0 %v641_v45  ;;  %7892 = vmatmul.mubr.bf16.gmra.mrb[20].mxu1 %v641_v45  ;;  %v235_v45 = vld [vmem:[#allocation2 + $0x3b0] sm:$0xff]  ;;  %v500_v32 = vld [vmem:[#allocation2 + $0xbf8] sm:$0xff] }
 0x36a   :  { %6587 = vmatpush1.bf16.msra.mxu0 %v11978_v48  ;;  %7943 = vmatpush1.bf16.msra.mxu1 %v11981_v49  ;;  %v308_v48 = vld [vmem:[#allocation2 + $0x5f8] sm:$0xff] }
 0x36b   :  { %6588 = vmatprep.subr.bf16.mxu0 %v11986_v50  ;;  %7944 = vmatprep.subr.bf16.mxu1 %v11989_v51  ;;  %v12023_v49 = vld [vmem:[#allocation8 + $0x30] ss:$8 sps:$4 sm:$0xff]   ;;  %v12028_v51 = vld [vmem:[#allocation8 + $0x44] ss:$8 sps:$4 sm:$0xff]  }
 0x36c   :  { %6545 = vmatprep.mubr.bf16.mxu0 %v666_v52  ;;  %7901 = vmatprep.mubr.bf16.mxu1 %v666_v52  ;;  %v12475_v50 = vld [vmem:[#allocation8 + $0x130] ss:$8 sps:$4 sm:$0xff]   ;;  %v12478_v52 = vld [vmem:[#allocation8 + $0x144] ss:$8 sps:$4 sm:$0xff]  }
 0x36e   :  { %6589 = vmatpush1.bf16.msra.mxu0 %v11984_v53  ;;  %7945 = vmatpush1.bf16.msra.mxu1 %v11987_v54  ;;  %v571_v53 = vpack.c.bf16 %v259_v46, %v235_v45  ;;  %v596_v54 = vpack.c.bf16 %v308_v48, %v284_v47  ;;  %v12068_v45 = vld [vmem:[#allocation8 + $0xd0] ss:$8 sps:$4 sm:$0xff]   ;;  %v12076_v47 = vld [vmem:[#allocation8 + $0xe4] ss:$8 sps:$4 sm:$0xff]  }
 0x36f   :  { %6590 = vmatprep.subr.bf16.mxu0 %v11992_v57  ;;  %7946 = vmatprep.subr.bf16.mxu1 %v11995_v58  ;;  %v12031_v57 = vld [vmem:[#allocation8 + $0x54] ss:$8 sps:$4 sm:$0xff]   ;;  %v12491_v48 = vld [vmem:[#allocation8 + $0x164] ss:$8 sps:$4 sm:$0xff]  }
 0x370   :  { %v12484_v58 = vld [vmem:[#allocation8 + $0x154] ss:$8 sps:$4 sm:$0xff]  }
 0x371   :  { %6546 = vmatmul.mubr.bf16.gmra.mrb[24].mxu0 %v665_v59  ;;  %7902 = vmatmul.mubr.bf16.gmra.mrb[24].mxu1 %v665_v59  ;;  %v283_v59 = vld [vmem:[#allocation2 + $0x530] sm:$0xff] }
 0x372   :  { %6591 = vmatpush1.bf16.msra.mxu0 %v11990_v62  ;;  %7947 = vmatpush1.bf16.msra.mxu1 %v11993_v63  ;;  %v356_v62 = vld [vmem:[#allocation2 + $0x778] sm:$0xff] }
 0x373   :  { %6592 = vmatprep.subr.bf16.mxu0 %v11998_v0  ;;  %7948 = vmatprep.subr.bf16.mxu1 %v12001_v1  ;;  %v12029_v63 = vld [vmem:[#allocation8 + $0x50] ss:$8 sps:$4 sm:$0xff]   ;;  %v12034_v1 = vld [vmem:[#allocation8 + $0x64] ss:$8 sps:$4 sm:$0xff]  }
 0x374   :  { %6555 = vmatprep.mubr.bf16.mxu0 %v690_v2  ;;  %7911 = vmatprep.mubr.bf16.mxu1 %v690_v2  ;;  %v12487_v0 = vld [vmem:[#allocation8 + $0x150] ss:$8 sps:$4 sm:$0xff]   ;;  %v595_v2 = vpack.c.bf16 %v307_v60, %v283_v59  ;;  %v12504_v59 = vld [vmem:[#allocation8 + $0x184] ss:$8 sps:$4 sm:$0xff]   ;;  %v12506_v60 = vld [vmem:[#allocation8 + $0x180] ss:$8 sps:$4 sm:$0xff]  }
 0x376   :  { %6593 = vmatpush1.bf16.msra.mxu0 %v11996_v3  ;;  %7949 = vmatpush1.bf16.msra.mxu1 %v11999_v4  ;;  %v620_v3 = vpack.c.bf16 %v356_v62, %v332_v61  ;;  %v12032_v4 = vld [vmem:[#allocation8 + $0x60] ss:$8 sps:$4 sm:$0xff]   ;;  %v12510_v61 = vld [vmem:[#allocation8 + $0x194] ss:$8 sps:$4 sm:$0xff]   ;;  %v12512_v62 = vld [vmem:[#allocation8 + $0x190] ss:$8 sps:$4 sm:$0xff]  }
 0x377   :  { %6594 = vmatprep.subr.bf16.mxu0 %v12004_v7  ;;  %7950 = vmatprep.subr.bf16.mxu1 %v12007_v8  ;;  %v355_v7 = vld [vmem:[#allocation2 + $0x770] sm:$0xff]  ;;  %v380_v8 = vld [vmem:[#allocation2 + $0x838] sm:$0xff] }
 0x379   :  { %6556 = vmatmul.mubr.bf16.gmra.mrb[28].mxu0 %v689_v9  ;;  %7912 = vmatmul.mubr.bf16.gmra.mrb[28].mxu1 %v689_v9  ;;  %v404_v9 = vld [vmem:[#allocation2 + $0x8f8] sm:$0xff] }
 0x37a   :  { %6595 = vmatpush1.bf16.msra.mxu0 %v12002_v12  ;;  %7951 = vmatpush1.bf16.msra.mxu1 %v12005_v13  ;;  %v619_v12 = vpack.c.bf16 %v355_v7, %v331_v6  ;;  %v644_v13 = vpack.c.bf16 %v404_v9, %v380_v8  ;;  %v12536_v6 = vld [vmem:[#allocation8 + $0x1d0] ss:$8 sps:$4 sm:$0xff]   ;;  %v12540_v7 = vld [vmem:[#allocation8 + $0x1e4] ss:$8 sps:$4 sm:$0xff]   ;;  %v12542_v8 = vld [vmem:[#allocation8 + $0x1e0] ss:$8 sps:$4 sm:$0xff]  }
 0x37b   :  { %6596 = vmatprep.subr.bf16.mxu0 %v12010_v14  ;;  %7952 = vmatprep.subr.bf16.mxu1 %v12013_v15  ;;  %v12038_v14 = vld [vmem:[#allocation8 + $0x80] ss:$8 sps:$4 sm:$0xff]   ;;  %v12046_v15 = vld [vmem:[#allocation8 + $0x94] ss:$8 sps:$4 sm:$0xff]  }
 0x37c   :  { %6598 = vmatprep.mubr.bf16.mxu0 %v524_v16  ;;  %7954 = vmatprep.mubr.bf16.mxu1 %v524_v16  ;;  %v379_v16 = vld [vmem:[#allocation2 + $0x830] sm:$0xff]  ;;  %v12546_v9 = vld [vmem:[#allocation8 + $0x1f4] ss:$8 sps:$4 sm:$0xff]  }
 0x37e   :  { %6597 = vmatpush1.bf16.msra.mxu0 %v12008_v17  ;;  %7953 = vmatpush1.bf16.msra.mxu1 %v12011_v18  ;;  %v403_v17 = vld [vmem:[#allocation2 + $0x8f0] sm:$0xff]  ;;  %v428_v18 = vld [vmem:[#allocation2 + $0x9b8] sm:$0xff] }
 0x37f   :  { %8527 = vmatprep.subr.bf16.mxu0 %v12016_v23  ;;  %9982 = vmatprep.subr.bf16.mxu1 %v12455_v24  ;;  %v643_v22 = vpack.c.bf16 %v403_v17, %v379_v16  ;;  %v668_v23 = vpack.c.bf16 %v452_v19, %v428_v18 }
 0x381   :  { %6599 = vmatmul.mubr.bf16.vlgmr.msra.gmra.mrb[0].mxu0 %v523_v25  ;;  %7955 = vmatmul.mubr.bf16.vlgmr.msra.gmra.mrb[0].mxu1 %v523_v25  ;;  %v12050_v25 = vld [vmem:[#allocation8 + $0xa0] ss:$8 sps:$4 sm:$0xff]  }
 0x382   :  { %6608 = vmatprep.mubr.bf16.mxu0 %v548_v26  ;;  %7964 = vmatprep.mubr.bf16.mxu1 %v548_v26  ;;  %v12058_v26 = vld [vmem:[#allocation8 + $0xb4] ss:$8 sps:$4 sm:$0xff]  }
 0x383   :  { %8528 = vmatpush1.bf16.msra.mxu0 %v12014_v27  ;;  %9998 = vmatpush1.bf16.msra.mxu1 %v12457_v28  ;;  %v427_v27 = vld [vmem:[#allocation2 + $0x9b0] sm:$0xff] }
 0x384   :  { %8529 = vmatprep.subr.bf16.mxu0 %v12019_v29  ;;  %9983 = vmatprep.subr.bf16.mxu1 %v12460_v30  ;;  %v451_v29 = vld [vmem:[#allocation2 + $0xa70] sm:$0xff] }
 0x387   :  { %8530 = vmatpush1.bf16.msra.mxu0 %v12017_v35  ;;  %9999 = vmatpush1.bf16.msra.mxu1 %v12463_v36  ;;  %v667_v35 = vpack.c.bf16 %v451_v29, %v427_v27 }
 0x388   :  { %8531 = vmatprep.subr.bf16.mxu0 %v12022_v37  ;;  %9984 = vmatprep.subr.bf16.mxu1 %v12466_v38  ;;  %v692_v37 = vpack.c.bf16 %v500_v32, %v476_v31 }
 0x389   :  { %6609 = vmatmul.mubr.bf16.gmra.mrb[4].mxu0 %v547_v39  ;;  %7965 = vmatmul.mubr.bf16.gmra.mrb[4].mxu1 %v547_v39  ;;  %v12062_v39 = vld [vmem:[#allocation8 + $0xc0] ss:$8 sps:$4 sm:$0xff]  }
 0x38a   :  { %6618 = vmatprep.mubr.bf16.mxu0 %v572_v40  ;;  %7974 = vmatprep.mubr.bf16.mxu1 %v572_v40  ;;  %v12070_v40 = vld [vmem:[#allocation8 + $0xd4] ss:$8 sps:$4 sm:$0xff]  }
 0x38b   :  { %8532 = vmatpush1.bf16.msra.mxu0 %v12020_v41  ;;  %10000 = vmatpush1.bf16.msra.mxu1 %v12469_v42  ;;  %v475_v41 = vld [vmem:[#allocation2 + $0xb30] sm:$0xff] }
 0x38c   :  { %8533 = vmatprep.subr.bf16.mxu0 %v12025_v43  ;;  %9985 = vmatprep.subr.bf16.mxu1 %v12472_v44  ;;  %v499_v43 = vld [vmem:[#allocation2 + $0xbf0] sm:$0xff] }
 0x38d   :  { %v691_v46 = vpack.c.bf16 %v499_v43, %v475_v41 }
 0x38f   :  { %8534 = vmatpush1.bf16.msra.mxu0 %v12023_v49  ;;  %10001 = vmatpush1.bf16.msra.mxu1 %v12475_v50  ;;  %v12074_v49 = vld [vmem:[#allocation8 + $0xe0] ss:$8 sps:$4 sm:$0xff]  }
 0x390   :  { %8535 = vmatprep.subr.bf16.mxu0 %v12028_v51  ;;  %9986 = vmatprep.subr.bf16.mxu1 %v12478_v52  ;;  %v12493_v51 = vld [vmem:[#allocation8 + $0x160] ss:$8 sps:$4 sm:$0xff]  }
 0x391   :  { %6619 = vmatmul.mubr.bf16.gmra.mrb[8].mxu0 %v571_v53  ;;  %7975 = vmatmul.mubr.bf16.gmra.mrb[8].mxu1 %v571_v53  ;;  %v12082_v53 = vld [vmem:[#allocation8 + $0xf4] ss:$8 sps:$4 sm:$0xff]  }
 0x392   :  { %6628 = vmatprep.mubr.bf16.mxu0 %v596_v54  ;;  %7984 = vmatprep.mubr.bf16.mxu1 %v596_v54  ;;  %v12497_v54 = vld [vmem:[#allocation8 + $0x174] ss:$8 sps:$4 sm:$0xff]  }
 0x393   :  { %8536 = vmatpush1.bf16.msra.mxu0 %v12026_v55  ;;  %10002 = vmatpush1.bf16.msra.mxu1 %v12481_v56  ;;  %v12080_v55 = vld [vmem:[#allocation8 + $0xf0] ss:$8 sps:$4 sm:$0xff]  }
 0x394   :  { %8537 = vmatprep.subr.bf16.mxu0 %v12031_v57  ;;  %9987 = vmatprep.subr.bf16.mxu1 %v12484_v58  ;;  %v12499_v57 = vld [vmem:[#allocation8 + $0x170] ss:$8 sps:$4 sm:$0xff]  }
 0x397   :  { %8538 = vmatpush1.bf16.msra.mxu0 %v12029_v63  ;;  %10003 = vmatpush1.bf16.msra.mxu1 %v12487_v0  ;;  %v12516_v63 = vld [vmem:[#allocation8 + $0x1a4] ss:$8 sps:$4 sm:$0xff]  }
 0x398   :  { %8539 = vmatprep.subr.bf16.mxu0 %v12034_v1  ;;  %9988 = vmatprep.subr.bf16.mxu1 %v12491_v48  ;;  %v12518_v1 = vld [vmem:[#allocation8 + $0x1a0] ss:$8 sps:$4 sm:$0xff]  }
 0x399   :  { %6629 = vmatmul.mubr.bf16.gmra.mrb[12].mxu0 %v595_v2  ;;  %7985 = vmatmul.mubr.bf16.gmra.mrb[12].mxu1 %v595_v2  ;;  %v12524_v2 = vld [vmem:[#allocation8 + $0x1b0] ss:$8 sps:$4 sm:$0xff]  }
 0x39a   :  { %6638 = vmatprep.mubr.bf16.mxu0 %v620_v3  ;;  %7994 = vmatprep.mubr.bf16.mxu1 %v620_v3  ;;  %v12528_v3 = vld [vmem:[#allocation8 + $0x1c4] ss:$8 sps:$4 sm:$0xff]  }
 0x39b   :  { %8540 = vmatpush1.bf16.msra.mxu0 %v12032_v4  ;;  %10004 = vmatpush1.bf16.msra.mxu1 %v12493_v51  ;;  %v12530_v4 = vld [vmem:[#allocation8 + $0x1c0] ss:$8 sps:$4 sm:$0xff]  }
 0x39c   :  { %8541 = vmatprep.subr.bf16.mxu0 %v12037_v5  ;;  %9989 = vmatprep.subr.bf16.mxu1 %v12497_v54  ;;  %v12534_v5 = vld [vmem:[#allocation8 + $0x1d4] ss:$8 sps:$4 sm:$0xff]  }
 0x39f   :  { %8542 = vmatpush1.bf16.msra.mxu0 %v12035_v10  ;;  %10005 = vmatpush1.bf16.msra.mxu1 %v12499_v57  ;;  %v12548_v10 = vld [vmem:[#allocation8 + $0x1f0] ss:$8 sps:$4 sm:$0xff]  }
 0x3a0   :  { %8543 = vmatprep.subr.bf16.mxu0 %v12040_v11  ;;  %9990 = vmatprep.subr.bf16.mxu1 %v12504_v59  ;;  %v1463_v11 = vlaneseq }
 0x3a1   :  { %6639 = vmatmul.mubr.bf16.gmra.mrb[16].mxu0 %v619_v12  ;;  %7995 = vmatmul.mubr.bf16.gmra.mrb[16].mxu1 %v619_v12 }
 0x3a2   :  { %6648 = vmatprep.mubr.bf16.mxu0 %v644_v13  ;;  %8004 = vmatprep.mubr.bf16.mxu1 %v644_v13  ;;  %v12552_v12 = vshrl.u32 %v1463_v11, 7 }
 0x3a3   :  { %8544 = vmatpush1.bf16.msra.mxu0 %v12038_v14  ;;  %10006 = vmatpush1.bf16.msra.mxu1 %v12506_v60 }
 0x3a4   :  { %8545 = vmatprep.subr.bf16.mxu0 %v12046_v15  ;;  %9991 = vmatprep.subr.bf16.mxu1 %v12510_v61  ;;  %v1465_v13 = vsub.s32 0, %v12552_v12  ;;  %v1473_v14 = vsub.s32 2, %v12552_v12  ;;  %v1461_v15 = vld [vmem:[#allocation7] sm:$0xf]  ;;  %v1469_v16 = vsub.s32 1, %v12552_v12  ;;  %v1477_v17 = vsub.s32 3, %v12552_v12 }
 0x3a6   :  { %v12560_v18 = vrot.slane %v1461_v15, %v1465_v13  ;;  %v12562_v19 = vrot.slane %v1461_v15, %v1473_v14 }
 0x3a7   :  { %8546 = vmatpush1.bf16.msra.mxu0 %v12044_v20  ;;  %10007 = vmatpush1.bf16.msra.mxu1 %v12512_v62  ;;  %v12566_v20 = vrot.slane %v1461_v15, %v1469_v16 }
 0x3a8   :  { %8547 = vmatprep.subr.bf16.mxu0 %v12052_v21  ;;  %9992 = vmatprep.subr.bf16.mxu1 %v12516_v63  ;;  %v12568_v21 = vrot.slane %v1461_v15, %v1477_v17 }
 0x3a9   :  { %6649 = vmatmul.mubr.bf16.gmra.mrb[20].mxu0 %v643_v22  ;;  %8005 = vmatmul.mubr.bf16.gmra.mrb[20].mxu1 %v643_v22 }
 0x3aa   :  { %6658 = vmatprep.mubr.bf16.mxu0 %v668_v23  ;;  %8014 = vmatprep.mubr.bf16.mxu1 %v668_v23 }
 0x3ab   :  { %8548 = vmatpush1.bf16.msra.mxu0 %v12050_v25  ;;  %10008 = vmatpush1.bf16.msra.mxu1 %v12518_v1 }
 0x3ac   :  { %8549 = vmatprep.subr.bf16.mxu0 %v12058_v26 }
 0x3af   :  { %8550 = vmatpush1.bf16.msra.mxu0 %v12056_v33 }
 0x3b0   :  { %8551 = vmatprep.subr.bf16.mxu0 %v12064_v34 }
 0x3b1   :  { %6659 = vmatmul.mubr.bf16.gmra.mrb[24].mxu0 %v667_v35  ;;  %8015 = vmatmul.mubr.bf16.gmra.mrb[24].mxu1 %v667_v35 }
 0x3b2   :  { %6668 = vmatprep.mubr.bf16.mxu0 %v692_v37  ;;  %8024 = vmatprep.mubr.bf16.mxu1 %v692_v37 }
 0x3b3   :  { %8552 = vmatpush1.bf16.msra.mxu0 %v12062_v39 }
 0x3b4   :  { %8553 = vmatprep.subr.bf16.mxu0 %v12070_v40 }
 0x3b7   :  { %8554 = vmatpush1.bf16.msra.mxu0 %v12068_v45 }
 0x3b8   :  { %8555 = vmatprep.subr.bf16.mxu0 %v12076_v47 }
 0x3b9   :  { %6669 = vmatmul.mubr.bf16.gmra.mrb[28].mxu0 %v691_v46  ;;  %8025 = vmatmul.mubr.bf16.gmra.mrb[28].mxu1 %v691_v46 }
 0x3bb   :  { %8556 = vmatpush1.bf16.msra.mxu0 %v12074_v49 }
 0x3bc   :  { %8557 = vmatprep.subr.bf16.mxu0 %v12082_v53 }
 0x3bf   :  { %8558 = vmatpush1.bf16.msra.mxu0 %v12080_v55 }
 0x3c0   :  { %8640 = vmatprep.subr.bf16.mxu0 %v12455_v24  ;;  %v12522_v24 = vld [vmem:[#allocation8 + $0x1b4] ss:$8 sps:$4 sm:$0xff]  }
 0x3c1   :  { %9993 = vmatprep.subr.bf16.mxu1 %v12522_v24 }
 0x3c2   :  { %10009 = vmatpush1.bf16.msra.mxu1 %v12524_v2 }
 0x3c3   :  { %9994 = vmatprep.subr.bf16.mxu1 %v12528_v3 }
 0x3c6   :  { %10010 = vmatpush1.bf16.msra.mxu1 %v12530_v4 }
 0x3c7   :  { %9995 = vmatprep.subr.bf16.mxu1 %v12534_v5 }
 0x3ca   :  { %10011 = vmatpush1.bf16.msra.mxu1 %v12536_v6 }
 0x3cb   :  { %9996 = vmatprep.subr.bf16.mxu1 %v12540_v7 }
 0x3ce   :  { %10012 = vmatpush1.bf16.msra.mxu1 %v12542_v8 }
 0x3cf   :  { %9997 = vmatprep.subr.bf16.mxu1 %v12546_v9 }
 0x3d2   :  { %10013 = vmatpush1.bf16.msra.mxu1 %v12548_v10 }
 0x454   :  { %v6600_v22 = vpop.f32.mrb[0].mxu0  ;;  %v7956_v23 = vpop.f32.mrb[0].mxu1 }
 0x455   :  { %v10014_v25 = vadd.f32 %v6600_v22, %v12560_v18  ;;  %v10046_v26 = vadd.f32 %v7956_v23, %v12562_v19  ;;  %v6602_v27 = vpop.f32.mrb[1].mxu0  ;;  %v7958_v29 = vpop.f32.mrb[1].mxu1 }
 0x456   :  { %v10015_v31 = vadd.f32 %v6602_v27, %v12566_v20  ;;  %v10047_v32 = vadd.f32 %v7958_v29, %v12568_v21  ;;  %v6604_v33 = vpop.f32.mrb[2].mxu0  ;;  %v7960_v34 = vpop.f32.mrb[2].mxu1 }
 0x457   :  { %v10016_v35 = vadd.f32 %v6604_v33, %v12560_v18  ;;  %v10048_v37 = vadd.f32 %v7960_v34, %v12562_v19  ;;  %v6606_v39 = vpop.f32.mrb[3].mxu0  ;;  %v7962_v40 = vpop.f32.mrb[3].mxu1  ;;  %v8035_v45 = vmax.f32 %v10014_v25, 0.0  ;;  %v8037_v46 = vmax.f32 %v10046_v26, 0.0 }
 0x458   :  { %v10017_v41 = vadd.f32 %v6606_v39, %v12566_v20  ;;  %v10049_v43 = vadd.f32 %v7962_v40, %v12568_v21  ;;  %v8036_v53 = vmax.f32 %v10015_v31, 0.0  ;;  %v8038_v55 = vmax.f32 %v10047_v32, 0.0 }
 0x459   :  { %v8039_v47 = vmax.f32 %v10016_v35, 0.0  ;;  %v8041_v49 = vmax.f32 %v10048_v37, 0.0 }
 0x45a   :  { %v8040_v11 = vmax.f32 %v10017_v41, 0.0  ;;  %v8042_v14 = vmax.f32 %v10049_v43, 0.0 }
 0x45b   :  { %v8099_v15 = vpack.c.bf16 %v8039_v47, %v8035_v45  ;;  %v12578_v17 = vpack.c.bf16 %v8041_v49, %v8037_v46 }
 0x45c   :  { %v8100_v22 = vpack.c.bf16 %v8040_v11, %v8036_v53  ;;  %v12580_v23 = vpack.c.bf16 %v8042_v14, %v8038_v55  ;;  %v6610_v27 = vpop.f32.mrb[4].mxu0  ;;  %v7966_v29 = vpop.f32.mrb[4].mxu1 }
 0x45d   :  { %v10018_v33 = vadd.f32 %v6610_v27, %v12560_v18  ;;  %v10050_v34 = vadd.f32 %v7966_v29, %v12562_v19  ;;  %v6612_v25 = vpop.f32.mrb[5].mxu0  ;;  %v7968_v26 = vpop.f32.mrb[5].mxu1 }
 0x45e   :  { %v10019_v35 = vadd.f32 %v6612_v25, %v12566_v20  ;;  %v10051_v31 = vadd.f32 %v7968_v26, %v12568_v21  ;;  %v6614_v32 = vpop.f32.mrb[6].mxu0  ;;  %v7970_v37 = vpop.f32.mrb[6].mxu1  ;;  %8559 = vmatprep.mubr.bf16.mxu0 %v8100_v22 }
 0x45f   :  { %v10020_v39 = vadd.f32 %v6614_v32, %v12560_v18  ;;  %v10052_v40 = vadd.f32 %v7970_v37, %v12562_v19  ;;  %v6616_v41 = vpop.f32.mrb[7].mxu0  ;;  %v7972_v43 = vpop.f32.mrb[7].mxu1  ;;  %8560 = vmatmul.mubr.bf16.vlgmr.msra.gmra.mrb[32].mxu0 %v8099_v15  ;;  %v8043_v47 = vmax.f32 %v10018_v33, 0.0  ;;  %v8045_v49 = vmax.f32 %v10050_v34, 0.0 }
 0x460   :  { %v10021_v45 = vadd.f32 %v6616_v41, %v12566_v20  ;;  %v10053_v46 = vadd.f32 %v7972_v43, %v12568_v21  ;;  %8641 = vmatpush1.bf16.msra.mxu0 %v12457_v28  ;;  %v8044_v11 = vmax.f32 %v10019_v35, 0.0  ;;  %v8046_v14 = vmax.f32 %v10051_v31, 0.0 }
 0x461   :  { %v8047_v53 = vmax.f32 %v10020_v39, 0.0  ;;  %v8049_v55 = vmax.f32 %v10052_v40, 0.0  ;;  %8642 = vmatprep.subr.bf16.mxu0 %v12460_v30 }
 0x462   :  { %v8048_v22 = vmax.f32 %v10021_v45, 0.0  ;;  %v8050_v27 = vmax.f32 %v10053_v46, 0.0 }
 0x463   :  { %v8103_v29 = vpack.c.bf16 %v8047_v53, %v8043_v47  ;;  %v12592_v25 = vpack.c.bf16 %v8049_v55, %v8045_v49 }
 0x464   :  { %v8104_v15 = vpack.c.bf16 %v8048_v22, %v8044_v11  ;;  %v12594_v26 = vpack.c.bf16 %v8050_v27, %v8046_v14  ;;  %v6620_v32 = vpop.f32.mrb[8].mxu0  ;;  %v7976_v37 = vpop.f32.mrb[8].mxu1  ;;  %8643 = vmatpush1.bf16.msra.mxu0 %v12463_v36 }
 0x465   :  { %v10022_v28 = vadd.f32 %v6620_v32, %v12560_v18  ;;  %v10054_v33 = vadd.f32 %v7976_v37, %v12562_v19  ;;  %v6622_v34 = vpop.f32.mrb[9].mxu0  ;;  %v7978_v30 = vpop.f32.mrb[9].mxu1  ;;  %8644 = vmatprep.subr.bf16.mxu0 %v12466_v38 }
 0x466   :  { %v10023_v35 = vadd.f32 %v6622_v34, %v12566_v20  ;;  %v10055_v31 = vadd.f32 %v7978_v30, %v12568_v21  ;;  %v6624_v39 = vpop.f32.mrb[10].mxu0  ;;  %v7980_v40 = vpop.f32.mrb[10].mxu1  ;;  %8569 = vmatprep.mubr.bf16.mxu0 %v8104_v15 }
 0x467   :  { %v10024_v41 = vadd.f32 %v6624_v39, %v12560_v18  ;;  %v10056_v43 = vadd.f32 %v7980_v40, %v12562_v19  ;;  %v6626_v36 = vpop.f32.mrb[11].mxu0  ;;  %v7982_v45 = vpop.f32.mrb[11].mxu1  ;;  %8570 = vmatmul.mubr.bf16.gmra.mrb[36].mxu0 %v8103_v29  ;;  %v8051_v38 = vmax.f32 %v10022_v28, 0.0  ;;  %v8053_v49 = vmax.f32 %v10054_v33, 0.0 }
 0x468   :  { %v10025_v46 = vadd.f32 %v6626_v36, %v12566_v20  ;;  %v10057_v47 = vadd.f32 %v7982_v45, %v12568_v21  ;;  %8645 = vmatpush1.bf16.msra.mxu0 %v12469_v42  ;;  %v8052_v11 = vmax.f32 %v10023_v35, 0.0  ;;  %v8054_v14 = vmax.f32 %v10055_v31, 0.0 }
 0x469   :  { %v8055_v53 = vmax.f32 %v10024_v41, 0.0  ;;  %v8057_v55 = vmax.f32 %v10056_v43, 0.0  ;;  %8646 = vmatprep.subr.bf16.mxu0 %v12472_v44 }
 0x46a   :  { %v8056_v22 = vmax.f32 %v10025_v46, 0.0  ;;  %v8058_v27 = vmax.f32 %v10057_v47, 0.0 }
 0x46b   :  { %v8107_v15 = vpack.c.bf16 %v8055_v53, %v8051_v38  ;;  %v12608_v32 = vpack.c.bf16 %v8057_v55, %v8053_v49 }
 0x46c   :  { %v8108_v29 = vpack.c.bf16 %v8056_v22, %v8052_v11  ;;  %v12610_v37 = vpack.c.bf16 %v8058_v27, %v8054_v14  ;;  %v6630_v34 = vpop.f32.mrb[12].mxu0  ;;  %v7986_v30 = vpop.f32.mrb[12].mxu1  ;;  %8647 = vmatpush1.bf16.msra.mxu0 %v12475_v50 }
 0x46d   :  { %v10026_v42 = vadd.f32 %v6630_v34, %v12560_v18  ;;  %v10058_v28 = vadd.f32 %v7986_v30, %v12562_v19  ;;  %v6632_v33 = vpop.f32.mrb[13].mxu0  ;;  %v7988_v44 = vpop.f32.mrb[13].mxu1  ;;  %8648 = vmatprep.subr.bf16.mxu0 %v12478_v52 }
 0x46e   :  { %v10027_v35 = vadd.f32 %v6632_v33, %v12566_v20  ;;  %v10059_v31 = vadd.f32 %v7988_v44, %v12568_v21  ;;  %v6634_v39 = vpop.f32.mrb[14].mxu0  ;;  %v7990_v40 = vpop.f32.mrb[14].mxu1  ;;  %8579 = vmatprep.mubr.bf16.mxu0 %v8108_v29 }
 0x46f   :  { %v10028_v41 = vadd.f32 %v6634_v39, %v12560_v18  ;;  %v10060_v43 = vadd.f32 %v7990_v40, %v12562_v19  ;;  %v6636_v50 = vpop.f32.mrb[15].mxu0  ;;  %v7992_v36 = vpop.f32.mrb[15].mxu1  ;;  %8580 = vmatmul.mubr.bf16.gmra.mrb[40].mxu0 %v8107_v15  ;;  %v8059_v52 = vmax.f32 %v10026_v42, 0.0  ;;  %v8061_v47 = vmax.f32 %v10058_v28, 0.0 }
 0x470   :  { %v10029_v45 = vadd.f32 %v6636_v50, %v12566_v20  ;;  %v10061_v46 = vadd.f32 %v7992_v36, %v12568_v21  ;;  %8649 = vmatpush1.bf16.msra.mxu0 %v12481_v56  ;;  %v8060_v53 = vmax.f32 %v10027_v35, 0.0  ;;  %v8062_v55 = vmax.f32 %v10059_v31, 0.0 }
 0x471   :  { %v8063_v38 = vmax.f32 %v10028_v41, 0.0  ;;  %v8065_v49 = vmax.f32 %v10060_v43, 0.0  ;;  %8650 = vmatprep.subr.bf16.mxu0 %v12484_v58 }
 0x472   :  { %v8064_v11 = vmax.f32 %v10029_v45, 0.0  ;;  %v8066_v14 = vmax.f32 %v10061_v46, 0.0 }
 0x473   :  { %v8111_v22 = vpack.c.bf16 %v8063_v38, %v8059_v52  ;;  %v12624_v27 = vpack.c.bf16 %v8065_v49, %v8061_v47 }
 0x474   :  { %v8112_v15 = vpack.c.bf16 %v8064_v11, %v8060_v53  ;;  %v12626_v29 = vpack.c.bf16 %v8066_v14, %v8062_v55  ;;  %v6640_v34 = vpop.f32.mrb[16].mxu0  ;;  %v7996_v30 = vpop.f32.mrb[16].mxu1  ;;  %8651 = vmatpush1.bf16.msra.mxu0 %v12487_v0 }
 0x475   :  { %v10030_v56 = vadd.f32 %v6640_v34, %v12560_v18  ;;  %v10062_v42 = vadd.f32 %v7996_v30, %v12562_v19  ;;  %v6642_v28 = vpop.f32.mrb[17].mxu0  ;;  %v7998_v58 = vpop.f32.mrb[17].mxu1  ;;  %8652 = vmatprep.subr.bf16.mxu0 %v12491_v48 }
 0x476   :  { %v10031_v33 = vadd.f32 %v6642_v28, %v12566_v20  ;;  %v10063_v44 = vadd.f32 %v7998_v58, %v12568_v21  ;;  %v6644_v35 = vpop.f32.mrb[18].mxu0  ;;  %v8000_v31 = vpop.f32.mrb[18].mxu1  ;;  %8589 = vmatprep.mubr.bf16.mxu0 %v8112_v15 }
 0x477   :  { %v10032_v39 = vadd.f32 %v6644_v35, %v12560_v18  ;;  %v10064_v40 = vadd.f32 %v8000_v31, %v12562_v19  ;;  %v6646_v0 = vpop.f32.mrb[19].mxu0  ;;  %v8002_v41 = vpop.f32.mrb[19].mxu1  ;;  %8590 = vmatmul.mubr.bf16.gmra.mrb[44].mxu0 %v8111_v22  ;;  %v8067_v48 = vmax.f32 %v10030_v56, 0.0  ;;  %v8069_v36 = vmax.f32 %v10062_v42, 0.0 }
 0x478   :  { %v10033_v43 = vadd.f32 %v6646_v0, %v12566_v20  ;;  %v10065_v50 = vadd.f32 %v8002_v41, %v12568_v21  ;;  %8653 = vmatpush1.bf16.msra.mxu0 %v12493_v51  ;;  %v8068_v52 = vmax.f32 %v10031_v33, 0.0  ;;  %v8070_v47 = vmax.f32 %v10063_v44, 0.0 }
 0x479   :  { %v8071_v45 = vmax.f32 %v10032_v39, 0.0  ;;  %v8073_v46 = vmax.f32 %v10064_v40, 0.0  ;;  %8654 = vmatprep.subr.bf16.mxu0 %v12497_v54 }
 0x47a   :  { %v8072_v38 = vmax.f32 %v10033_v43, 0.0  ;;  %v8074_v49 = vmax.f32 %v10065_v50, 0.0 }
 0x47b   :  { %v8115_v53 = vpack.c.bf16 %v8071_v45, %v8067_v48  ;;  %v8117_v55 = vpack.c.bf16 %v8073_v46, %v8069_v36 }
 0x47c   :  { %v8116_v11 = vpack.c.bf16 %v8072_v38, %v8068_v52  ;;  %v8118_v14 = vpack.c.bf16 %v8074_v49, %v8070_v47  ;;  %v6650_v22 = vpop.f32.mrb[20].mxu0  ;;  %v8006_v15 = vpop.f32.mrb[20].mxu1  ;;  %8655 = vmatpush1.bf16.msra.mxu0 %v12499_v57 }
 0x47d   :  { %v10034_v51 = vadd.f32 %v6650_v22, %v12560_v18  ;;  %v10066_v34 = vadd.f32 %v8006_v15, %v12562_v19  ;;  %v6652_v30 = vpop.f32.mrb[21].mxu0  ;;  %v8008_v56 = vpop.f32.mrb[21].mxu1  ;;  %8656 = vmatprep.subr.bf16.mxu0 %v12504_v59 }
 0x47e   :  { %v10035_v54 = vadd.f32 %v6652_v30, %v12566_v20  ;;  %v10067_v42 = vadd.f32 %v8008_v56, %v12568_v21  ;;  %v6654_v28 = vpop.f32.mrb[22].mxu0  ;;  %v8010_v58 = vpop.f32.mrb[22].mxu1  ;;  %8599 = vmatprep.mubr.bf16.mxu0 %v8116_v11  ;;  %8712 = vmatprep.mubr.bf16.mxu1 %v8118_v14 }
 0x47f   :  { %v10036_v33 = vadd.f32 %v6654_v28, %v12560_v18  ;;  %v10068_v57 = vadd.f32 %v8010_v58, %v12562_v19  ;;  %v6656_v44 = vpop.f32.mrb[23].mxu0  ;;  %v8012_v35 = vpop.f32.mrb[23].mxu1  ;;  %8600 = vmatmul.mubr.bf16.gmra.mrb[48].mxu0 %v8115_v53  ;;  %8713 = vmatmul.mubr.bf16.vlgmr.msra.gmra.mrb[32].mxu1 %v8117_v55  ;;  %v8075_v39 = vmax.f32 %v10034_v51, 0.0  ;;  %v8077_v40 = vmax.f32 %v10066_v34, 0.0 }
 0x480   :  { %v10037_v31 = vadd.f32 %v6656_v44, %v12566_v20  ;;  %v10069_v59 = vadd.f32 %v8012_v35, %v12568_v21  ;;  %8657 = vmatpush1.bf16.msra.mxu0 %v12506_v60  ;;  %v8076_v43 = vmax.f32 %v10035_v54, 0.0  ;;  %v8078_v50 = vmax.f32 %v10067_v42, 0.0 }
 0x481   :  { %v8079_v0 = vmax.f32 %v10036_v33, 0.0  ;;  %v8081_v41 = vmax.f32 %v10068_v57, 0.0  ;;  %8658 = vmatprep.subr.bf16.mxu0 %v12510_v61 }
 0x482   :  { %v8080_v48 = vmax.f32 %v10037_v31, 0.0  ;;  %v8082_v36 = vmax.f32 %v10069_v59, 0.0 }
 0x483   :  { %v8119_v45 = vpack.c.bf16 %v8079_v0, %v8075_v39  ;;  %v8121_v46 = vpack.c.bf16 %v8081_v41, %v8077_v40 }
 0x484   :  { %v8120_v52 = vpack.c.bf16 %v8080_v48, %v8076_v43  ;;  %v8122_v47 = vpack.c.bf16 %v8082_v36, %v8078_v50  ;;  %v6660_v38 = vpop.f32.mrb[24].mxu0  ;;  %v8016_v49 = vpop.f32.mrb[24].mxu1  ;;  %8659 = vmatpush1.bf16.msra.mxu0 %v12512_v62 }
 0x485   :  { %v10038_v60 = vadd.f32 %v6660_v38, %v12560_v18  ;;  %v10070_v53 = vadd.f32 %v8016_v49, %v12562_v19  ;;  %v6662_v55 = vpop.f32.mrb[25].mxu0  ;;  %v8018_v11 = vpop.f32.mrb[25].mxu1  ;;  %8660 = vmatprep.subr.bf16.mxu0 %v12516_v63 }
 0x486   :  { %v10039_v61 = vadd.f32 %v6662_v55, %v12566_v20  ;;  %v10071_v14 = vadd.f32 %v8018_v11, %v12568_v21  ;;  %v6664_v22 = vpop.f32.mrb[26].mxu0  ;;  %v8020_v15 = vpop.f32.mrb[26].mxu1  ;;  %8609 = vmatprep.mubr.bf16.mxu0 %v8120_v52  ;;  %8722 = vmatprep.mubr.bf16.mxu1 %v8122_v47 }
 0x487   :  { %v10040_v51 = vadd.f32 %v6664_v22, %v12560_v18  ;;  %v10072_v62 = vadd.f32 %v8020_v15, %v12562_v19  ;;  %v6666_v34 = vpop.f32.mrb[27].mxu0  ;;  %v8022_v30 = vpop.f32.mrb[27].mxu1  ;;  %8610 = vmatmul.mubr.bf16.gmra.mrb[52].mxu0 %v8119_v45  ;;  %8723 = vmatmul.mubr.bf16.gmra.mrb[36].mxu1 %v8121_v46  ;;  %v8083_v54 = vmax.f32 %v10038_v60, 0.0  ;;  %v8085_v42 = vmax.f32 %v10070_v53, 0.0 }
 0x488   :  { %v10041_v56 = vadd.f32 %v6666_v34, %v12566_v20  ;;  %v10073_v63 = vadd.f32 %v8022_v30, %v12568_v21  ;;  %8661 = vmatpush1.bf16.msra.mxu0 %v12518_v1  ;;  %v8084_v33 = vmax.f32 %v10039_v61, 0.0  ;;  %v8086_v57 = vmax.f32 %v10071_v14, 0.0 }
 0x489   :  { %v8087_v28 = vmax.f32 %v10040_v51, 0.0  ;;  %v8089_v58 = vmax.f32 %v10072_v62, 0.0  ;;  %8662 = vmatprep.subr.bf16.mxu0 %v12522_v24 }
 0x48a   :  { %v8088_v44 = vmax.f32 %v10041_v56, 0.0  ;;  %v8090_v35 = vmax.f32 %v10073_v63, 0.0 }
 0x48b   :  { %v8123_v31 = vpack.c.bf16 %v8087_v28, %v8083_v54  ;;  %v8125_v59 = vpack.c.bf16 %v8089_v58, %v8085_v42 }
 0x48c   :  { %v8124_v39 = vpack.c.bf16 %v8088_v44, %v8084_v33  ;;  %v8126_v40 = vpack.c.bf16 %v8090_v35, %v8086_v57  ;;  %v6670_v0 = vpop.f32.mrb[28].mxu0  ;;  %v8026_v41 = vpop.f32.mrb[28].mxu1  ;;  %8663 = vmatpush1.bf16.msra.mxu0 %v12524_v2 }
 0x48d   :  { %v10042_v1 = vadd.f32 %v6670_v0, %v12560_v18  ;;  %v10074_v43 = vadd.f32 %v8026_v41, %v12562_v19  ;;  %v6672_v50 = vpop.f32.mrb[29].mxu0  ;;  %v8028_v48 = vpop.f32.mrb[29].mxu1  ;;  %8664 = vmatprep.subr.bf16.mxu0 %v12528_v3 }
 0x48e   :  { %v10043_v24 = vadd.f32 %v6672_v50, %v12566_v20  ;;  %v10075_v36 = vadd.f32 %v8028_v48, %v12568_v21  ;;  %v6674_v45 = vpop.f32.mrb[30].mxu0  ;;  %v8030_v46 = vpop.f32.mrb[30].mxu1  ;;  %8619 = vmatprep.mubr.bf16.mxu0 %v8124_v39  ;;  %8732 = vmatprep.mubr.bf16.mxu1 %v8126_v40 }
 0x48f   :  { %v10044_v52 = vadd.f32 %v6674_v45, %v12560_v18  ;;  %v10076_v2 = vadd.f32 %v8030_v46, %v12562_v19  ;;  %v6676_v47 = vpop.f32.mrb[31].mxu0  ;;  %v8032_v38 = vpop.f32.mrb[31].mxu1  ;;  %8620 = vmatmul.mubr.bf16.gmra.mrb[56].mxu0 %v8123_v31  ;;  %8733 = vmatmul.mubr.bf16.gmra.mrb[40].mxu1 %v8125_v59  ;;  %v8091_v60 = vmax.f32 %v10042_v1, 0.0  ;;  %v8093_v53 = vmax.f32 %v10074_v43, 0.0 }
 0x490   :  { %v10045_v49 = vadd.f32 %v6676_v47, %v12566_v20  ;;  %v10077_v3 = vadd.f32 %v8032_v38, %v12568_v21  ;;  %8665 = vmatpush1.bf16.msra.mxu0 %v12530_v4  ;;  %v8092_v61 = vmax.f32 %v10043_v24, 0.0  ;;  %v8094_v18 = vmax.f32 %v10075_v36, 0.0  ;;  %v12110_v4 = vld [vmem:[#allocation11 + $0x40] sm:$0xff]   ;;  %v12117_v20 = vld [vmem:[#allocation11 + $0x18] sm:$0xff]  }
 0x491   :  { %v8095_v55 = vmax.f32 %v10044_v52, 0.0  ;;  %v8097_v11 = vmax.f32 %v10076_v2, 0.0  ;;  %8666 = vmatprep.subr.bf16.mxu0 %v12534_v5  ;;  %v12111_v5 = vld [vmem:[#allocation11] sm:$0xff]   ;;  %9918 = vmatprep.subr.bf16.mxu1 %v12110_v4 }
 0x492   :  { %v8096_v14 = vmax.f32 %v10045_v49, 0.0  ;;  %v8098_v19 = vmax.f32 %v10077_v3, 0.0  ;;  %9919 = vmatpush3.bf16.msra.mxu1 %v12111_v5  ;;  %v12118_v21 = vld [vmem:[#allocation11 + $0x60] sm:$0xff]  }
 0x493   :  { %v8127_v22 = vpack.c.bf16 %v8095_v55, %v8091_v60  ;;  %v8129_v15 = vpack.c.bf16 %v8097_v11, %v8093_v53 }
 0x494   :  { %v8128_v51 = vpack.c.bf16 %v8096_v14, %v8092_v61  ;;  %v8130_v62 = vpack.c.bf16 %v8098_v19, %v8094_v18  ;;  %8667 = vmatpush1.bf16.msra.mxu0 %v12536_v6  ;;  %v12112_v6 = vld [vmem:[#allocation11 + $0x48] sm:$0xff]  }
 0x495   :  { %8668 = vmatprep.subr.bf16.mxu0 %v12540_v7  ;;  %v12113_v7 = vld [vmem:[#allocation11 + $0x8] sm:$0xff]   ;;  %9920 = vmatprep.subr.bf16.mxu1 %v12112_v6 }
 0x496   :  { %8629 = vmatprep.mubr.bf16.mxu0 %v8128_v51  ;;  %8742 = vmatprep.mubr.bf16.mxu1 %v8130_v62 }
 0x497   :  { %8630 = vmatmul.mubr.bf16.gmra.mrb[60].mxu0 %v8127_v22  ;;  %8743 = vmatmul.mubr.bf16.gmra.mrb[44].mxu1 %v8129_v15 }
 0x498   :  { %8669 = vmatpush1.bf16.msra.mxu0 %v12542_v8  ;;  %8672 = vmatprep.mubr.bf16.mxu0 %v12580_v23  ;;  %v12114_v8 = vld [vmem:[#allocation11 + $0x50] sm:$0xff]   ;;  %v12120_v23 = vld [vmem:[#allocation11 + $0x68] sm:$0xff]  }
 0x499   :  { %8670 = vmatprep.subr.bf16.mxu0 %v12546_v9  ;;  %9921 = vmatpush3.bf16.msra.mxu1 %v12113_v7  ;;  %v12115_v9 = vld [vmem:[#allocation11 + $0x10] sm:$0xff]  }
 0x49a   :  { %9922 = vmatprep.subr.bf16.mxu1 %v12114_v8 }
 0x49c   :  { %8671 = vmatpush1.bf16.msra.mxu0 %v12548_v10  ;;  %v12116_v10 = vld [vmem:[#allocation11 + $0x58] sm:$0xff]  }
 0x49d   :  { %9923 = vmatpush3.bf16.msra.mxu1 %v12115_v9 }
 0x49e   :  { %9924 = vmatprep.subr.bf16.mxu1 %v12116_v10 }
 0x49f   :  { %8673 = vmatmul.mubr.bf16.vlgmr.msra.gmra.mrb[32].mxu0 %v12578_v17  ;;  %v12119_v17 = vld [vmem:[#allocation11 + $0x20] sm:$0xff]  }
 0x4a0   :  { %8682 = vmatprep.mubr.bf16.mxu0 %v12594_v26  ;;  %v12122_v26 = vld [vmem:[#allocation11 + $0x70] sm:$0xff]  }
 0x4a1   :  { %9925 = vmatpush3.bf16.msra.mxu1 %v12117_v20 }
 0x4a2   :  { %9926 = vmatprep.subr.bf16.mxu1 %v12118_v21 }
 0x4a5   :  { %9927 = vmatpush3.bf16.msra.mxu1 %v12119_v17 }
 0x4a6   :  { %9928 = vmatprep.subr.bf16.mxu1 %v12120_v23 }
 0x4a7   :  { %8683 = vmatmul.mubr.bf16.gmra.mrb[36].mxu0 %v12592_v25  ;;  %v12121_v25 = vld [vmem:[#allocation11 + $0x28] sm:$0xff]  }
 0x4a8   :  { %8692 = vmatprep.mubr.bf16.mxu0 %v12610_v37  ;;  %v12124_v37 = vld [vmem:[#allocation11 + $0x78] sm:$0xff]  }
 0x4a9   :  { %9929 = vmatpush3.bf16.msra.mxu1 %v12121_v25 }
 0x4aa   :  { %9930 = vmatprep.subr.bf16.mxu1 %v12122_v26 }
 0x4af   :  { %8693 = vmatmul.mubr.bf16.gmra.mrb[40].mxu0 %v12608_v32  ;;  %v12123_v32 = vld [vmem:[#allocation11 + $0x30] sm:$0xff]  }
 0x4b0   :  { %8702 = vmatprep.mubr.bf16.mxu0 %v12626_v29  ;;  %9931 = vmatpush3.bf16.msra.mxu1 %v12123_v32  ;;  %v8195_v29 = vld [vmem:[#allocation10] sm:$0x3] }
 0x4b1   :  { %9932 = vmatprep.subr.bf16.mxu1 %v12124_v37  ;;  %v12691_v34 = vrot.slane %v8195_v29, %v1465_v13  ;;  %v12695_v30 = vrot.slane %v8195_v29, %v1469_v16 }
 0x4b7   :  { %8703 = vmatmul.mubr.bf16.gmra.mrb[44].mxu0 %v12624_v27  ;;  %v12125_v27 = vld [vmem:[#allocation11 + $0x38] sm:$0xff]  }
 0x4b8   :  { %9933 = vmatpush3.bf16.msra.mxu1 %v12125_v27 }
 0x552   :  { %v8601_v56 = vpop.f32.mrb[48].mxu0  ;;  %v8714_v63 = vpop.f32.mrb[32].mxu1 }
 0x553   :  { %v8602_v54 = vadd.f32 %v8601_v56, %v12691_v34  ;;  %v8603_v42 = vpop.f32.mrb[49].mxu0  ;;  %v8716_v28 = vpop.f32.mrb[33].mxu1 }
 0x554   :  { %v8604_v58 = vadd.f32 %v8603_v42, %v12695_v30  ;;  %v8605_v33 = vpop.f32.mrb[50].mxu0  ;;  %v8718_v57 = vpop.f32.mrb[34].mxu1 }
 0x555   :  { %v8715_v44 = vadd.f32 %v8714_v63, %v8602_v54  ;;  %v8606_v35 = vadd.f32 %v8605_v33, %v12691_v34  ;;  %v8607_v31 = vpop.f32.mrb[51].mxu0  ;;  %v8720_v13 = vpop.f32.mrb[35].mxu1 }
 0x556   :  { %v8717_v59 = vadd.f32 %v8716_v28, %v8604_v58  ;;  %v8608_v12 = vadd.f32 %v8607_v31, %v12695_v30 }
 0x557   :  { %v8719_v16 = vadd.f32 %v8718_v57, %v8606_v35  ;;  %v8769_v40 = vmax.f32 %v8715_v44, 0.0 }
 0x558   :  { %v8721_v39 = vadd.f32 %v8720_v13, %v8608_v12  ;;  %v8770_v41 = vmax.f32 %v8717_v59, 0.0 }
 0x559   :  { %v8771_v0 = vmax.f32 %v8719_v16, 0.0 }
 0x55a   :  { %v8772_v1 = vmax.f32 %v8721_v39, 0.0  ;;  %v8611_v43 = vpop.f32.mrb[52].mxu0  ;;  %v8724_v50 = vpop.f32.mrb[36].mxu1 }
 0x55b   :  { %v12701_v48 = vpack.c.bf16 %v8771_v0, %v8769_v40  ;;  %v8612_v24 = vadd.f32 %v8611_v43, %v12691_v34  ;;  %v8613_v36 = vpop.f32.mrb[53].mxu0  ;;  %v8726_v45 = vpop.f32.mrb[37].mxu1 }
 0x55c   :  { %v12704_v46 = vpack.c.bf16 %v8772_v1, %v8770_v41  ;;  %v8614_v52 = vadd.f32 %v8613_v36, %v12695_v30  ;;  %v8615_v2 = vpop.f32.mrb[54].mxu0  ;;  %v8728_v47 = vpop.f32.mrb[38].mxu1 }
 0x55d   :  { %v8725_v38 = vadd.f32 %v8724_v50, %v8612_v24  ;;  %v8616_v49 = vadd.f32 %v8615_v2, %v12691_v34  ;;  %v8617_v3 = vpop.f32.mrb[55].mxu0  ;;  %v8730_v60 = vpop.f32.mrb[39].mxu1 }
 0x55e   :  { %v8727_v53 = vadd.f32 %v8726_v45, %v8614_v52  ;;  %v8618_v55 = vadd.f32 %v8617_v3, %v12695_v30 }
 0x55f   :  { %v8729_v11 = vadd.f32 %v8728_v47, %v8616_v49  ;;  %v8773_v18 = vmax.f32 %v8725_v38, 0.0 }
 0x560   :  { %v8731_v61 = vadd.f32 %v8730_v60, %v8618_v55  ;;  %v8774_v19 = vmax.f32 %v8727_v53, 0.0 }
 0x561   :  { %v8775_v14 = vmax.f32 %v8729_v11, 0.0 }
 0x562   :  { %v8776_v22 = vmax.f32 %v8731_v61, 0.0  ;;  %v8621_v15 = vpop.f32.mrb[56].mxu0  ;;  %v8734_v51 = vpop.f32.mrb[40].mxu1 }
 0x563   :  { %v12709_v62 = vpack.c.bf16 %v8775_v14, %v8773_v18  ;;  %v8622_v4 = vadd.f32 %v8621_v15, %v12691_v34  ;;  %v8623_v5 = vpop.f32.mrb[57].mxu0  ;;  %v8736_v6 = vpop.f32.mrb[41].mxu1 }
 0x564   :  { %v12712_v7 = vpack.c.bf16 %v8776_v22, %v8774_v19  ;;  %v8624_v8 = vadd.f32 %v8623_v5, %v12695_v30  ;;  %v8625_v9 = vpop.f32.mrb[58].mxu0  ;;  %v8738_v10 = vpop.f32.mrb[42].mxu1 }
 0x565   :  { %v8735_v20 = vadd.f32 %v8734_v51, %v8622_v4  ;;  %v8626_v21 = vadd.f32 %v8625_v9, %v12691_v34  ;;  %v8627_v17 = vpop.f32.mrb[59].mxu0  ;;  %v8740_v23 = vpop.f32.mrb[43].mxu1 }
 0x566   :  { %v8737_v25 = vadd.f32 %v8736_v6, %v8624_v8  ;;  %v8628_v26 = vadd.f32 %v8627_v17, %v12695_v30 }
 0x567   :  { %v8739_v32 = vadd.f32 %v8738_v10, %v8626_v21  ;;  %v8777_v27 = vmax.f32 %v8735_v20, 0.0 }
 0x568   :  { %v8741_v37 = vadd.f32 %v8740_v23, %v8628_v26  ;;  %v8778_v56 = vmax.f32 %v8737_v25, 0.0 }
 0x569   :  { %v8779_v29 = vmax.f32 %v8739_v32, 0.0 }
 0x56a   :  { %v8780_v63 = vmax.f32 %v8741_v37, 0.0  ;;  %v8631_v54 = vpop.f32.mrb[60].mxu0  ;;  %v8744_v42 = vpop.f32.mrb[44].mxu1 }
 0x56b   :  { %v12717_v28 = vpack.c.bf16 %v8779_v29, %v8777_v27  ;;  %v8632_v58 = vadd.f32 %v8631_v54, %v12691_v34  ;;  %v8633_v33 = vpop.f32.mrb[61].mxu0  ;;  %v8746_v57 = vpop.f32.mrb[45].mxu1 }
 0x56c   :  { %v12720_v44 = vpack.c.bf16 %v8780_v63, %v8778_v56  ;;  %v8634_v35 = vadd.f32 %v8633_v33, %v12695_v30  ;;  %v8635_v31 = vpop.f32.mrb[62].mxu0  ;;  %v8748_v13 = vpop.f32.mrb[46].mxu1 }
 0x56d   :  { %v8745_v59 = vadd.f32 %v8744_v42, %v8632_v58  ;;  %v8636_v12 = vadd.f32 %v8635_v31, %v12691_v34  ;;  %v8637_v16 = vpop.f32.mrb[63].mxu0  ;;  %v8750_v39 = vpop.f32.mrb[47].mxu1 }
 0x56e   :  { %v8747_v40 = vadd.f32 %v8746_v57, %v8634_v35  ;;  %v8638_v0 = vadd.f32 %v8637_v16, %v12695_v30 }
 0x56f   :  { %v8749_v41 = vadd.f32 %v8748_v13, %v8636_v12  ;;  %v8781_v43 = vmax.f32 %v8745_v59, 0.0 }
 0x570   :  { %v8751_v1 = vadd.f32 %v8750_v39, %v8638_v0  ;;  %v8782_v24 = vmax.f32 %v8747_v40, 0.0 }
 0x571   :  { %v8783_v50 = vmax.f32 %v8749_v41, 0.0 }
 0x572   :  { %v8784_v36 = vmax.f32 %v8751_v1, 0.0  ;;  %v8674_v45 = vpop.f32.mrb[32].mxu0 }
 0x573   :  { %v12725_v52 = vpack.c.bf16 %v8783_v50, %v8781_v43  ;;  %v10078_v2 = vadd.f32 %v8674_v45, %v12691_v34  ;;  %v8676_v47 = vpop.f32.mrb[33].mxu0 }
 0x574   :  { %v12728_v38 = vpack.c.bf16 %v8784_v36, %v8782_v24  ;;  %v10079_v49 = vadd.f32 %v8676_v47, %v12695_v30  ;;  %v8678_v3 = vpop.f32.mrb[34].mxu0 }
 0x575   :  { %v10080_v60 = vadd.f32 %v8678_v3, %v12691_v34  ;;  %v8680_v53 = vpop.f32.mrb[35].mxu0  ;;  %v8753_v11 = vmax.f32 %v10078_v2, 0.0 }
 0x576   :  { %v10081_v55 = vadd.f32 %v8680_v53, %v12695_v30  ;;  %v8754_v18 = vmax.f32 %v10079_v49, 0.0 }
 0x577   :  { %v8755_v61 = vmax.f32 %v10080_v60, 0.0 }
 0x578   :  { %v8756_v14 = vmax.f32 %v10081_v55, 0.0 }
 0x579   :  { %v8785_v19 = vpack.c.bf16 %v8755_v61, %v8753_v11 }
 0x57a   :  { %v8786_v22 = vpack.c.bf16 %v8756_v14, %v8754_v18  ;;  %v8684_v15 = vpop.f32.mrb[36].mxu0 }
 0x57b   :  { %v10082_v51 = vadd.f32 %v8684_v15, %v12691_v34  ;;  %v8686_v4 = vpop.f32.mrb[37].mxu0 }
 0x57c   :  { %v10083_v5 = vadd.f32 %v8686_v4, %v12695_v30  ;;  %v8688_v6 = vpop.f32.mrb[38].mxu0  ;;  %8968 = vmatprep.mubr.bf16.mxu1 %v8786_v22 }
 0x57d   :  { %v10084_v8 = vadd.f32 %v8688_v6, %v12691_v34  ;;  %v8690_v9 = vpop.f32.mrb[39].mxu0  ;;  %8969 = vmatmul.mubr.bf16.vlgmr.msra.gmra.mrb[48].mxu1 %v8785_v19  ;;  %v8757_v20 = vmax.f32 %v10082_v51, 0.0 }
 0x57e   :  { %v10085_v10 = vadd.f32 %v8690_v9, %v12695_v30  ;;  %v8758_v17 = vmax.f32 %v10083_v5, 0.0 }
 0x57f   :  { %v8759_v21 = vmax.f32 %v10084_v8, 0.0 }
 0x580   :  { %v8760_v23 = vmax.f32 %v10085_v10, 0.0 }
 0x581   :  { %v8787_v25 = vpack.c.bf16 %v8759_v21, %v8757_v20 }
 0x582   :  { %v8788_v26 = vpack.c.bf16 %v8760_v23, %v8758_v17  ;;  %v8694_v32 = vpop.f32.mrb[40].mxu0 }
 0x583   :  { %v10086_v37 = vadd.f32 %v8694_v32, %v12691_v34  ;;  %v8696_v27 = vpop.f32.mrb[41].mxu0 }
 0x584   :  { %v10087_v29 = vadd.f32 %v8696_v27, %v12695_v30  ;;  %v8698_v56 = vpop.f32.mrb[42].mxu0  ;;  %8976 = vmatprep.mubr.bf16.mxu1 %v8788_v26 }
 0x585   :  { %v10088_v63 = vadd.f32 %v8698_v56, %v12691_v34  ;;  %v8700_v54 = vpop.f32.mrb[43].mxu0  ;;  %8977 = vmatmul.mubr.bf16.gmra.mrb[52].mxu1 %v8787_v25  ;;  %v8761_v58 = vmax.f32 %v10086_v37, 0.0 }
 0x586   :  { %v10089_v42 = vadd.f32 %v8700_v54, %v12695_v30  ;;  %v8762_v57 = vmax.f32 %v10087_v29, 0.0 }
 0x587   :  { %v8763_v33 = vmax.f32 %v10088_v63, 0.0 }
 0x588   :  { %v8764_v35 = vmax.f32 %v10089_v42, 0.0 }
 0x589   :  { %v8789_v31 = vpack.c.bf16 %v8763_v33, %v8761_v58 }
 0x58a   :  { %v8790_v13 = vpack.c.bf16 %v8764_v35, %v8762_v57  ;;  %v8704_v59 = vpop.f32.mrb[44].mxu0 }
 0x58b   :  { %v10090_v12 = vadd.f32 %v8704_v59, %v12691_v34  ;;  %v8706_v16 = vpop.f32.mrb[45].mxu0 }
 0x58c   :  { %v10091_v39 = vadd.f32 %v8706_v16, %v12695_v30  ;;  %v8708_v40 = vpop.f32.mrb[46].mxu0  ;;  %8984 = vmatprep.mubr.bf16.mxu1 %v8790_v13 }
 0x58d   :  { %v10092_v0 = vadd.f32 %v8708_v40, %v12691_v34  ;;  %v8710_v41 = vpop.f32.mrb[47].mxu0  ;;  %8985 = vmatmul.mubr.bf16.gmra.mrb[56].mxu1 %v8789_v31  ;;  %v8765_v43 = vmax.f32 %v10090_v12, 0.0 }
 0x58e   :  { %v10093_v1 = vadd.f32 %v8710_v41, %v12695_v30  ;;  %v8766_v24 = vmax.f32 %v10091_v39, 0.0  ;;  %v12753_v30 = vld [vmem:[#allocation13] ss:$0 sm:$0xff] }
 0x58f   :  { %v8767_v50 = vmax.f32 %v10092_v0, 0.0 }
 0x590   :  { %v8768_v36 = vmax.f32 %v10093_v1, 0.0 }
 0x591   :  { %v8791_v45 = vpack.c.bf16 %v8767_v50, %v8765_v43 }
 0x592   :  { %v8792_v2 = vpack.c.bf16 %v8768_v36, %v8766_v24 }
 0x594   :  { %8992 = vmatprep.mubr.bf16.mxu1 %v8792_v2 }
 0x595   :  { %8993 = vmatmul.mubr.bf16.gmra.mrb[60].mxu1 %v8791_v45 }
 0x596   :  { %9000 = vmatprep.mubr.bf16.mxu1 %v12704_v46 }
 0x59d   :  { %9001 = vmatmul.mubr.bf16.gmra.mrb[64].mxu1 %v12701_v48 }
 0x59e   :  { %9008 = vmatprep.mubr.bf16.mxu1 %v12712_v7 }
 0x5a5   :  { %9009 = vmatmul.mubr.bf16.gmra.mrb[68].mxu1 %v12709_v62 }
 0x5a6   :  { %9016 = vmatprep.mubr.bf16.mxu1 %v12720_v44 }
 0x5ad   :  { %9017 = vmatmul.mubr.bf16.gmra.mrb[72].mxu1 %v12717_v28 }
 0x5ae   :  { %9024 = vmatprep.mubr.bf16.mxu1 %v12728_v38 }
 0x5b5   :  { %9025 = vmatmul.mubr.bf16.gmra.mrb[76].mxu1 %v12725_v52 }
 0x650   :  { %v9934_v34 = vpop.f32.mrb[48].mxu1 }
 0x651   :  { %v9935_v47 = vpop.f32.mrb[49].mxu1 }
 0x652   :  { %v9936_v49 = vadd.f32 %v9935_v47, %v9934_v34  ;;  %v9937_v46 = vpop.f32.mrb[50].mxu1 }
 0x653   :  { %v9938_v3 = vpop.f32.mrb[51].mxu1 }
 0x654   :  { %v8971_v48 = vadd.f32 %v9936_v49, %v12753_v30  ;;  %v9939_v7 = vadd.f32 %v9938_v3, %v9937_v46 }
 0x656   :  { %9033 = vst [vmem:[#allocation14] sm:$0xff] %v8971_v48  ;;  %v8974_v62 = vadd.f32 %v9939_v7, %v12753_v30 }
 0x658   :  { %9034 = vst [vmem:[#allocation14 + $0x8] sm:$0xff] %v8974_v62  ;;  %v9940_v44 = vpop.f32.mrb[52].mxu1 }
 0x659   :  { %v9941_v28 = vpop.f32.mrb[53].mxu1 }
 0x65a   :  { %v9942_v60 = vadd.f32 %v9941_v28, %v9940_v44  ;;  %v9943_v38 = vpop.f32.mrb[54].mxu1 }
 0x65b   :  { %v9944_v53 = vpop.f32.mrb[55].mxu1 }
 0x65c   :  { %v8979_v52 = vadd.f32 %v9942_v60, %v12753_v30  ;;  %v9945_v55 = vadd.f32 %v9944_v53, %v9943_v38 }
 0x65e   :  { %9035 = vst [vmem:[#allocation14 + $0x10] sm:$0xff] %v8979_v52  ;;  %v8982_v11 = vadd.f32 %v9945_v55, %v12753_v30 }
 0x660   :  { %9036 = vst [vmem:[#allocation14 + $0x18] sm:$0xff] %v8982_v11  ;;  %v9946_v61 = vpop.f32.mrb[56].mxu1 }
 0x661   :  { %v9947_v18 = vpop.f32.mrb[57].mxu1 }
 0x662   :  { %v9948_v14 = vadd.f32 %v9947_v18, %v9946_v61  ;;  %v9949_v19 = vpop.f32.mrb[58].mxu1 }
 0x663   :  { %v9950_v22 = vpop.f32.mrb[59].mxu1 }
 0x664   :  { %v8987_v15 = vadd.f32 %v9948_v14, %v12753_v30  ;;  %v9951_v51 = vadd.f32 %v9950_v22, %v9949_v19 }
 0x666   :  { %9037 = vst [vmem:[#allocation14 + $0x20] sm:$0xff] %v8987_v15  ;;  %v8990_v4 = vadd.f32 %v9951_v51, %v12753_v30 }
 0x668   :  { %9038 = vst [vmem:[#allocation14 + $0x28] sm:$0xff] %v8990_v4  ;;  %v9952_v5 = vpop.f32.mrb[60].mxu1 }
 0x669   :  { %v9953_v6 = vpop.f32.mrb[61].mxu1 }
 0x66a   :  { %v9954_v8 = vadd.f32 %v9953_v6, %v9952_v5  ;;  %v9955_v9 = vpop.f32.mrb[62].mxu1 }
 0x66b   :  { %v9956_v10 = vpop.f32.mrb[63].mxu1 }
 0x66c   :  { %v8995_v20 = vadd.f32 %v9954_v8, %v12753_v30  ;;  %v9957_v21 = vadd.f32 %v9956_v10, %v9955_v9 }
 0x66e   :  { %9039 = vst [vmem:[#allocation14 + $0x30] sm:$0xff] %v8995_v20  ;;  %v8998_v17 = vadd.f32 %v9957_v21, %v12753_v30 }
 0x670   :  { %9040 = vst [vmem:[#allocation14 + $0x38] sm:$0xff] %v8998_v17  ;;  %v9958_v23 = vpop.f32.mrb[64].mxu1 }
 0x671   :  { %v9959_v25 = vpop.f32.mrb[65].mxu1 }
 0x672   :  { %v9960_v26 = vadd.f32 %v9959_v25, %v9958_v23  ;;  %v9961_v32 = vpop.f32.mrb[66].mxu1 }
 0x673   :  { %v9962_v37 = vpop.f32.mrb[67].mxu1 }
 0x674   :  { %v9003_v27 = vadd.f32 %v9960_v26, %v12753_v30  ;;  %v9963_v29 = vadd.f32 %v9962_v37, %v9961_v32 }
 0x676   :  { %9041 = vst [vmem:[#allocation14 + $0x40] sm:$0xff] %v9003_v27  ;;  %v9006_v56 = vadd.f32 %v9963_v29, %v12753_v30 }
 0x678   :  { %9042 = vst [vmem:[#allocation14 + $0x48] sm:$0xff] %v9006_v56  ;;  %v9964_v63 = vpop.f32.mrb[68].mxu1 }
 0x679   :  { %v9965_v54 = vpop.f32.mrb[69].mxu1 }
 0x67a   :  { %v9966_v42 = vadd.f32 %v9965_v54, %v9964_v63  ;;  %v9967_v58 = vpop.f32.mrb[70].mxu1 }
 0x67b   :  { %v9968_v33 = vpop.f32.mrb[71].mxu1 }
 0x67c   :  { %v9011_v57 = vadd.f32 %v9966_v42, %v12753_v30  ;;  %v9969_v35 = vadd.f32 %v9968_v33, %v9967_v58 }
 0x67e   :  { %9043 = vst [vmem:[#allocation14 + $0x50] sm:$0xff] %v9011_v57  ;;  %v9014_v31 = vadd.f32 %v9969_v35, %v12753_v30 }
 0x680   :  { %9044 = vst [vmem:[#allocation14 + $0x58] sm:$0xff] %v9014_v31  ;;  %v9970_v13 = vpop.f32.mrb[72].mxu1 }
 0x681   :  { %v9971_v59 = vpop.f32.mrb[73].mxu1 }
 0x682   :  { %v9972_v12 = vadd.f32 %v9971_v59, %v9970_v13  ;;  %v9973_v16 = vpop.f32.mrb[74].mxu1 }
 0x683   :  { %v9974_v39 = vpop.f32.mrb[75].mxu1 }
 0x684   :  { %v9019_v40 = vadd.f32 %v9972_v12, %v12753_v30  ;;  %v9975_v0 = vadd.f32 %v9974_v39, %v9973_v16 }
 0x686   :  { %9045 = vst [vmem:[#allocation14 + $0x60] sm:$0xff] %v9019_v40  ;;  %v9022_v41 = vadd.f32 %v9975_v0, %v12753_v30 }
 0x688   :  { %9046 = vst [vmem:[#allocation14 + $0x68] sm:$0xff] %v9022_v41  ;;  %v9976_v1 = vpop.f32.mrb[76].mxu1 }
 0x689   :  { %v9977_v43 = vpop.f32.mrb[77].mxu1 }
 0x68a   :  { %v9978_v50 = vadd.f32 %v9977_v43, %v9976_v1  ;;  %v9979_v24 = vpop.f32.mrb[78].mxu1 }
 0x68b   :  { %v9980_v36 = vpop.f32.mrb[79].mxu1 }
 0x68c   :  { %v9027_v45 = vadd.f32 %v9978_v50, %v12753_v30  ;;  %v9981_v2 = vadd.f32 %v9980_v36, %v9979_v24 }
 0x68e   :  { %9047 = vst [vmem:[#allocation14 + $0x70] sm:$0xff] %v9027_v45  ;;  %v9030_v34 = vadd.f32 %v9981_v2, %v12753_v30 }
 0x690   :  { %9048 = vst [vmem:[#allocation14 + $0x78] sm:$0xff] %v9030_v34 }
 0x691   :  { %12291 = shalt.err (!%p12288_p4)
}
 0x692   :  { %s12292_s21 = scalar_lea.hbm %s12793_s7, 2048 }
 0x693   :  { %p12293_p5 = scmp.ne.s32.totalorder %s12793_s7, %s12292_s21  ;;  %p12296_p6 = scmp.lt.u32.totalorder %s12292_s21, %s12793_s7 }
 0x695   :  { %p12298_p7 = pnand %p12296_p6, %p12293_p5 }
 0x697   :  { %12301 = shalt.err (!%p12298_p7)
}
 0x698   :  { %9060 = dma.vmem_to_hbm [thread:$0]  %s9055_s18, 2048, %s12793_s7, [#allocation4], %s12316_s1, %s12316_s1, %s12317_s25  }
 0x699   :  { %12310 = dma.done.wait [#allocation4], 2048  }
 0x69a   :  { %12311 = vsyncadd [#allocation4], 4294965248 }
 0x69b   :  { %9064 = vsyncpa [#allocation3], 1 }
 0x69c   :  { %9065 = vsyncpa [#allocation6], 1 }
 0x69d   :  { %9066 = vsyncpa [#allocation9], 1 }
 0x69e   :  { %9067 = vsyncpa [#allocation12], 1 }
 0x69f   :  { %9068 = vsyncpa [#allocation4], 1 }

</bundles_post_ra>
